<compile_context>
chip_gen: v7x
topology: tpu7x:2x2x1
jax: 0.10.0
libtpu: 0.0.40
codegen_flags: <defaults>
</compile_context>

<pallas_src>
import jax
import jax.numpy as jnp
import numpy as np
from jax.experimental import pallas as pl
from jax.experimental.pallas import tpu as pltpu


# ----------------------------- fused Pallas kernel -----------------------------

def _make_fused_kernel(num_layers, has_points1, mxu_dtype, approx_recip):
    """Build the fused interp+concat+MLP kernel for a fixed layer count."""

    def _recip(x):
        if approx_recip:
            return pl.reciprocal(x, approx=True)     # EUP slot, nearly free
        return 1.0 / x

    def kernel(*refs):
        i = 0
        xyz1 = refs[i][0].astype(jnp.float32); i += 1          # (3, TN)
        xyz2 = refs[i][0].astype(jnp.float32); i += 1          # (S, 3)
        if has_points1:
            p1 = refs[i][0]; i += 1                            # (D1, TN)  mxu dtype
        p2 = refs[i][0]; i += 1                                # (D2, S)   mxu dtype
        wrefs = refs[i:-1]
        out_ref = refs[-1]

        S = xyz2.shape[0]
        TN = xyz1.shape[1]

        # --- squared distances on the VPU (f32): d[s, n] = sum_c (x2[s,c]-x1[c,n])^2
        d = jnp.zeros((S, TN), jnp.float32)
        for c in range(3):
            diff = xyz2[:, c:c + 1] - xyz1[c:c + 1, :]         # (S, TN)
            d = d + diff * diff

        # --- 3 nearest neighbours via iterative min (stable first-occurrence) ---
        iota = jax.lax.broadcasted_iota(jnp.int32, (S, TN), 0)
        w_acc = jnp.zeros((S, TN), jnp.float32)                # 3 nonzeros / column
        w_sum = jnp.zeros((1, TN), jnp.float32)
        for _ in range(3):
            mn = jnp.min(d, axis=0, keepdims=True)             # (1, TN)
            sel = jnp.min(jnp.where(d <= mn, iota, S), axis=0, keepdims=True)
            onehot = iota == sel                               # (S, TN) exactly-one
            w_k = _recip(mn + 1e-8)                            # (1, TN)
            w_acc = jnp.where(onehot, w_k, w_acc)              # no convert+mul
            w_sum = w_sum + w_k
            d = jnp.where(onehot, jnp.float32(jnp.inf), d)

        # --- inverse-distance weighted gather as a sparse-weight matmul ---
        interp = jnp.dot(p2, w_acc.astype(mxu_dtype),
                         preferred_element_type=jnp.float32)   # (D2, TN) f32
        interp = interp * _recip(w_sum)

        # --- fused MLP chain (concat removed by splitting the first weight) ---
        wi = 0
        if has_points1:
            w1a = wrefs[wi][...]                               # (C1, D1)
            w1b = wrefs[wi + 1][...]                           # (C1, D2)
            b1 = wrefs[wi + 2][...]                            # (C1, 1) f32
            wi += 3
            h = (jnp.dot(w1a, p1, preferred_element_type=jnp.float32)
                 + jnp.dot(w1b, interp.astype(mxu_dtype),
                           preferred_element_type=jnp.float32)
                 + b1)
        else:
            w1 = wrefs[wi][...]
            b1 = wrefs[wi + 1][...]
            wi += 2
            h = jnp.dot(w1, interp.astype(mxu_dtype),
                        preferred_element_type=jnp.float32) + b1
        h = jnp.maximum(h, 0.0)

        for _ in range(1, num_layers):
            w_l = wrefs[wi][...]
            b_l = wrefs[wi + 1][...]
            wi += 2
            h = jnp.maximum(
                jnp.dot(w_l, h.astype(mxu_dtype),
                        preferred_element_type=jnp.float32) + b_l, 0.0)

        out_ref[0] = h.astype(out_ref.dtype)                   # (C_last, TN) lane-dense

    return kernel


# ----------------------------- pallas_call wrapper -----------------------------

def _pick_n_tile(N, max_tile=512):
    """Largest multiple-of-128 divisor of N that is <= max_tile (else N)."""
    if N % 128 != 0 or N <= 128:
        return N
    tn = 128
    while tn * 2 <= max_tile and N % (tn * 2) == 0:
        tn *= 2
    return tn


def _vmem_bytes_estimate(S, TN, D1, D2, weight_bytes, c_last, act_itemsize):
    """Rough live-VMEM estimate for one grid step (temporaries + 2x-buffered blocks)."""
    # in-kernel (S, TN) f32 temporaries: d, iota, onehot/sel, w_acc, diff  (~5 live)
    tmps = 5 * S * TN * 4
    # double-buffered streamed blocks
    blocks = 2 * (3 * TN * 4 + S * 3 * 4
                  + D1 * TN * act_itemsize + D2 * S * act_itemsize
                  + c_last * TN * 4)
    return tmps + blocks + 2 * weight_bytes


def pointnet_fp_forward(xyz1, xyz2, points1, points2, folded_params,
                        n_tile=None, precise=False):
    """
    xyz1: [B, 3, N], xyz2: [B, 3, S], points1: [B, D1, N] or None,
    points2: [B, D2, S]  ->  new_points: [B, C_last, N]   (all NCW, like PyTorch)

    precise=False (default): bf16 MXU operands + approx reciprocals (fast path).
    precise=True: all-f32 math, exact parity with the reference.
    """
    B, _, N = xyz1.shape
    S = xyz2.shape[2]
    D2 = points2.shape[1]
    has_p1 = points1 is not None
    D1 = points1.shape[1] if has_p1 else 0
    num_layers = len(folded_params)
    c_last = folded_params[-1][0].shape[0]

    mxu_dtype = jnp.float32 if precise else jnp.bfloat16
    act_isz = 2 if mxu_dtype == jnp.bfloat16 else 4

    # Physical VMEM (per TensorCore) gates tile size and the scoped limit.
    try:
        phys_vmem = int(pltpu.get_tpu_info().vmem_capacity_bytes)
    except Exception:
        phys_vmem = 64 * 1024 * 1024          # conservative: v7x per-TC VMEM
    vmem_budget = (3 * phys_vmem) // 4

    xyz2_sc = jnp.transpose(xyz2, (0, 2, 1))                   # [B, S, 3] (tiny)

    # Flat per-layer weights; first layer split so the kernel never concats.
    # Matmul weights fed to the MXU in bf16 (fast path); biases stay f32.
    def _wcast(w):
        return w.astype(mxu_dtype)

    w0, b0 = folded_params[0]
    if has_p1:
        weight_args = [_wcast(w0[:, :D1]), _wcast(w0[:, D1:]), b0]
    else:
        weight_args = [_wcast(w0), b0]
    for w, bvec in folded_params[1:]:
        weight_args += [_wcast(w), bvec]
    weight_bytes = sum(int(a.size) * a.dtype.itemsize for a in weight_args)

    # --- N-tile selection: big lane-dense tiles, VMEM-gated, megacore-aware ---
    if n_tile is None:
        TN = _pick_n_tile(N, max_tile=512)
        while (TN > 128 and TN % 2 == 0 and N % (TN // 2) == 0 and
               _vmem_bytes_estimate(S, TN, D1, D2, weight_bytes,
                                    c_last, act_isz) > vmem_budget):
            TN //= 2
        # keep >= 2 grid steps so both v7x TensorCores get work at small batch
        if B * (N // TN) < 2 and TN >= 256 and N % (TN // 2) == 0:
            TN //= 2
    else:
        if N % n_tile != 0:
            raise ValueError(f"n_tile={n_tile} must divide N={N}")
        TN = n_tile
    NT = N // TN

    est = _vmem_bytes_estimate(S, TN, D1, D2, weight_bytes, c_last, act_isz)
    vmem_limit = int(min(phys_vmem, max(32 * 1024 * 1024, int(1.5 * est))))

    p1_arg = points1.astype(mxu_dtype) if has_p1 else None
    p2_arg = points2.astype(mxu_dtype)

    def _full_spec(shape):
        nd = len(shape)
        return pl.BlockSpec(shape, lambda b, n, _nd=nd: (0,) * _nd)

    in_specs = [
        pl.BlockSpec((1, 3, TN), lambda b, n: (b, 0, n)),      # xyz1
        pl.BlockSpec((1, S, 3), lambda b, n: (b, 0, 0)),       # xyz2 (S, 3)
    ]
    in_args = [xyz1, xyz2_sc]
    if has_p1:
        in_specs.append(pl.BlockSpec((1, D1, TN), lambda b, n: (b, 0, n)))
        in_args.append(p1_arg)
    in_specs.append(pl.BlockSpec((1, D2, S), lambda b, n: (b, 0, 0)))
    in_args.append(p2_arg)
    in_specs += [_full_spec(a.shape) for a in weight_args]
    in_args += weight_args

    # Advisory cost estimate so XLA schedules surrounding ops around the call.
    flops = B * N * (8 * S + 2 * S * D2)
    cin = D1 + D2
    for w, _ in folded_params:
        cout = w.shape[0]
        flops += 2 * B * N * cin * cout
        cin = cout
    bytes_accessed = int(sum(int(a.size) * a.dtype.itemsize for a in in_args)
                         + B * c_last * N * 4)

    kernel = _make_fused_kernel(num_layers, has_p1, mxu_dtype,
                                approx_recip=not precise)

    return pl.pallas_call(
        kernel,
        out_shape=jax.ShapeDtypeStruct((B, c_last, N), jnp.float32),
        grid=(B, NT),
        in_specs=in_specs,
        out_specs=pl.BlockSpec((1, c_last, TN), lambda b, n: (b, 0, n)),
        compiler_params=pltpu.CompilerParams(
            dimension_semantics=("parallel", "parallel"),
            vmem_limit_bytes=vmem_limit),
        cost_estimate=pl.CostEstimate(flops=int(flops), transcendentals=0,
                                      bytes_accessed=bytes_accessed),
    )(*in_args)


# ----------------------------- parameters -----------------------------

def init_raw_params(key, in_channel, mlp):
    """Deterministic init matching Conv1d(c_in, c_out, 1) + BatchNorm1d(c_out)."""
    raw = []
    last = in_channel
    for out in mlp:
        key, k1, k2, k3, k4 = jax.random.split(key, 5)
        w_conv = 0.1 * jax.random.normal(k1, (out, last, 1), jnp.float32)
        b_conv = 0.1 * jax.random.normal(k2, (out,), jnp.float32)
        gamma = 1.0 + 0.1 * jax.random.normal(k3, (out,), jnp.float32)
        beta = 0.1 * jax.random.normal(k4, (out,), jnp.float32)
        mean = jnp.zeros((out,), jnp.float32)   # running_mean
        var = jnp.ones((out,), jnp.float32)     # running_var
        raw.append((w_conv, b_conv, gamma, beta, mean, var))
        last = out
    return raw


def fold_params(raw, eps=1e-5):
    """Fold BN (running stats) into the 1x1 conv: y = relu(W_eff @ x + b_eff)."""
    folded = []
    for (w_conv, b_conv, gamma, beta, mean, var) in raw:
        s = gamma / jnp.sqrt(var + eps)                 # (Cout,)
        w_eff = w_conv[:, :, 0] * s[:, None]            # (Cout, Cin)
        b_eff = ((b_conv - mean) * s + beta)[:, None]   # (Cout, 1)
        folded.append((w_eff, b_eff))
    return folded


# ----------------------------- pure-JAX reference -----------------------------

def ref_forward(xyz1, xyz2, points1, points2, raw, eps=1e-5):
    xyz1_t = jnp.transpose(xyz1, (0, 2, 1))
    xyz2_t = jnp.transpose(xyz2, (0, 2, 1))
    p2_t = jnp.transpose(points2, (0, 2, 1))
    B, N, _ = xyz1_t.shape
    S = xyz2_t.shape[1]
    if S == 1:
        interp = jnp.broadcast_to(p2_t, (B, N, p2_t.shape[-1]))
    else:
        # Squared pairwise distance computed per-coordinate; mathematically
        # identical to square_distance's ||x||^2+||y||^2-2x.y formulation.
        diff = xyz1_t[:, :, None, :] - xyz2_t[:, None, :, :]   # [B,N,S,3]
        d = jnp.sum(diff * diff, axis=-1)
        idx = jnp.argsort(d, axis=-1)[:, :, :3]
        dd = jnp.take_along_axis(d, idx, axis=-1)
        recip = 1.0 / (dd + 1e-8)
        w = recip / jnp.sum(recip, -1, keepdims=True)
        gathered = jax.vmap(lambda pts, i: pts[i])(p2_t, idx)  # [B,N,3,D2]
        interp = jnp.sum(gathered * w[..., None], axis=2)
    if points1 is not None:
        x = jnp.concatenate([jnp.transpose(points1, (0, 2, 1)), interp], -1)
    else:
        x = interp
    for (w_conv, b_conv, gamma, beta, mean, var) in raw:
        y = jnp.einsum('bnc,oc->bno', x, w_conv[:, :, 0]) + b_conv
        y = (y - mean) / jnp.sqrt(var + eps) * gamma + beta
        x = jnp.maximum(y, 0.0)
    return jnp.transpose(x, (0, 2, 1))


# ----------------------------- main -----------------------------

if __name__ == "__main__":
    B, N, S = 2, 512, 64
    D1, D2 = 16, 32
    in_channel = D1 + D2
    mlp = [64, 32]

    key = jax.random.PRNGKey(0)
    k_xyz1, k_xyz2, k_p1, k_p2, k_par = jax.random.split(key, 5)
    xyz1 = jax.random.normal(k_xyz1, (B, 3, N), jnp.float32)
    xyz2 = jax.random.normal(k_xyz2, (B, 3, S), jnp.float32)
    points1 = jax.random.normal(k_p1, (B, D1, N), jnp.float32)
    points2 = jax.random.normal(k_p2, (B, D2, S), jnp.float32)

    raw = init_raw_params(k_par, in_channel, mlp)
    folded = fold_params(raw)

    ref = jax.block_until_ready(ref_forward(xyz1, xyz2, points1, points2, raw))

    # Exact (all-f32) path: bit-close parity with the reference.
    out_precise = jax.block_until_ready(
        pointnet_fp_forward(xyz1, xyz2, points1, points2, folded, precise=True))
    assert out_precise.shape == (B, mlp[-1], N), out_precise.shape
    np.testing.assert_allclose(np.asarray(out_precise), np.asarray(ref),
                               rtol=1e-3, atol=1e-3)

    # Fast path (default): bf16 MXU feed + approx EUP reciprocals.
    out_fast = jax.block_until_ready(
        pointnet_fp_forward(xyz1, xyz2, points1, points2, folded))
    assert out_fast.shape == (B, mlp[-1], N), out_fast.shape
    np.testing.assert_allclose(np.asarray(out_fast), np.asarray(ref),
                               rtol=5e-2, atol=5e-2)

    print("KERNEL_OK")
</pallas_src>

<mosaic_0001>
module attributes {stable_mosaic.version = 11 : i64} {
  func.func @kernel(%arg0: i32, %arg1: i32, %arg2: memref<1x3x512xf32, #tpu.memory_space<vmem>>, %arg3: memref<1x64x3xf32, #tpu.memory_space<vmem>>, %arg4: memref<1x16x512xf32, #tpu.memory_space<vmem>>, %arg5: memref<1x32x64xf32, #tpu.memory_space<vmem>>, %arg6: memref<64x16xf32, #tpu.memory_space<vmem>>, %arg7: memref<64x32xf32, #tpu.memory_space<vmem>>, %arg8: memref<64x1xf32, #tpu.memory_space<vmem>>, %arg9: memref<32x64xf32, #tpu.memory_space<vmem>>, %arg10: memref<32x1xf32, #tpu.memory_space<vmem>>, %arg11: memref<1x32x512xf32, #tpu.memory_space<vmem>>) attributes {dimension_semantics = [#tpu.dimension_semantics<parallel>, #tpu.dimension_semantics<parallel>], iteration_bounds = array<i64: 2, 1>, scalar_prefetch = 0 : i64, scratch_operands = 0 : i64, tpu.core_type = #tpu.core_type<tc>, window_params = [{transform_indices = @transform_0, window_bounds = array<i64: 1, 3, 512>}, {transform_indices = @transform_1, window_bounds = array<i64: 1, 64, 3>}, {transform_indices = @transform_2, window_bounds = array<i64: 1, 16, 512>}, {transform_indices = @transform_3, window_bounds = array<i64: 1, 32, 64>}, {pipeline_mode = #tpu.pipeline_mode<synchronous>, transform_indices = @transform_4, window_bounds = array<i64: 64, 16>}, {pipeline_mode = #tpu.pipeline_mode<synchronous>, transform_indices = @transform_5, window_bounds = array<i64: 64, 32>}, {pipeline_mode = #tpu.pipeline_mode<synchronous>, transform_indices = @transform_6, window_bounds = array<i64: 64, 1>}, {pipeline_mode = #tpu.pipeline_mode<synchronous>, transform_indices = @transform_7, window_bounds = array<i64: 32, 64>}, {pipeline_mode = #tpu.pipeline_mode<synchronous>, transform_indices = @transform_8, window_bounds = array<i64: 32, 1>}, {transform_indices = @transform_9, window_bounds = array<i64: 1, 32, 512>}]} {
    %c0 = arith.constant 0 : index
    %c0_0 = arith.constant 0 : index
    %c0_1 = arith.constant 0 : index
    %0 = vector.load %arg2[%c0, %c0_0, %c0_1] : memref<1x3x512xf32, #tpu.memory_space<vmem>>, vector<1x3x512xf32>
    %1 = vector.shape_cast %0 : vector<1x3x512xf32> to vector<3x512xf32>
    %c0_2 = arith.constant 0 : index
    %c0_3 = arith.constant 0 : index
    %c0_4 = arith.constant 0 : index
    %2 = vector.load %arg3[%c0_2, %c0_3, %c0_4] : memref<1x64x3xf32, #tpu.memory_space<vmem>>, vector<1x64x3xf32>
    %3 = vector.shape_cast %2 : vector<1x64x3xf32> to vector<64x3xf32>
    %c0_5 = arith.constant 0 : index
    %c0_6 = arith.constant 0 : index
    %c0_7 = arith.constant 0 : index
    %4 = vector.load %arg4[%c0_5, %c0_6, %c0_7] : memref<1x16x512xf32, #tpu.memory_space<vmem>>, vector<1x16x512xf32>
    %5 = vector.shape_cast %4 : vector<1x16x512xf32> to vector<16x512xf32>
    %c0_8 = arith.constant 0 : index
    %c0_9 = arith.constant 0 : index
    %c0_10 = arith.constant 0 : index
    %6 = vector.load %arg5[%c0_8, %c0_9, %c0_10] : memref<1x32x64xf32, #tpu.memory_space<vmem>>, vector<1x32x64xf32>
    %7 = vector.shape_cast %6 : vector<1x32x64xf32> to vector<32x64xf32>
    %cst = arith.constant 0.000000e+00 : f32
    %8 = vector.broadcast %cst : f32 to vector<64x512xf32>
    %9 = vector.extract_strided_slice %3 {offsets = [0, 0], sizes = [64, 1], strides = [1, 1]} : vector<64x3xf32> to vector<64x1xf32>
    %10 = vector.extract_strided_slice %1 {offsets = [0, 0], sizes = [1, 512], strides = [1, 1]} : vector<3x512xf32> to vector<1x512xf32>
    %11 = vector.broadcast %9 : vector<64x1xf32> to vector<64x512xf32>
    %12 = vector.broadcast %10 : vector<1x512xf32> to vector<64x512xf32>
    %13 = arith.subf %11, %12 : vector<64x512xf32>
    %14 = arith.mulf %13, %13 : vector<64x512xf32>
    %15 = arith.addf %8, %14 : vector<64x512xf32>
    %16 = vector.extract_strided_slice %3 {offsets = [0, 1], sizes = [64, 1], strides = [1, 1]} : vector<64x3xf32> to vector<64x1xf32>
    %17 = vector.extract_strided_slice %1 {offsets = [1, 0], sizes = [1, 512], strides = [1, 1]} : vector<3x512xf32> to vector<1x512xf32>
    %18 = vector.broadcast %16 : vector<64x1xf32> to vector<64x512xf32>
    %19 = vector.broadcast %17 : vector<1x512xf32> to vector<64x512xf32>
    %20 = arith.subf %18, %19 : vector<64x512xf32>
    %21 = arith.mulf %20, %20 : vector<64x512xf32>
    %22 = arith.addf %15, %21 : vector<64x512xf32>
    %23 = vector.extract_strided_slice %3 {offsets = [0, 2], sizes = [64, 1], strides = [1, 1]} : vector<64x3xf32> to vector<64x1xf32>
    %24 = vector.extract_strided_slice %1 {offsets = [2, 0], sizes = [1, 512], strides = [1, 1]} : vector<3x512xf32> to vector<1x512xf32>
    %25 = vector.broadcast %23 : vector<64x1xf32> to vector<64x512xf32>
    %26 = vector.broadcast %24 : vector<1x512xf32> to vector<64x512xf32>
    %27 = arith.subf %25, %26 : vector<64x512xf32>
    %28 = arith.mulf %27, %27 : vector<64x512xf32>
    %29 = arith.addf %22, %28 : vector<64x512xf32>
    %30 = tpu.iota {dimensions = array<i32: 0>} : vector<64x512xi32>
    %cst_11 = arith.constant 0.000000e+00 : f32
    %31 = vector.broadcast %cst_11 : f32 to vector<64x512xf32>
    %cst_12 = arith.constant 0.000000e+00 : f32
    %32 = vector.broadcast %cst_12 : f32 to vector<1x512xf32>
    %cst_13 = arith.constant dense<0x7F800000> : vector<512xf32>
    %33 = vector.multi_reduction <minimumf>, %29, %cst_13 [0] : vector<64x512xf32> to vector<512xf32>
    %34 = vector.shape_cast %33 : vector<512xf32> to vector<1x512xf32>
    %35 = vector.broadcast %34 : vector<1x512xf32> to vector<64x512xf32>
    %36 = arith.cmpf ole, %29, %35 : vector<64x512xf32>
    %c64_i32 = arith.constant 64 : i32
    %37 = vector.broadcast %c64_i32 : i32 to vector<64x512xi32>
    %38 = arith.select %36, %30, %37 : vector<64x512xi1>, vector<64x512xi32>
    %cst_14 = arith.constant dense<2147483647> : vector<512xi32>
    %39 = vector.multi_reduction <minsi>, %38, %cst_14 [0] : vector<64x512xi32> to vector<512xi32>
    %40 = vector.shape_cast %39 : vector<512xi32> to vector<1x512xi32>
    %41 = vector.broadcast %40 : vector<1x512xi32> to vector<64x512xi32>
    %42 = arith.cmpi eq, %30, %41 : vector<64x512xi32>
    %cst_15 = arith.constant 9.99999993E-9 : f32
    %43 = vector.broadcast %cst_15 : f32 to vector<1x512xf32>
    %44 = arith.addf %34, %43 : vector<1x512xf32>
    %cst_16 = arith.constant 1.000000e+00 : f32
    %45 = vector.broadcast %cst_16 : f32 to vector<1x512xf32>
    %46 = arith.divf %45, %44 : vector<1x512xf32>
    %47 = vector.shape_cast %46 : vector<1x512xf32> to vector<1x512xf32>
    %48 = vector.broadcast %47 : vector<1x512xf32> to vector<64x512xf32>
    %49 = arith.select %42, %48, %31 : vector<64x512xi1>, vector<64x512xf32>
    %50 = arith.addf %32, %46 : vector<1x512xf32>
    %cst_17 = arith.constant 0x7F800000 : f32
    %51 = vector.broadcast %cst_17 : f32 to vector<64x512xf32>
    %52 = arith.select %42, %51, %29 : vector<64x512xi1>, vector<64x512xf32>
    %cst_18 = arith.constant dense<0x7F800000> : vector<512xf32>
    %53 = vector.multi_reduction <minimumf>, %52, %cst_18 [0] : vector<64x512xf32> to vector<512xf32>
    %54 = vector.shape_cast %53 : vector<512xf32> to vector<1x512xf32>
    %55 = vector.broadcast %54 : vector<1x512xf32> to vector<64x512xf32>
    %56 = arith.cmpf ole, %52, %55 : vector<64x512xf32>
    %c64_i32_19 = arith.constant 64 : i32
    %57 = vector.broadcast %c64_i32_19 : i32 to vector<64x512xi32>
    %58 = arith.select %56, %30, %57 : vector<64x512xi1>, vector<64x512xi32>
    %cst_20 = arith.constant dense<2147483647> : vector<512xi32>
    %59 = vector.multi_reduction <minsi>, %58, %cst_20 [0] : vector<64x512xi32> to vector<512xi32>
    %60 = vector.shape_cast %59 : vector<512xi32> to vector<1x512xi32>
    %61 = vector.broadcast %60 : vector<1x512xi32> to vector<64x512xi32>
    %62 = arith.cmpi eq, %30, %61 : vector<64x512xi32>
    %cst_21 = arith.constant 9.99999993E-9 : f32
    %63 = vector.broadcast %cst_21 : f32 to vector<1x512xf32>
    %64 = arith.addf %54, %63 : vector<1x512xf32>
    %cst_22 = arith.constant 1.000000e+00 : f32
    %65 = vector.broadcast %cst_22 : f32 to vector<1x512xf32>
    %66 = arith.divf %65, %64 : vector<1x512xf32>
    %67 = vector.shape_cast %66 : vector<1x512xf32> to vector<1x512xf32>
    %68 = vector.broadcast %67 : vector<1x512xf32> to vector<64x512xf32>
    %69 = arith.select %62, %68, %49 : vector<64x512xi1>, vector<64x512xf32>
    %70 = arith.addf %50, %66 : vector<1x512xf32>
    %cst_23 = arith.constant 0x7F800000 : f32
    %71 = vector.broadcast %cst_23 : f32 to vector<64x512xf32>
    %72 = arith.select %62, %71, %52 : vector<64x512xi1>, vector<64x512xf32>
    %cst_24 = arith.constant dense<0x7F800000> : vector<512xf32>
    %73 = vector.multi_reduction <minimumf>, %72, %cst_24 [0] : vector<64x512xf32> to vector<512xf32>
    %74 = vector.shape_cast %73 : vector<512xf32> to vector<1x512xf32>
    %75 = vector.broadcast %74 : vector<1x512xf32> to vector<64x512xf32>
    %76 = arith.cmpf ole, %72, %75 : vector<64x512xf32>
    %c64_i32_25 = arith.constant 64 : i32
    %77 = vector.broadcast %c64_i32_25 : i32 to vector<64x512xi32>
    %78 = arith.select %76, %30, %77 : vector<64x512xi1>, vector<64x512xi32>
    %cst_26 = arith.constant dense<2147483647> : vector<512xi32>
    %79 = vector.multi_reduction <minsi>, %78, %cst_26 [0] : vector<64x512xi32> to vector<512xi32>
    %80 = vector.shape_cast %79 : vector<512xi32> to vector<1x512xi32>
    %81 = vector.broadcast %80 : vector<1x512xi32> to vector<64x512xi32>
    %82 = arith.cmpi eq, %30, %81 : vector<64x512xi32>
    %cst_27 = arith.constant 9.99999993E-9 : f32
    %83 = vector.broadcast %cst_27 : f32 to vector<1x512xf32>
    %84 = arith.addf %74, %83 : vector<1x512xf32>
    %cst_28 = arith.constant 1.000000e+00 : f32
    %85 = vector.broadcast %cst_28 : f32 to vector<1x512xf32>
    %86 = arith.divf %85, %84 : vector<1x512xf32>
    %87 = vector.shape_cast %86 : vector<1x512xf32> to vector<1x512xf32>
    %88 = vector.broadcast %87 : vector<1x512xf32> to vector<64x512xf32>
    %89 = arith.select %82, %88, %69 : vector<64x512xi1>, vector<64x512xf32>
    %90 = arith.addf %70, %86 : vector<1x512xf32>
    %cst_29 = arith.constant dense<0.000000e+00> : vector<32x512xf32>
    %91 = tpu.matmul %7, %89, %cst_29 {dimension_numbers = #tpu.dot_dimension_numbers<[1], [0], [0], [1], [0, 0, 1, 1], [], []>} : vector<32x64xf32>, vector<64x512xf32>, vector<32x512xf32> -> vector<32x512xf32>
    %cst_30 = arith.constant 1.000000e+00 : f32
    %92 = vector.broadcast %cst_30 : f32 to vector<1x512xf32>
    %93 = arith.divf %92, %90 : vector<1x512xf32>
    %94 = vector.broadcast %93 : vector<1x512xf32> to vector<32x512xf32>
    %95 = arith.mulf %91, %94 : vector<32x512xf32>
    %c0_31 = arith.constant 0 : index
    %c0_32 = arith.constant 0 : index
    %96 = vector.load %arg6[%c0_31, %c0_32] : memref<64x16xf32, #tpu.memory_space<vmem>>, vector<64x16xf32>
    %c0_33 = arith.constant 0 : index
    %c0_34 = arith.constant 0 : index
    %97 = vector.load %arg7[%c0_33, %c0_34] : memref<64x32xf32, #tpu.memory_space<vmem>>, vector<64x32xf32>
    %c0_35 = arith.constant 0 : index
    %c0_36 = arith.constant 0 : index
    %98 = vector.load %arg8[%c0_35, %c0_36] : memref<64x1xf32, #tpu.memory_space<vmem>>, vector<64x1xf32>
    %cst_37 = arith.constant dense<0.000000e+00> : vector<64x512xf32>
    %99 = tpu.matmul %96, %5, %cst_37 {dimension_numbers = #tpu.dot_dimension_numbers<[1], [0], [0], [1], [0, 0, 1, 1], [], []>} : vector<64x16xf32>, vector<16x512xf32>, vector<64x512xf32> -> vector<64x512xf32>
    %cst_38 = arith.constant dense<0.000000e+00> : vector<64x512xf32>
    %100 = tpu.matmul %97, %95, %cst_38 {dimension_numbers = #tpu.dot_dimension_numbers<[1], [0], [0], [1], [0, 0, 1, 1], [], []>} : vector<64x32xf32>, vector<32x512xf32>, vector<64x512xf32> -> vector<64x512xf32>
    %101 = arith.addf %99, %100 : vector<64x512xf32>
    %102 = vector.broadcast %98 : vector<64x1xf32> to vector<64x512xf32>
    %103 = arith.addf %101, %102 : vector<64x512xf32>
    %cst_39 = arith.constant 0.000000e+00 : f32
    %104 = vector.broadcast %cst_39 : f32 to vector<64x512xf32>
    %105 = arith.maximumf %103, %104 : vector<64x512xf32>
    %c0_40 = arith.constant 0 : index
    %c0_41 = arith.constant 0 : index
    %106 = vector.load %arg9[%c0_40, %c0_41] : memref<32x64xf32, #tpu.memory_space<vmem>>, vector<32x64xf32>
    %c0_42 = arith.constant 0 : index
    %c0_43 = arith.constant 0 : index
    %107 = vector.load %arg10[%c0_42, %c0_43] : memref<32x1xf32, #tpu.memory_space<vmem>>, vector<32x1xf32>
    %cst_44 = arith.constant dense<0.000000e+00> : vector<32x512xf32>
    %108 = tpu.matmul %106, %105, %cst_44 {dimension_numbers = #tpu.dot_dimension_numbers<[1], [0], [0], [1], [0, 0, 1, 1], [], []>} : vector<32x64xf32>, vector<64x512xf32>, vector<32x512xf32> -> vector<32x512xf32>
    %109 = vector.broadcast %107 : vector<32x1xf32> to vector<32x512xf32>
    %110 = arith.addf %108, %109 : vector<32x512xf32>
    %cst_45 = arith.constant 0.000000e+00 : f32
    %111 = vector.broadcast %cst_45 : f32 to vector<32x512xf32>
    %112 = arith.maximumf %110, %111 : vector<32x512xf32>
    %c0_46 = arith.constant 0 : index
    %c0_47 = arith.constant 0 : index
    %c0_48 = arith.constant 0 : index
    %113 = vector.load %arg11[%c0_46, %c0_47, %c0_48] : memref<1x32x512xf32, #tpu.memory_space<vmem>>, vector<1x32x512xf32>
    %114 = vector.shape_cast %113 : vector<1x32x512xf32> to vector<32x512xf32>
    %115 = vector.shape_cast %112 : vector<32x512xf32> to vector<1x32x512xf32>
    tpu.vector_store %arg11[%c0_46, %c0_47, %c0_48], %115 {strides = array<i32>} : memref<1x32x512xf32, #tpu.memory_space<vmem>>, vector<1x32x512xf32>,
    return
  }
  func.func @transform_0(%arg0: i32, %arg1: i32) -> (i32, i32, i32) {
    %c0_i32 = arith.constant 0 : i32
    %c0_i32_0 = arith.constant 0 : i32
    return %arg0, %c0_i32, %arg1 : i32, i32, i32
  }
  func.func @transform_1(%arg0: i32, %arg1: i32) -> (i32, i32, i32) {
    %c0_i32 = arith.constant 0 : i32
    %c0_i32_0 = arith.constant 0 : i32
    %c0_i32_1 = arith.constant 0 : i32
    return %arg0, %c0_i32, %c0_i32_0 : i32, i32, i32
  }
  func.func @transform_2(%arg0: i32, %arg1: i32) -> (i32, i32, i32) {
    %c0_i32 = arith.constant 0 : i32
    %c0_i32_0 = arith.constant 0 : i32
    return %arg0, %c0_i32, %arg1 : i32, i32, i32
  }
  func.func @transform_3(%arg0: i32, %arg1: i32) -> (i32, i32, i32) {
    %c0_i32 = arith.constant 0 : i32
    %c0_i32_0 = arith.constant 0 : i32
    %c0_i32_1 = arith.constant 0 : i32
    return %arg0, %c0_i32, %c0_i32_0 : i32, i32, i32
  }
  func.func @transform_4(%arg0: i32, %arg1: i32) -> (i32, i32) {
    %c0_i32 = arith.constant 0 : i32
    %c0_i32_0 = arith.constant 0 : i32
    %c0_i32_1 = arith.constant 0 : i32
    return %c0_i32, %c0_i32_0 : i32, i32
  }
  func.func @transform_5(%arg0: i32, %arg1: i32) -> (i32, i32) {
    %c0_i32 = arith.constant 0 : i32
    %c0_i32_0 = arith.constant 0 : i32
    %c0_i32_1 = arith.constant 0 : i32
    return %c0_i32, %c0_i32_0 : i32, i32
  }
  func.func @transform_6(%arg0: i32, %arg1: i32) -> (i32, i32) {
    %c0_i32 = arith.constant 0 : i32
    %c0_i32_0 = arith.constant 0 : i32
    %c0_i32_1 = arith.constant 0 : i32
    return %c0_i32, %c0_i32_0 : i32, i32
  }
  func.func @transform_7(%arg0: i32, %arg1: i32) -> (i32, i32) {
    %c0_i32 = arith.constant 0 : i32
    %c0_i32_0 = arith.constant 0 : i32
    %c0_i32_1 = arith.constant 0 : i32
    return %c0_i32, %c0_i32_0 : i32, i32
  }
  func.func @transform_8(%arg0: i32, %arg1: i32) -> (i32, i32) {
    %c0_i32 = arith.constant 0 : i32
    %c0_i32_0 = arith.constant 0 : i32
    %c0_i32_1 = arith.constant 0 : i32
    return %c0_i32, %c0_i32_0 : i32, i32
  }
  func.func @transform_9(%arg0: i32, %arg1: i32) -> (i32, i32, i32) {
    %c0_i32 = arith.constant 0 : i32
    %c0_i32_0 = arith.constant 0 : i32
    return %arg0, %c0_i32, %arg1 : i32, i32, i32
  }
}

</mosaic_0001>

<bundles_post_ra>
// kernel: tpu_custom_call.1
= control target key start
LH: loop header
LB: loop body
LE: loop exit
PB: predicated region body
PF: predicated region fallthrough
CT: control target
= control target key end

     0   :  { %14 = vsyncpa [#allocation3], 0  ;;  %s5967_s0 = inlined_call_operand.vmem [shape: f32[2,3,512], index: 0, kind: input, shape index: {}]   ;;  %s5968_s1 = inlined_call_operand.vmem [shape: f32[2,64,3], index: 1, kind: input, shape index: {}]   ;;  %s5969_s2 = inlined_call_operand.vmem [shape: f32[2,16,512], index: 2, kind: input, shape index: {}]   ;;  %s5970_s3 = inlined_call_operand.vmem [shape: f32[2,32,64], index: 3, kind: input, shape index: {}]   ;;  %s5971_s4 = inlined_call_operand.vmem [shape: f32[64,16], index: 4, kind: input, shape index: {}]   ;;  %s5972_s5 = inlined_call_operand.vmem [shape: f32[64,32], index: 5, kind: input, shape index: {}]   ;;  %s5973_s6 = inlined_call_operand.vmem [shape: f32[64,1], index: 6, kind: input, shape index: {}]   ;;  %s5974_s7 = inlined_call_operand.vmem [shape: f32[32,64], index: 7, kind: input, shape index: {}]   ;;  %s5975_s8 = inlined_call_operand.vmem [shape: f32[32,1], index: 8, kind: input, shape index: {}]   ;;  %s5976_s9 = inlined_call_operand.hbm [shape: f32[2,32,512], index: 9, kind: output, shape index: {}]  }
   0x1   :  { %16 = vsyncpa [#allocation3 + $0x1], 0  ;;  %s3571_s30 = smov 0   ;;  %s3573_s10 = smov 0  }
   0x2   :  { %s3575_s11 = smov 0   ;;  %s3577_s12 = smov 0  }
   0x3   :  { %s3579_s13 = smov 0   ;;  %s3581_s14 = smov 0  }
   0x4 LB: > { %s3131_s15 = sadd.s32 4294967295, %s3512_s14   ;;  %s3132_s16 = sadd.s32 4294967294, %s3512_s14   ;;  %s3512_s14 = sphi %s3581_s14, %s22_s14   ;;  %s3508_s13 = sphi %s3579_s13, %s6265_s13   ;;  %s3504_s12 = sphi %s3577_s12, %s6264_s12   ;;  %s3500_s11 = sphi %s3575_s11, %s6263_s11   ;;  %s3496_s10 = sphi %s3573_s10, %s6262_s10   ;;  %s3492_s30 = sphi %s3571_s30, %s6261_s30  }
   0x5   : > { %s34_s17 = sadd.s32 1, %s3508_s13  ;;  %s256_s18 = sadd.s32 1, %s3500_s11 }
   0x6   : > { %p36_p0 = scmp.ge.s32.totalorder %s34_s17, 2  ;;  %p266_p1 = scmp.ne.s32.totalorder %s3500_s11, %s3496_s10 }
   0x7   : > { %p267_p2 = scmp.eq.s32.totalorder %s3131_s15, 1  ;;  %p272_p3 = scmp.ne.s32.totalorder %s3496_s10, %s3492_s30 }
   0x8   : > { %s6267_s17 = smov (%p36_p0, %s34_s17), 0  ;;  %p273_p5 = scmp.eq.s32.totalorder %s3132_s16, 1 }
   0x9   : > { %p3611_p4 = por %p267_p2, %p266_p1  ;;  %s251_s20 = ssub.s32 %s3508_s13, %s6267_s17 }
   0xa   : > { %p3135_p6 = scmp.ge.s32.totalorder %s3512_s14, 1  ;;  %p254_p7 = scmp.eq.s32.totalorder %s251_s20, 0 }
   0xb   : > { %p3618_p8 = por %p273_p5, %p272_p3  ;;  %p348_p9 = scmp.lt.s32.totalorder %s3512_s14, 3 }
   0xc   : > { %s3624_s22 = scalar_select %p254_p7, %s3500_s11, %s256_s18  }
   0xd   : > { %p349_p10 = pnand %p3135_p6, %p348_p9 }
   0xf   : > { %352 = sbr.rel (%p349_p10) target bundleno = 1268 (0x4f4), region = 56 }
  0x16   : > { %p408_p11 = scmp.lt.s32.totalorder %s3504_s12, 1  ;;  %v3514_v0 = vmov 2   ;;  %v3515_v1 = vmov 1   ;;  %v3516_v7 = vmov 0   ;;  %v502_v11 = vlaneseq }
  0x17   : > { %3385 = vset.pattern.permute.xlu0 %v3514_v0  ;;  %3384 = vset.pattern.permute.xlu1 %v3515_v1 }
  0x18   : > { %s3628_s23 = scalar_select %p408_p11, %s3504_s12, 1  ;;  %v3647_v12 = vshrl.u32 %v502_v11, 7 }
  0x1a   : > { %s3199_s24 = sshll.u32 %s3628_s23, 6  ;;  %s3198_s28 = sshll.u32 %s3628_s23, 4  ;;  %v668_v13 = vsub.s32 1, %v3647_v12  ;;  %v672_v15 = vsub.s32 5, %v3647_v12  ;;  %v832_v17 = vsub.s32 2, %v3647_v12  ;;  %v836_v21 = vsub.s32 6, %v3647_v12 }
  0x1b   : > { %s3636_s27 = scalar_lea.vmem %s5968_s1, %s3199_s24  ;;  %s415_s16 = scalar_lea.vmem %s5967_s0, %s3198_s28  ;;  %v504_v22 = vsub.s32 0, %v3647_v12  ;;  %v508_v25 = vsub.s32 4, %v3647_v12 }
  0x1c   : > { %v440_v2 = vld [vmem:[%s3636_s27] sm:$0xff]  ;;  %v441_v3 = vld [vmem:[%s3636_s27 + $0x8] sm:$0xff]  ;;  %v443_v4 = vld [vmem:[%s3636_s27 + $0x18] sm:$0xff]  ;;  %s3201_s18 = sshll.u32 %s3628_s23, 5  ;;  %s3202_s23 = sshll.u32 %s3504_s12, 11 }
  0x1d   : > { %799 = vperm.xlu0 %3385, %v440_v2   ;;  %635 = vperm.xlu1 %3384, %v440_v2   ;;  %v442_v5 = vld [vmem:[%s3636_s27 + $0x10] sm:$0xff]  ;;  %v444_v6 = vld [vmem:[%s3636_s27 + $0x20] sm:$0xff]  ;;  %v445_v8 = vld [vmem:[%s3636_s27 + $0x28] sm:$0xff]  ;;  %s436_s26 = scalar_lea.vmem %s5970_s3, %s3201_s18  ;;  %s5913_s29 = scalar_lea.hbm %s5976_s9, %s3202_s23 }
  0x1e   : > { %v446_v9 = vld [vmem:[%s3636_s27 + $0x30] sm:$0xff]  ;;  %v447_v10 = vld [vmem:[%s3636_s27 + $0x38] sm:$0xff]  ;;  %v439_v14 = vld [vmem:[%s415_s16 + $0x8] sm:$0x77] }
  0x1f   : > { %v438_v16 = vld [vmem:[%s415_s16] sm:$0x77]  ;;  %v677_v18 = vrot.slane %v439_v14, %v668_v13  ;;  %v681_v23 = vrot.slane %v439_v14, %v672_v15  ;;  %v841_v24 = vrot.slane %v439_v14, %v832_v17  ;;  %v845_v31 = vrot.slane %v439_v14, %v836_v21  ;;  %s3518_s16 = smov [#allocation2]  }
  0x20   : > { %v669_v19 = vrot.slane %v438_v16, %v668_v13  ;;  %v673_v20 = vrot.slane %v438_v16, %v672_v15  ;;  %v833_v27 = vrot.slane %v438_v16, %v832_v17  ;;  %v837_v30 = vrot.slane %v438_v16, %v836_v21  ;;  %s3438_s18 = sshll.u32 %s3518_s16, 4  ;;  %s3439_s18 = int_to_ptr.vmem [resolvable:$false] %s3438_s18 }
  0x21   : > { %3388 = vset.pattern.permute.xlu0 %v3515_v1  ;;  %639 = vperm.xlu1 %3384, %v441_v3   ;;  %v3658_v26 = vrot.slane %v677_v18, %v668_v13  ;;  %v505_v32 = vrot.slane %v438_v16, %v504_v22  ;;  %v3664_v34 = vrot.slane %v681_v23, %v668_v13 }
  0x22   : > { %647 = vperm.xlu0 %3388, %v443_v4   ;;  %v3660_v28 = vrot.slane %v669_v19, %v668_v13  ;;  %v3662_v29 = vrot.slane %v673_v20, %v668_v13  ;;  %v3666_v36 = vrot.slane %v841_v24, %v832_v17  ;;  %v509_v37 = vrot.slane %v438_v16, %v508_v25 }
  0x23   : > { %v3669_v39 = vrot.slane %v833_v27, %v832_v17  ;;  %v513_v40 = vrot.slane %v439_v14, %v504_v22  ;;  %v517_v41 = vrot.slane %v439_v14, %v508_v25  ;;  %v3673_v44 = vrot.slane %v837_v30, %v832_v17 }
  0x24   : > { %v3676_v46 = vrot.slane %v845_v31, %v832_v17  ;;  %v3678_v47 = vrot.slane %v505_v32, %v504_v22  ;;  %v3683_v52 = vrot.slane %v509_v37, %v504_v22 }
  0x25   : > { %643 = vperm.xlu1 %3384, %v442_v5   ;;  %v3687_v56 = vrot.slane %v513_v40, %v504_v22  ;;  %v3689_v57 = vrot.slane %v517_v41, %v504_v22 }
  0x26   : > { %651 = vperm.xlu0 %3388, %v444_v6  }
  0x29   : > { %3386 = vset.pattern.permute.xlu1 %v3514_v0 }
  0x2a   : > { %3391 = vset.pattern.permute.xlu0 %v3516_v7  ;;  %803 = vperm.xlu1 %3386, %v441_v3  }
  0x2b   : > { %462 = vperm.xlu0 %3391, %v440_v2  }
  0x2e   : > { %3387 = vset.pattern.permute.xlu1 %v3516_v7 }
  0x2f   : > { %467 = vperm.xlu0 %3391, %v441_v3   ;;  %477 = vperm.xlu1 %3387, %v443_v4  }
  0x33   : > { %472 = vperm.xlu0 %3391, %v442_v5   ;;  %3389 = vset.pattern.permute.xlu1 %v3514_v0 }
  0x34   : > { %807 = vperm.xlu1 %3389, %v442_v5  }
  0x37   : > { %487 = vperm.xlu0 %3391, %v445_v8  }
  0x38   : > { %3390 = vset.pattern.permute.xlu1 %v3516_v7 }
  0x39   : > { %482 = vperm.xlu1 %3390, %v444_v6  }
  0x3b   : > { %492 = vperm.xlu0 %3391, %v446_v9  }
  0x3d   : > { %3392 = vset.pattern.permute.xlu1 %v3514_v0 }
  0x3e   : > { %811 = vperm.xlu1 %3392, %v443_v4  }
  0x3f   : > { %3396 = vset.pattern.permute.xlu0 %v3514_v0 }
  0x40   : > { %819 = vperm.xlu0 %3396, %v445_v8  }
  0x42   : > { %3393 = vset.pattern.permute.xlu1 %v3515_v1 }
  0x43   : > { %655 = vperm.xlu1 %3393, %v445_v8  }
  0x44   : > { %823 = vperm.xlu0 %3396, %v446_v9  }
  0x47   : > { %3394 = vset.pattern.permute.xlu1 %v3514_v0 }
  0x48   : > { %815 = vperm.xlu1 %3394, %v444_v6   ;;  %3400 = vset.pattern.permute.xlu0 %v3516_v7 }
  0x4c   : > { %3395 = vset.pattern.permute.xlu1 %v3515_v1 }
  0x4d   : > { %659 = vperm.xlu1 %3395, %v446_v9  }
  0x51   : > { %3397 = vset.pattern.permute.xlu1 %v3516_v7 }
  0x52   : > { %497 = vperm.xlu1 %3397, %v447_v10  }
  0x56   : > { %3398 = vset.pattern.permute.xlu1 %v3515_v1 }
  0x57   : > { %663 = vperm.xlu1 %3398, %v447_v10  }
  0x5b   : > { %3399 = vset.pattern.permute.xlu1 %v3514_v0 }
  0x5c   : > { %827 = vperm.xlu1 %3399, %v447_v10  }
  0x60   : > { %3401 = vset.pattern.permute.xlu1 %v3516_v7 }
  0x9c   : > { %v636_v33 = vpop.permute.xlu1 %635  ;;  %v800_v35 = vpop.permute.xlu0 %799 }
  0x9d   : > { %v704_v38 = vsub.f32 %v636_v33, %v3658_v26  ;;  %v702_v42 = vsub.f32 %v636_v33, %v3660_v28  ;;  %v703_v43 = vsub.f32 %v636_v33, %v3662_v29  ;;  %v868_v45 = vsub.f32 %v800_v35, %v3666_v36 }
  0x9e   : > { %v705_v48 = vsub.f32 %v636_v33, %v3664_v34  ;;  %v866_v49 = vsub.f32 %v800_v35, %v3669_v39  ;;  %v867_v50 = vsub.f32 %v800_v35, %v3673_v44  ;;  %v869_v53 = vsub.f32 %v800_v35, %v3676_v46 }
  0x9f   : > { %v734_v58 = vmul.f32 %v702_v42, %v702_v42  ;;  %v3691_v59 = vmul.f32 %v703_v43, %v703_v43  ;;  %v736_v62 = vmul.f32 %v704_v38, %v704_v38  ;;  %v900_v7 = vmul.f32 %v868_v45, %v868_v45 }
  0xa0   : > { %v640_v51 = vpop.permute.xlu1 %639  ;;  %v737_v2 = vmul.f32 %v705_v48, %v705_v48  ;;  %v898_v3 = vmul.f32 %v866_v49, %v866_v49  ;;  %v3698_v4 = vmul.f32 %v867_v50, %v867_v50  ;;  %v3704_v13 = vmul.f32 %v869_v53, %v869_v53 }
  0xa1   : > { %v708_v54 = vsub.f32 %v640_v51, %v3658_v26  ;;  %v648_v55 = vpop.permute.xlu0 %647  ;;  %v706_v60 = vsub.f32 %v640_v51, %v3660_v28  ;;  %v707_v63 = vsub.f32 %v640_v51, %v3662_v29  ;;  %v709_v0 = vsub.f32 %v640_v51, %v3664_v34 }
  0xa2   : > { %v716_v61 = vsub.f32 %v648_v55, %v3658_v26  ;;  %v714_v1 = vsub.f32 %v648_v55, %v3660_v28  ;;  %v715_v5 = vsub.f32 %v648_v55, %v3662_v29  ;;  %v717_v8 = vsub.f32 %v648_v55, %v3664_v34 }
  0xa3   : > { %v738_v14 = vmul.f32 %v706_v60, %v706_v60  ;;  %v739_v17 = vmul.f32 %v707_v63, %v707_v63  ;;  %v740_v18 = vmul.f32 %v708_v54, %v708_v54  ;;  %v741_v19 = vmul.f32 %v709_v0, %v709_v0 }
  0xa4   : > { %v644_v6 = vpop.permute.xlu1 %643  ;;  %v3708_v20 = vmul.f32 %v714_v1, %v714_v1  ;;  %v3710_v21 = vmul.f32 %v715_v5, %v715_v5  ;;  %v3715_v25 = vmul.f32 %v716_v61, %v716_v61  ;;  %v3717_v27 = vmul.f32 %v717_v8, %v717_v8 }
  0xa5   : > { %v710_v9 = vsub.f32 %v644_v6, %v3660_v28  ;;  %v712_v10 = vsub.f32 %v644_v6, %v3658_v26  ;;  %v652_v11 = vpop.permute.xlu0 %651  ;;  %v711_v15 = vsub.f32 %v644_v6, %v3662_v29  ;;  %v713_v22 = vsub.f32 %v644_v6, %v3664_v34 }
  0xa6   : > { %v720_v16 = vsub.f32 %v652_v11, %v3658_v26  ;;  %v718_v23 = vsub.f32 %v652_v11, %v3660_v28  ;;  %v719_v24 = vsub.f32 %v652_v11, %v3662_v29  ;;  %v721_v31 = vsub.f32 %v652_v11, %v3664_v34 }
  0xa7   : > { %v3719_v30 = vmul.f32 %v710_v9, %v710_v9  ;;  %v3722_v33 = vmul.f32 %v711_v15, %v711_v15  ;;  %v3731_v48 = vmul.f32 %v712_v10, %v712_v10  ;;  %v3733_v49 = vmul.f32 %v713_v22, %v713_v22 }
  0xa8   : > { %v3735_v50 = vmul.f32 %v718_v23, %v718_v23  ;;  %v3737_v51 = vmul.f32 %v719_v24, %v719_v24  ;;  %v3739_v61 = vmul.f32 %v720_v16, %v720_v16  ;;  %v3741_v63 = vmul.f32 %v721_v31, %v721_v31 }
  0xa9   : > { %v804_v32 = vpop.permute.xlu1 %803 }
  0xaa   : > { %v870_v35 = vsub.f32 %v804_v32, %v3669_v39  ;;  %v871_v37 = vsub.f32 %v804_v32, %v3673_v44  ;;  %v872_v38 = vsub.f32 %v804_v32, %v3666_v36  ;;  %v463_v40 = vpop.permute.xlu0 %462  ;;  %v873_v0 = vsub.f32 %v804_v32, %v3676_v46 }
  0xab   : > { %v538_v41 = vsub.f32 %v463_v40, %v3678_v47  ;;  %v539_v42 = vsub.f32 %v463_v40, %v3683_v52  ;;  %v540_v43 = vsub.f32 %v463_v40, %v3687_v56  ;;  %v541_v45 = vsub.f32 %v463_v40, %v3689_v57 }
  0xac   : > { %v902_v1 = vmul.f32 %v870_v35, %v870_v35  ;;  %v903_v8 = vmul.f32 %v871_v37, %v871_v37  ;;  %v904_v9 = vmul.f32 %v872_v38, %v872_v38 }
  0xad   : > { %v570_v53 = vmul.f32 %v538_v41, %v538_v41  ;;  %v571_v54 = vmul.f32 %v539_v42, %v539_v42  ;;  %v572_v55 = vmul.f32 %v540_v43, %v540_v43  ;;  %v573_v60 = vmul.f32 %v541_v45, %v541_v45 }
  0xae   : > { %v468_v5 = vpop.permute.xlu0 %467  ;;  %v478_v6 = vpop.permute.xlu1 %477 }
  0xaf   : > { %v766_v10 = vadd.f32 %v734_v58, %v570_v53  ;;  %v768_v11 = vadd.f32 %v736_v62, %v572_v55  ;;  %v542_v15 = vsub.f32 %v468_v5, %v3678_v47  ;;  %v543_v22 = vsub.f32 %v468_v5, %v3683_v52 }
  0xb0   : > { %v544_v23 = vsub.f32 %v468_v5, %v3687_v56  ;;  %v545_v16 = vsub.f32 %v468_v5, %v3689_v57  ;;  %v767_v24 = vadd.f32 %v3691_v59, %v571_v54  ;;  %v769_v31 = vadd.f32 %v737_v2, %v573_v60 }
  0xb1   : > { %v3749_v40 = vadd.f32 %v898_v3, %v766_v10  ;;  %v3751_v32 = vadd.f32 %v900_v7, %v768_v11  ;;  %v574_v35 = vmul.f32 %v542_v15, %v542_v15  ;;  %v575_v37 = vmul.f32 %v543_v22, %v543_v22 }
  0xb2   : > { %v576_v38 = vmul.f32 %v544_v23, %v544_v23  ;;  %v577_v58 = vmul.f32 %v545_v16, %v545_v16  ;;  %v905_v62 = vmul.f32 %v873_v0, %v873_v0  ;;  %v550_v41 = vsub.f32 %v478_v6, %v3678_v47  ;;  %v473_v0 = vpop.permute.xlu0 %472 }
  0xb3   : > { %6058 = vst [vmem:[#allocation5_spill] sm:$0xff] %v3749_v40  ;;  %6059 = vst [vmem:[#allocation6_spill] sm:$0xff] %v3751_v32  ;;  %v551_v42 = vsub.f32 %v478_v6, %v3683_v52  ;;  %v552_v43 = vsub.f32 %v478_v6, %v3687_v56  ;;  %v808_v45 = vpop.permute.xlu1 %807  ;;  %v770_v53 = vadd.f32 %v738_v14, %v574_v35 }
  0xb4   : > { %v771_v55 = vadd.f32 %v739_v17, %v575_v37  ;;  %v772_v59 = vadd.f32 %v740_v18, %v576_v38  ;;  %v773_v2 = vadd.f32 %v741_v19, %v577_v58  ;;  %v3757_v3 = vadd.f32 %v3698_v4, %v767_v24 }
  0xb5   : > { %v3760_v7 = vadd.f32 %v3704_v13, %v769_v31  ;;  %v582_v54 = vmul.f32 %v550_v41, %v550_v41  ;;  %v584_v60 = vmul.f32 %v552_v43, %v552_v43  ;;  %v3762_v5 = vadd.f32 %v902_v1, %v770_v53 }
  0xb6   : > { %v3764_v10 = vadd.f32 %v904_v9, %v772_v59  ;;  %v553_v11 = vsub.f32 %v478_v6, %v3689_v57  ;;  %v583_v15 = vmul.f32 %v551_v42, %v551_v42  ;;  %v3767_v14 = vadd.f32 %v903_v8, %v771_v55 }
  0xb7   : > { %6060 = vst [vmem:[#allocation7_spill] sm:$0xff] %v3760_v7  ;;  %6061 = vst [vmem:[#allocation8_spill] sm:$0xff] %v3762_v5  ;;  %v3769_v17 = vadd.f32 %v905_v62, %v773_v2  ;;  %v3772_v4 = vadd.f32 %v3708_v20, %v582_v54  ;;  %v3775_v13 = vadd.f32 %v3715_v25, %v584_v60  ;;  %v488_v2 = vpop.permute.xlu0 %487 }
  0xb8   : > { %6062 = vst [vmem:[#allocation9_spill] sm:$0xff] %v3764_v10  ;;  %v546_v18 = vsub.f32 %v473_v0, %v3678_v47  ;;  %v547_v19 = vsub.f32 %v473_v0, %v3683_v52  ;;  %v548_v1 = vsub.f32 %v473_v0, %v3687_v56  ;;  %v549_v9 = vsub.f32 %v473_v0, %v3689_v57  ;;  %v483_v6 = vpop.permute.xlu1 %482 }
  0xb9   : > { %6063 = vst [vmem:[#allocation10_spill] sm:$0xff] %v3769_v17  ;;  %v874_v8 = vsub.f32 %v808_v45, %v3669_v39  ;;  %v875_v22 = vsub.f32 %v808_v45, %v3673_v44  ;;  %v876_v23 = vsub.f32 %v808_v45, %v3666_v36  ;;  %v877_v20 = vsub.f32 %v808_v45, %v3676_v46 }
  0xba   : > { %v578_v16 = vmul.f32 %v546_v18, %v546_v18  ;;  %v579_v25 = vmul.f32 %v547_v19, %v547_v19  ;;  %v580_v24 = vmul.f32 %v548_v1, %v548_v1  ;;  %v581_v31 = vmul.f32 %v549_v9, %v549_v9 }
  0xbb   : > { %v906_v35 = vmul.f32 %v874_v8, %v874_v8  ;;  %v907_v37 = vmul.f32 %v875_v22, %v875_v22  ;;  %v908_v38 = vmul.f32 %v876_v23, %v876_v23  ;;  %v909_v58 = vmul.f32 %v877_v20, %v877_v20 }
  0xbc   : > { %v774_v62 = vadd.f32 %v3719_v30, %v578_v16  ;;  %v775_v41 = vadd.f32 %v3722_v33, %v579_v25  ;;  %v776_v42 = vadd.f32 %v3731_v48, %v580_v24  ;;  %v777_v43 = vadd.f32 %v3733_v49, %v581_v31 }
  0xbd   : > { %v585_v53 = vmul.f32 %v553_v11, %v553_v11  ;;  %v779_v55 = vadd.f32 %v3710_v21, %v583_v15  ;;  %v971_v45 = vmin.f32 %v3749_v40, %v3762_v5  ;;  %v997_v59 = vmin.f32 %v3751_v32, %v3764_v10  ;;  %v812_v54 = vpop.permute.xlu1 %811 }
  0xbe   : > { %v3794_v60 = vadd.f32 %v906_v35, %v774_v62  ;;  %v3796_v30 = vadd.f32 %v907_v37, %v775_v41  ;;  %v3798_v33 = vadd.f32 %v908_v38, %v776_v42  ;;  %v3800_v48 = vadd.f32 %v909_v58, %v777_v43 }
  0xbf   : > { %v554_v49 = vsub.f32 %v483_v6, %v3678_v47  ;;  %v555_v21 = vsub.f32 %v483_v6, %v3683_v52  ;;  %v556_v0 = vsub.f32 %v483_v6, %v3687_v56  ;;  %v557_v11 = vsub.f32 %v483_v6, %v3689_v57 }
  0xc0   : > { %6064 = vst [vmem:[#allocation11_spill] sm:$0xff] %v3794_v60  ;;  %6065 = vst [vmem:[#allocation12_spill] sm:$0xff] %v3796_v30  ;;  %v3807_v15 = vmin.f32 %v971_v45, %v3794_v60  ;;  %v984_v18 = vmin.f32 %v3757_v3, %v3767_v14  ;;  %v3812_v19 = vmin.f32 %v997_v59, %v3798_v33 }
  0xc1   : > { %6066 = vst [vmem:[#allocation13_spill] sm:$0xff] %v3798_v33  ;;  %6067 = vst [vmem:[#allocation14_spill] sm:$0xff] %v3800_v48  ;;  %v1010_v1 = vmin.f32 %v3760_v7, %v3769_v17  ;;  %v586_v9 = vmul.f32 %v554_v49, %v554_v49  ;;  %v587_v8 = vmul.f32 %v555_v21, %v555_v21 }
  0xc2   : > { %v588_v22 = vmul.f32 %v556_v0, %v556_v0  ;;  %v589_v23 = vmul.f32 %v557_v11, %v557_v11  ;;  %v781_v20 = vadd.f32 %v3717_v27, %v585_v53  ;;  %v558_v6 = vsub.f32 %v488_v2, %v3678_v47  ;;  %v656_v24 = vpop.permute.xlu1 %655  ;;  %v493_v27 = vpop.permute.xlu0 %492 }
  0xc3   : > { %v559_v16 = vsub.f32 %v488_v2, %v3683_v52  ;;  %v560_v25 = vsub.f32 %v488_v2, %v3687_v56  ;;  %v3821_v31 = vmin.f32 %v984_v18, %v3796_v30  ;;  %v3824_v35 = vmin.f32 %v1010_v1, %v3800_v48 }
  0xc4   : > { %v3827_v37 = vadd.f32 %v3735_v50, %v586_v9  ;;  %v3830_v38 = vadd.f32 %v3739_v61, %v588_v22  ;;  %v3833_v58 = vadd.f32 %v3737_v51, %v587_v8  ;;  %v3836_v62 = vadd.f32 %v3741_v63, %v589_v23 }
  0xc5   : > { %v561_v41 = vsub.f32 %v488_v2, %v3689_v57  ;;  %v590_v42 = vmul.f32 %v558_v6, %v558_v6  ;;  %v878_v43 = vsub.f32 %v812_v54, %v3669_v39  ;;  %v879_v53 = vsub.f32 %v812_v54, %v3673_v44 }
  0xc6   : > { %v880_v50 = vsub.f32 %v812_v54, %v3666_v36  ;;  %v881_v45 = vsub.f32 %v812_v54, %v3676_v46  ;;  %v591_v61 = vmul.f32 %v559_v16, %v559_v16  ;;  %v562_v59 = vsub.f32 %v493_v27, %v3678_v47 }
  0xc7   : > { %v563_v51 = vsub.f32 %v493_v27, %v3683_v52  ;;  %v564_v49 = vsub.f32 %v493_v27, %v3687_v56  ;;  %v910_v63 = vmul.f32 %v878_v43, %v878_v43  ;;  %v911_v21 = vmul.f32 %v879_v53, %v879_v53  ;;  %v816_v11 = vpop.permute.xlu1 %815 }
  0xc8   : > { %v912_v0 = vmul.f32 %v880_v50, %v880_v50  ;;  %v913_v2 = vmul.f32 %v881_v45, %v881_v45  ;;  %v592_v18 = vmul.f32 %v560_v25, %v560_v25  ;;  %v593_v1 = vmul.f32 %v561_v41, %v561_v41  ;;  %v820_v41 = vpop.permute.xlu0 %819 }
  0xc9   : > { %v565_v9 = vsub.f32 %v493_v27, %v3689_v57  ;;  %v3847_v8 = vmul.f32 %v562_v59, %v562_v59  ;;  %v3850_v54 = vadd.f32 %v910_v63, %v3772_v4  ;;  %v3852_v22 = vadd.f32 %v911_v21, %v779_v55 }
  0xca   : > { %v3855_v23 = vadd.f32 %v912_v0, %v3775_v13  ;;  %v3857_v6 = vadd.f32 %v913_v2, %v781_v20  ;;  %v722_v16 = vsub.f32 %v656_v24, %v3660_v28  ;;  %v723_v43 = vsub.f32 %v656_v24, %v3662_v29 }
  0xcb   : > { %6068 = vst [vmem:[#allocation15_spill] sm:$0xff] %v3850_v54  ;;  %6069 = vst [vmem:[#allocation16_spill] sm:$0xff] %v3852_v22  ;;  %v724_v25 = vsub.f32 %v656_v24, %v3658_v26  ;;  %v725_v27 = vsub.f32 %v656_v24, %v3664_v34  ;;  %v973_v4 = vmin.f32 %v3807_v15, %v3850_v54 }
  0xcc   : > { %6070 = vst [vmem:[#allocation17_spill] sm:$0xff] %v3855_v23  ;;  %6071 = vst [vmem:[#allocation18_spill] sm:$0xff] %v3857_v6  ;;  %v999_v55 = vmin.f32 %v3812_v19, %v3855_v23  ;;  %v595_v53 = vmul.f32 %v563_v51, %v563_v51  ;;  %v596_v13 = vmul.f32 %v564_v49, %v564_v49  ;;  %v660_v63 = vpop.permute.xlu1 %659 }
  0xcd   : > { %v754_v50 = vmul.f32 %v722_v16, %v722_v16  ;;  %v755_v20 = vmul.f32 %v723_v43, %v723_v43  ;;  %v756_v45 = vmul.f32 %v724_v25, %v724_v25  ;;  %v757_v59 = vmul.f32 %v725_v27, %v725_v27 }
  0xce   : > { %v886_v21 = vsub.f32 %v820_v41, %v3669_v39  ;;  %v887_v0 = vsub.f32 %v820_v41, %v3673_v44  ;;  %v888_v24 = vsub.f32 %v820_v41, %v3666_v36  ;;  %v889_v2 = vsub.f32 %v820_v41, %v3676_v46 }
  0xcf   : > { %v986_v15 = vmin.f32 %v3821_v31, %v3852_v22  ;;  %v1012_v19 = vmin.f32 %v3824_v35, %v3857_v6  ;;  %v597_v51 = vmul.f32 %v565_v9, %v565_v9  ;;  %v788_v49 = vadd.f32 %v756_v45, %v592_v18 }
  0xd0   : > { %v786_v16 = vadd.f32 %v754_v50, %v590_v42  ;;  %v787_v43 = vadd.f32 %v755_v20, %v591_v61  ;;  %v789_v25 = vadd.f32 %v757_v59, %v593_v1  ;;  %v920_v27 = vmul.f32 %v888_v24, %v888_v24 }
  0xd1   : > { %v882_v23 = vsub.f32 %v816_v11, %v3669_v39  ;;  %v883_v54 = vsub.f32 %v816_v11, %v3673_v44  ;;  %v884_v48 = vsub.f32 %v816_v11, %v3666_v36  ;;  %v885_v41 = vsub.f32 %v816_v11, %v3676_v46  ;;  %v498_v35 = vpop.permute.xlu1 %497 }
  0xd2   : > { %v918_v33 = vmul.f32 %v886_v21, %v886_v21  ;;  %v919_v30 = vmul.f32 %v887_v0, %v887_v0  ;;  %v921_v31 = vmul.f32 %v889_v2, %v889_v2  ;;  %v3879_v22 = vadd.f32 %v920_v27, %v788_v49  ;;  %v824_v2 = vpop.permute.xlu0 %823 }
  0xd3   : > { %v914_v9 = vmul.f32 %v882_v23, %v882_v23  ;;  %v915_v18 = vmul.f32 %v883_v54, %v883_v54  ;;  %v916_v42 = vmul.f32 %v884_v48, %v884_v48  ;;  %v917_v61 = vmul.f32 %v885_v41, %v885_v41 }
  0xd4   : > { %6072 = vst [vmem:[#allocation19_spill] sm:$0xff] %v3879_v22  ;;  %v726_v1 = vsub.f32 %v660_v63, %v3660_v28  ;;  %v727_v50 = vsub.f32 %v660_v63, %v3662_v29  ;;  %v728_v20 = vsub.f32 %v660_v63, %v3658_v26  ;;  %v729_v45 = vsub.f32 %v660_v63, %v3664_v34 }
  0xd5   : > { %v3886_v11 = vadd.f32 %v914_v9, %v3827_v37  ;;  %v3889_v59 = vadd.f32 %v915_v18, %v3833_v58  ;;  %v3892_v21 = vadd.f32 %v916_v42, %v3830_v38  ;;  %v3895_v48 = vadd.f32 %v917_v61, %v3836_v62 }
  0xd6   : > { %v758_v54 = vmul.f32 %v726_v1, %v726_v1  ;;  %v759_v23 = vmul.f32 %v727_v50, %v727_v50  ;;  %v760_v0 = vmul.f32 %v728_v20, %v728_v20  ;;  %v761_v24 = vmul.f32 %v729_v45, %v729_v45  ;;  %v664_v9 = vpop.permute.xlu1 %663 }
  0xd7   : > { %6073 = vst [vmem:[#allocation20_spill] sm:$0xff] %v3886_v11  ;;  %6074 = vst [vmem:[#allocation21_spill] sm:$0xff] %v3892_v21  ;;  %v3897_v49 = vadd.f32 %v918_v33, %v786_v16  ;;  %v3899_v63 = vadd.f32 %v919_v30, %v787_v43  ;;  %v974_v37 = vmin.f32 %v973_v4, %v3886_v11 }
  0xd8   : > { %6075 = vst [vmem:[#allocation22_spill] sm:$0xff] %v3895_v48  ;;  %v1000_v58 = vmin.f32 %v999_v55, %v3892_v21  ;;  %v3903_v27 = vadd.f32 %v921_v31, %v789_v25  ;;  %v987_v38 = vmin.f32 %v986_v15, %v3889_v59  ;;  %v1013_v62 = vmin.f32 %v1012_v19, %v3895_v48 }
  0xd9   : > { %6076 = vst [vmem:[#allocation23_spill] sm:$0xff] %v3897_v49  ;;  %6077 = vst [vmem:[#allocation24_spill] sm:$0xff] %v3899_v63  ;;  %v792_v41 = vadd.f32 %v760_v0, %v596_v13  ;;  %v890_v18 = vsub.f32 %v824_v2, %v3669_v39  ;;  %v891_v42 = vsub.f32 %v824_v2, %v3673_v44 }
  0xda   : > { %6078 = vst [vmem:[#allocation25_spill] sm:$0xff] %v3903_v27  ;;  %v892_v33 = vsub.f32 %v824_v2, %v3666_v36  ;;  %v893_v30 = vsub.f32 %v824_v2, %v3676_v46  ;;  %v790_v4 = vadd.f32 %v758_v54, %v3847_v8  ;;  %v791_v16 = vadd.f32 %v759_v23, %v595_v53 }
  0xdb   : > { %v793_v55 = vadd.f32 %v761_v24, %v597_v51  ;;  %v1001_v43 = vmin.f32 %v1000_v58, %v3879_v22  ;;  %v922_v25 = vmul.f32 %v890_v18, %v890_v18  ;;  %v923_v15 = vmul.f32 %v891_v42, %v891_v42 }
  0xdc   : > { %v924_v31 = vmul.f32 %v892_v33, %v892_v33  ;;  %v925_v19 = vmul.f32 %v893_v30, %v893_v30  ;;  %v566_v13 = vsub.f32 %v498_v35, %v3678_v47  ;;  %v567_v61 = vsub.f32 %v498_v35, %v3683_v52  ;;  %v828_v52 = vpop.permute.xlu1 %827 }
  0xdd   : > { %v568_v1 = vsub.f32 %v498_v35, %v3687_v56  ;;  %v569_v50 = vsub.f32 %v498_v35, %v3689_v57  ;;  %v975_v8 = vmin.f32 %v974_v37, %v3897_v49  ;;  %v988_v53 = vmin.f32 %v987_v38, %v3899_v63 }
  0xde   : > { %v3917_v20 = vadd.f32 %v924_v31, %v792_v41  ;;  %v1014_v51 = vmin.f32 %v1013_v62, %v3903_v27  ;;  %v3922_v45 = vadd.f32 %v922_v25, %v790_v4  ;;  %v3924_v54 = vadd.f32 %v923_v15, %v791_v16 }
  0xdf   : > { %v3926_v23 = vadd.f32 %v925_v19, %v793_v55  ;;  %v598_v47 = vmul.f32 %v566_v13, %v566_v13  ;;  %v599_v0 = vmul.f32 %v567_v61, %v567_v61  ;;  %v600_v57 = vmul.f32 %v568_v1, %v568_v1 }
  0xe0   : > { %6079 = vst [vmem:[#allocation26_spill] sm:$0xff] %v3917_v20  ;;  %6080 = vst [vmem:[#allocation27_spill] sm:$0xff] %v3922_v45  ;;  %v1002_v56 = vmin.f32 %v1001_v43, %v3917_v20  ;;  %v601_v35 = vmul.f32 %v569_v50, %v569_v50  ;;  %v730_v24 = vsub.f32 %v664_v9, %v3660_v28 }
  0xe1   : > { %6081 = vst [vmem:[#allocation28_spill] sm:$0xff] %v3924_v54  ;;  %6082 = vst [vmem:[#allocation29_spill] sm:$0xff] %v3926_v23  ;;  %v731_v2 = vsub.f32 %v664_v9, %v3662_v29  ;;  %v732_v37 = vsub.f32 %v664_v9, %v3658_v26  ;;  %v733_v58 = vsub.f32 %v664_v9, %v3664_v34 }
  0xe2   : > { %v894_v38 = vsub.f32 %v828_v52, %v3669_v39  ;;  %v895_v62 = vsub.f32 %v828_v52, %v3673_v44  ;;  %v896_v41 = vsub.f32 %v828_v52, %v3666_v36  ;;  %v897_v18 = vsub.f32 %v828_v52, %v3676_v46 }
  0xe3   : > { %v762_v42 = vmul.f32 %v730_v24, %v730_v24  ;;  %v763_v33 = vmul.f32 %v731_v2, %v731_v2  ;;  %v764_v30 = vmul.f32 %v732_v37, %v732_v37  ;;  %v765_v4 = vmul.f32 %v733_v58, %v733_v58 }
  0xe4   : > { %v926_v16 = vmul.f32 %v894_v38, %v894_v38  ;;  %v927_v28 = vmul.f32 %v895_v62, %v895_v62  ;;  %v928_v55 = vmul.f32 %v896_v41, %v896_v41  ;;  %v929_v29 = vmul.f32 %v897_v18, %v897_v18 }
  0xe5   : > { %v794_v43 = vadd.f32 %v762_v42, %v598_v47  ;;  %v795_v26 = vadd.f32 %v763_v33, %v599_v0  ;;  %v796_v25 = vadd.f32 %v764_v30, %v600_v57  ;;  %v797_v34 = vadd.f32 %v765_v4, %v601_v35 }
  0xe6   : > { %v976_v39 = vmin.f32 %v975_v8, %v3922_v45  ;;  %v989_v44 = vmin.f32 %v988_v53, %v3924_v54  ;;  %v1015_v36 = vmin.f32 %v1014_v51, %v3926_v23  ;;  %v3953_v30 = vadd.s32 8, %v3647_v12 }
  0xe7   : > { %v3940_v9 = vadd.f32 %v926_v16, %v794_v43  ;;  %v3942_v46 = vadd.f32 %v927_v28, %v795_v26  ;;  %v3944_v15 = vadd.f32 %v928_v55, %v796_v25  ;;  %v3946_v31 = vadd.f32 %v929_v29, %v797_v34 }
  0xe8   : > { %v3956_v4 = vadd.s32 16, %v3647_v12  ;;  %v3959_v16 = vadd.s32 24, %v3647_v12  ;;  %v3970_v26 = vadd.s32 32, %v3647_v12  ;;  %v3973_v25 = vadd.s32 40, %v3647_v12 }
  0xe9   : > { %6083 = vst [vmem:[#allocation30_spill] sm:$0xff] %v3940_v9  ;;  %v977_v19 = vmin.f32 %v976_v39, %v3940_v9  ;;  %v990_v13 = vmin.f32 %v989_v44, %v3942_v46  ;;  %v1003_v61 = vmin.f32 %v1002_v56, %v3944_v15  ;;  %v1016_v1 = vmin.f32 %v1015_v36, %v3946_v31  ;;  %v6084_v44 = vld [vmem:[#allocation12_spill] sm:$0xff]  ;;  %v6085_v36 = vld [vmem:[#allocation13_spill] sm:$0xff] }
  0xea   : > { %v3976_v34 = vadd.s32 48, %v3647_v12  ;;  %v3979_v39 = vadd.s32 56, %v3647_v12 }
  0xeb   : > { %v978_v50 = vrot.slane %v977_v19, 4  ;;  %v991_v8 = vrot.slane %v990_v13, 4  ;;  %v1004_v53 = vrot.slane %v1003_v61, 4  ;;  %v1017_v51 = vrot.slane %v1016_v1, 4 }
  0xed   : > { %v979_v47 = vmin.f32 %v977_v19, %v978_v50  ;;  %v992_v52 = vmin.f32 %v990_v13, %v991_v8  ;;  %v1005_v0 = vmin.f32 %v1003_v61, %v1004_v53  ;;  %v1018_v57 = vmin.f32 %v1016_v1, %v1017_v51  ;;  %v6086_v19 = vld [vmem:[#allocation14_spill] sm:$0xff]  ;;  %v6087_v13 = vld [vmem:[#allocation15_spill] sm:$0xff]  ;;  %v6088_v61 = vld [vmem:[#allocation16_spill] sm:$0xff] }
  0xee   : > { %v6089_v1 = vld [vmem:[#allocation17_spill] sm:$0xff] }
  0xef   : > { %v980_v35 = vrot.slane %v979_v47, 2  ;;  %v993_v24 = vrot.slane %v992_v52, 2  ;;  %v1006_v2 = vrot.slane %v1005_v0, 2  ;;  %v1019_v37 = vrot.slane %v1018_v57, 2 }
  0xf1   : > { %v981_v58 = vmin.f32 %v979_v47, %v980_v35  ;;  %v994_v38 = vmin.f32 %v992_v52, %v993_v24  ;;  %v1007_v62 = vmin.f32 %v1005_v0, %v1006_v2  ;;  %v1020_v41 = vmin.f32 %v1018_v57, %v1019_v37 }
  0xf3   : > { %v982_v18 = vrot.slane %v981_v58, 1  ;;  %v995_v56 = vrot.slane %v994_v38, 1  ;;  %v1008_v42 = vrot.slane %v1007_v62, 1  ;;  %v1021_v33 = vrot.slane %v1020_v41, 1 }
  0xf5   : > { %v3961_v28 = vmin.f32 %v981_v58, %v982_v18  ;;  %v3963_v55 = vmin.f32 %v994_v38, %v995_v56  ;;  %v3965_v29 = vmin.f32 %v1007_v62, %v1008_v42  ;;  %v3967_v43 = vmin.f32 %v1020_v41, %v1021_v33 }
  0xf7   : > { %vm1023_vm0 = vcmp.le.f32.partialorder %v3749_v40, %v3961_v28  ;;  %vm1024_vm1 = vcmp.le.f32.partialorder %v3757_v3, %v3963_v55  ;;  %vm1025_vm2 = vcmp.le.f32.partialorder %v3751_v32, %v3965_v29  ;;  %vm1026_vm3 = vcmp.le.f32.partialorder %v3760_v7, %v3967_v43 }
  0xf8   : > { %vm1027_vm4 = vcmp.le.f32.partialorder %v3762_v5, %v3961_v28  ;;  %vm1028_vm5 = vcmp.le.f32.partialorder %v3767_v14, %v3963_v55  ;;  %vm1029_vm6 = vcmp.le.f32.partialorder %v3764_v10, %v3965_v29  ;;  %vm1030_vm7 = vcmp.le.f32.partialorder %v3769_v17, %v3967_v43 }
  0xf9   : > { %vm1031_vm8 = vcmp.le.f32.partialorder %v3794_v60, %v3961_v28  ;;  %vm1048_vm11 = vcmp.le.f32.partialorder %v3924_v54, %v3963_v55  ;;  %vm1049_vm12 = vcmp.le.f32.partialorder %v3917_v20, %v3965_v29  ;;  %vm1050_vm13 = vcmp.le.f32.partialorder %v3926_v23, %v3967_v43 }
  0xfa   : > { %vm1051_vm14 = vcmp.le.f32.partialorder %v3940_v9, %v3961_v28  ;;  %vm1052_vm15 = vcmp.le.f32.partialorder %v3942_v46, %v3963_v55  ;;  %vm1053_vm9 = vcmp.le.f32.partialorder %v3944_v15, %v3965_v29  ;;  %vm1054_vm10 = vcmp.le.f32.partialorder %v3946_v31, %v3967_v43 }
  0xfb   : > { %v1055_v50 = vsel %vm1023_vm0, %v3647_v12, 64  ;;  %v1056_v8 = vsel %vm1024_vm1, %v3647_v12, 64  ;;  %v1057_v53 = vsel %vm1025_vm2, %v3647_v12, 64  ;;  %v1058_v51 = vsel %vm1026_vm3, %v3647_v12, 64 }
  0xfc   : > { %v1059_v47 = vsel %vm1027_vm4, %v3953_v30, 64  ;;  %v1060_v52 = vsel %vm1028_vm5, %v3953_v30, 64  ;;  %v1061_v0 = vsel %vm1029_vm6, %v3953_v30, 64  ;;  %v1062_v57 = vsel %vm1030_vm7, %v3953_v30, 64 }
  0xfd   : > { %v1063_v35 = vsel %vm1031_vm8, %v3956_v4, 64  ;;  %vm6090_vm0 = vcmp.le.f32.partialorder %v6084_v44, %v3963_v55  ;;  %vm6091_vm1 = vcmp.le.f32.partialorder %v6085_v36, %v3965_v29  ;;  %vm6092_vm2 = vcmp.le.f32.partialorder %v6086_v19, %v3967_v43 }
  0xfe   : > { %v1064_v24 = vsel %vm6090_vm0, %v3956_v4, 64  ;;  %v1065_v2 = vsel %vm6091_vm1, %v3956_v4, 64  ;;  %v1066_v37 = vsel %vm6092_vm2, %v3956_v4, 64  ;;  %vm6093_vm3 = vcmp.le.f32.partialorder %v6087_v13, %v3961_v28 }
  0xff   : > { %v1067_v58 = vsel %vm6093_vm3, %v3959_v16, 64  ;;  %vm6094_vm4 = vcmp.le.f32.partialorder %v6088_v61, %v3963_v55  ;;  %vm6095_vm5 = vcmp.le.f32.partialorder %v6089_v1, %v3965_v29  ;;  %vm6096_vm6 = vcmp.le.f32.partialorder %v3857_v6, %v3967_v43 }
 0x100   : > { %v1068_v38 = vsel %vm6094_vm4, %v3959_v16, 64  ;;  %v1069_v62 = vsel %vm6095_vm5, %v3959_v16, 64  ;;  %v1070_v41 = vsel %vm6096_vm6, %v3959_v16, 64  ;;  %vm6097_vm7 = vcmp.le.f32.partialorder %v3886_v11, %v3961_v28 }
 0x101   : > { %v1071_v18 = vsel %vm6097_vm7, %v3970_v26, 64  ;;  %vm6098_vm8 = vcmp.le.f32.partialorder %v3889_v59, %v3963_v55  ;;  %vm6099_vm0 = vcmp.le.f32.partialorder %v3892_v21, %v3965_v29  ;;  %vm6100_vm1 = vcmp.le.f32.partialorder %v3895_v48, %v3967_v43 }
 0x102   : > { %v1072_v56 = vsel %vm6098_vm8, %v3970_v26, 64  ;;  %v1073_v42 = vsel %vm6099_vm0, %v3970_v26, 64  ;;  %v1074_v33 = vsel %vm6100_vm1, %v3970_v26, 64  ;;  %vm6101_vm2 = vcmp.le.f32.partialorder %v3897_v49, %v3961_v28 }
 0x103   : > { %v1075_v1 = vsel %vm6101_vm2, %v3973_v25, 64  ;;  %vm6102_vm3 = vcmp.le.f32.partialorder %v3899_v63, %v3963_v55  ;;  %vm6103_vm4 = vcmp.le.f32.partialorder %v3879_v22, %v3965_v29  ;;  %vm6104_vm5 = vcmp.le.f32.partialorder %v3903_v27, %v3967_v43 }
 0x104   : > { %v1076_v36 = vsel %vm6102_vm3, %v3973_v25, 64  ;;  %v1077_v21 = vsel %vm6103_vm4, %v3973_v25, 64  ;;  %v1078_v10 = vsel %vm6104_vm5, %v3973_v25, 64  ;;  %vm6105_vm6 = vcmp.le.f32.partialorder %v3922_v45, %v3961_v28 }
 0x105   : > { %v1079_v32 = vsel %vm6105_vm6, %v3976_v34, 64  ;;  %v1080_v49 = vsel %vm1048_vm11, %v3976_v34, 64  ;;  %v1081_v22 = vsel %vm1049_vm12, %v3976_v34, 64  ;;  %v1082_v11 = vsel %vm1050_vm13, %v3976_v34, 64 }
 0x106   : > { %v1083_v45 = vsel %vm1051_vm14, %v3979_v39, 64  ;;  %v1084_v13 = vsel %vm1052_vm15, %v3979_v39, 64  ;;  %v1085_v20 = vsel %vm1053_vm9, %v3979_v39, 64  ;;  %v1086_v23 = vsel %vm1054_vm10, %v3979_v39, 64 }
 0x107   : > { %vm1087_vm11 = vcmp.lt.s32.totalorder %v1055_v50, %v1059_v47  ;;  %vm1110_vm12 = vcmp.lt.s32.totalorder %v1056_v8, %v1060_v52  ;;  %vm1133_vm13 = vcmp.lt.s32.totalorder %v1057_v53, %v1061_v0  ;;  %vm1156_vm7 = vcmp.lt.s32.totalorder %v1058_v51, %v1062_v57 }
 0x108   : > { %v1088_v9 = vsel %vm1087_vm11, %v1055_v50, %v1059_v47  ;;  %v1111_v60 = vsel %vm1110_vm12, %v1056_v8, %v1060_v52  ;;  %v1134_v5 = vsel %vm1133_vm13, %v1057_v53, %v1061_v0  ;;  %v1157_v40 = vsel %vm1156_vm7, %v1058_v51, %v1062_v57 }
 0x109   : > { %vm1089_vm14 = vcmp.lt.s32.totalorder %v1088_v9, %v1063_v35  ;;  %vm1112_vm15 = vcmp.lt.s32.totalorder %v1111_v60, %v1064_v24  ;;  %vm1135_vm8 = vcmp.lt.s32.totalorder %v1134_v5, %v1065_v2  ;;  %vm1158_vm0 = vcmp.lt.s32.totalorder %v1157_v40, %v1066_v37 }
 0x10a   : > { %v1090_v27 = vsel %vm1089_vm14, %v1088_v9, %v1063_v35  ;;  %v1113_v48 = vsel %vm1112_vm15, %v1111_v60, %v1064_v24  ;;  %v1136_v6 = vsel %vm1135_vm8, %v1134_v5, %v1065_v2  ;;  %v1159_v19 = vsel %vm1158_vm0, %v1157_v40, %v1066_v37 }
 0x10b   : > { %vm1091_vm9 = vcmp.lt.s32.totalorder %v1090_v27, %v1067_v58  ;;  %vm1114_vm1 = vcmp.lt.s32.totalorder %v1113_v48, %v1068_v38  ;;  %vm1137_vm2 = vcmp.lt.s32.totalorder %v1136_v6, %v1069_v62  ;;  %vm1160_vm10 = vcmp.lt.s32.totalorder %v1159_v19, %v1070_v41 }
 0x10c   : > { %v1092_v17 = vsel %vm1091_vm9, %v1090_v27, %v1067_v58  ;;  %v1115_v54 = vsel %vm1114_vm1, %v1113_v48, %v1068_v38  ;;  %v1138_v7 = vsel %vm1137_vm2, %v1136_v6, %v1069_v62  ;;  %v1161_v63 = vsel %vm1160_vm10, %v1159_v19, %v1070_v41 }
 0x10d   : > { %vm1093_vm3 = vcmp.lt.s32.totalorder %v1092_v17, %v1071_v18  ;;  %vm1116_vm4 = vcmp.lt.s32.totalorder %v1115_v54, %v1072_v56  ;;  %vm1139_vm5 = vcmp.lt.s32.totalorder %v1138_v7, %v1073_v42  ;;  %vm1162_vm6 = vcmp.lt.s32.totalorder %v1161_v63, %v1074_v33 }
 0x10e   : > { %v1094_v50 = vsel %vm1093_vm3, %v1092_v17, %v1071_v18  ;;  %v1117_v8 = vsel %vm1116_vm4, %v1115_v54, %v1072_v56  ;;  %v1140_v53 = vsel %vm1139_vm5, %v1138_v7, %v1073_v42  ;;  %v1163_v51 = vsel %vm1162_vm6, %v1161_v63, %v1074_v33 }
 0x10f   : > { %vm1095_vm11 = vcmp.lt.s32.totalorder %v1094_v50, %v1075_v1  ;;  %vm1118_vm12 = vcmp.lt.s32.totalorder %v1117_v8, %v1076_v36  ;;  %vm1141_vm13 = vcmp.lt.s32.totalorder %v1140_v53, %v1077_v21  ;;  %vm1164_vm7 = vcmp.lt.s32.totalorder %v1163_v51, %v1078_v10 }
 0x110   : > { %v1096_v40 = vsel %vm1095_vm11, %v1094_v50, %v1075_v1  ;;  %v1119_v5 = vsel %vm1118_vm12, %v1117_v8, %v1076_v36  ;;  %v1142_v60 = vsel %vm1141_vm13, %v1140_v53, %v1077_v21  ;;  %v1165_v9 = vsel %vm1164_vm7, %v1163_v51, %v1078_v10  ;;  %v6107_v50 = vld [vmem:[#allocation24_spill] sm:$0xff]  ;;  %v6108_v51 = vld [vmem:[#allocation7_spill] sm:$0xff] }
 0x111   : > { %vm1097_vm14 = vcmp.lt.s32.totalorder %v1096_v40, %v1079_v32  ;;  %vm1120_vm15 = vcmp.lt.s32.totalorder %v1119_v5, %v1080_v49  ;;  %vm1143_vm8 = vcmp.lt.s32.totalorder %v1142_v60, %v1081_v22  ;;  %vm1166_vm0 = vcmp.lt.s32.totalorder %v1165_v9, %v1082_v11 }
 0x112   : > { %v1098_v6 = vsel %vm1097_vm14, %v1096_v40, %v1079_v32  ;;  %v1121_v48 = vsel %vm1120_vm15, %v1119_v5, %v1080_v49  ;;  %v1144_v27 = vsel %vm1143_vm8, %v1142_v60, %v1081_v22  ;;  %v1167_v19 = vsel %vm1166_vm0, %v1165_v9, %v1082_v11  ;;  %v6109_v5 = vld [vmem:[#allocation28_spill] sm:$0xff]  ;;  %v6110_v9 = vld [vmem:[#allocation10_spill] sm:$0xff] }
 0x113   : > { %vm1099_vm9 = vcmp.lt.s32.totalorder %v1098_v6, %v1083_v45  ;;  %vm1122_vm1 = vcmp.lt.s32.totalorder %v1121_v48, %v1084_v13  ;;  %vm1145_vm2 = vcmp.lt.s32.totalorder %v1144_v27, %v1085_v20  ;;  %vm1168_vm10 = vcmp.lt.s32.totalorder %v1167_v19, %v1086_v23 }
 0x114   : > { %v1100_v7 = vsel %vm1099_vm9, %v1098_v6, %v1083_v45  ;;  %v1123_v17 = vsel %vm1122_vm1, %v1121_v48, %v1084_v13  ;;  %v1146_v63 = vsel %vm1145_vm2, %v1144_v27, %v1085_v20  ;;  %v1169_v54 = vsel %vm1168_vm10, %v1167_v19, %v1086_v23  ;;  %v6112_v19 = vld [vmem:[#allocation14_spill] sm:$0xff] }
 0x115   : > { %v1101_v1 = vrot.slane %v1100_v7, 4  ;;  %v1124_v36 = vrot.slane %v1123_v17, 4  ;;  %v1147_v21 = vrot.slane %v1146_v63, 4  ;;  %v1170_v10 = vrot.slane %v1169_v54, 4 }
 0x116   : > { %v1212_v45 = vadd.f32 1e-08, %v3963_v55  ;;  %v1214_v38 = vadd.f32 1e-08, %v3967_v43  ;;  %v1211_v18 = vadd.f32 1e-08, %v3961_v28 }
 0x117   : > { %vm1102_vm3 = vcmp.lt.s32.totalorder %v1100_v7, %v1101_v1  ;;  %vm1125_vm4 = vcmp.lt.s32.totalorder %v1123_v17, %v1124_v36  ;;  %vm1148_vm5 = vcmp.lt.s32.totalorder %v1146_v63, %v1147_v21  ;;  %vm1171_vm6 = vcmp.lt.s32.totalorder %v1169_v54, %v1170_v10 }
 0x118   : > { %v1103_v32 = vsel %vm1102_vm3, %v1100_v7, %v1101_v1  ;;  %v1126_v49 = vsel %vm1125_vm4, %v1123_v17, %v1124_v36  ;;  %v1149_v22 = vsel %vm1148_vm5, %v1146_v63, %v1147_v21  ;;  %v1172_v11 = vsel %vm1171_vm6, %v1169_v54, %v1170_v10  ;;  %v6117_v10 = vld [vmem:[#allocation18_spill] sm:$0xff] }
 0x119   : > { %v1104_v47 = vrot.slane %v1103_v32, 2  ;;  %v1127_v52 = vrot.slane %v1126_v49, 2  ;;  %v1150_v0 = vrot.slane %v1149_v22, 2  ;;  %v1173_v57 = vrot.slane %v1172_v11, 2 }
 0x11a   : > { %3402 = vrcp.f32 %v1212_v45  ;;  %v1213_v56 = vadd.f32 1e-08, %v3965_v29 }
 0x11b   : > { %vm1105_vm11 = vcmp.lt.s32.totalorder %v1103_v32, %v1104_v47  ;;  %vm1128_vm12 = vcmp.lt.s32.totalorder %v1126_v49, %v1127_v52  ;;  %vm1151_vm13 = vcmp.lt.s32.totalorder %v1149_v22, %v1150_v0  ;;  %vm1174_vm7 = vcmp.lt.s32.totalorder %v1172_v11, %v1173_v57 }
 0x11c   : > { %v1106_v20 = vsel %vm1105_vm11, %v1103_v32, %v1104_v47  ;;  %v1129_v23 = vsel %vm1128_vm12, %v1126_v49, %v1127_v52  ;;  %v1152_v13 = vsel %vm1151_vm13, %v1149_v22, %v1150_v0  ;;  %v1175_v35 = vsel %vm1174_vm7, %v1172_v11, %v1173_v57  ;;  %v6118_v49 = vld [vmem:[#allocation22_spill] sm:$0xff]  ;;  %v6119_v47 = vld [vmem:[#allocation25_spill] sm:$0xff] }
 0x11d   : > { %v1107_v24 = vrot.slane %v1106_v20, 1  ;;  %v1130_v2 = vrot.slane %v1129_v23, 1  ;;  %v1153_v37 = vrot.slane %v1152_v13, 1  ;;  %v1176_v58 = vrot.slane %v1175_v35, 1  ;;  %v6120_v57 = vld [vmem:[#allocation5_spill] sm:$0xff] }
 0x11e   : > { %3404 = vrcp.f32 %v1214_v38 }
 0x11f   : > { %vm1131_vm14 = vcmp.lt.s32.totalorder %v1129_v23, %v1130_v2  ;;  %vm1154_vm15 = vcmp.lt.s32.totalorder %v1152_v13, %v1153_v37  ;;  %vm1177_vm8 = vcmp.lt.s32.totalorder %v1175_v35, %v1176_v58  ;;  %vm1108_vm0 = vcmp.lt.s32.totalorder %v1106_v20, %v1107_v24 }
 0x120   : > { %v4175_v62 = vsel %vm1131_vm14, %v1129_v23, %v1130_v2  ;;  %v4177_v55 = vsel %vm1154_vm15, %v1152_v13, %v1153_v37  ;;  %v4179_v41 = vsel %vm1177_vm8, %v1175_v35, %v1176_v58  ;;  %v4199_v28 = vsel %vm1108_vm0, %v1106_v20, %v1107_v24  ;;  %v6121_v23 = vld [vmem:[#allocation8_spill] sm:$0xff]  ;;  %v6122_v35 = vld [vmem:[#allocation11_spill] sm:$0xff] }
 0x121   : > { %vm6013_vm9 = vcmp.eq.s32.totalorder %v3979_v39, %v4177_v55  ;;  %vm6015_vm1 = vcmp.eq.s32.totalorder %v3979_v39, %v4175_v62  ;;  %vm6014_vm2 = vcmp.eq.s32.totalorder %v3979_v39, %v4179_v41  ;;  %vm1180_vm10 = vcmp.eq.s32.totalorder %v3647_v12, %v4175_v62  ;;  %v6123_v2 = vld [vmem:[#allocation15_spill] sm:$0xff]  ;;  %v6124_v58 = vld [vmem:[#allocation20_spill] sm:$0xff] }
 0x122   : > { %v4191_v43 = vsel %vm6013_vm9, inf, %v3944_v15  ;;  %vm1184_vm3 = vcmp.eq.s32.totalorder %v3953_v30, %v4175_v62  ;;  %3406 = vrcp.f32 %v1211_v18  ;;  %vm1188_vm4 = vcmp.eq.s32.totalorder %v3956_v4, %v4175_v62 }
 0x123   : > { %6106 = vst [vmem:[#allocation12_spill] sm:$0xff] %v4191_v43  ;;  %vm1192_vm5 = vcmp.eq.s32.totalorder %v3959_v16, %v4175_v62  ;;  %vm6024_vm6 = vcmp.eq.s32.totalorder %v3970_v26, %v4175_v62  ;;  %vm6023_vm11 = vcmp.eq.s32.totalorder %v3973_v25, %v4175_v62  ;;  %v4213_v15 = vsel %vm1180_vm10, inf, %v3757_v3 }
 0x124   : > { %v4219_v29 = vsel %vm1184_vm3, inf, %v3767_v14  ;;  %3408 = vrcp.f32 %v1213_v56  ;;  %v4225_v42 = vsel %vm6015_vm1, inf, %v3942_v46  ;;  %v4231_v33 = vsel %vm6014_vm2, inf, %v3946_v31  ;;  %v4247_v46 = vpop.eup %3402  ;;  %v6125_v56 = vld [vmem:[#allocation29_spill] sm:$0xff] }
 0x125   : > { %vm6016_vm12 = vcmp.eq.s32.totalorder %v3976_v34, %v4175_v62  ;;  %v4239_v3 = vsel %vm1188_vm4, inf, %v6084_v44  ;;  %v1304_v14 = vmin.f32 %v4213_v15, %v4219_v29  ;;  %vm1182_vm13 = vcmp.eq.s32.totalorder %v3647_v12, %v4179_v41 }
 0x126   : > { %vm1186_vm7 = vcmp.eq.s32.totalorder %v3953_v30, %v4179_v41  ;;  %v4253_v31 = vsel %vm1192_vm5, inf, %v6088_v61  ;;  %v4259_v44 = vsel %vm6024_vm6, inf, %v3889_v59  ;;  %v4265_v8 = vsel %vm6023_vm11, inf, %v6107_v50 }
 0x127   : > { %vm1190_vm14 = vcmp.eq.s32.totalorder %v3956_v4, %v4179_v41  ;;  %v4273_v61 = vsel %vm1180_vm10, %v4247_v46, 0.0  ;;  %v4279_v59 = vsel %vm1184_vm3, %v4247_v46, 0.0  ;;  %v1305_v53 = vmin.f32 %v1304_v14, %v4239_v3 }
 0x128   : > { %v4286_v40 = vsel %vm1182_vm13, inf, %v6108_v51  ;;  %v4292_v60 = vsel %vm6016_vm12, inf, %v6109_v5  ;;  %vm1194_vm15 = vcmp.eq.s32.totalorder %v3959_v16, %v4179_v41  ;;  %vm6022_vm8 = vcmp.eq.s32.totalorder %v3970_v26, %v4179_v41  ;;  %v4323_v17 = vpop.eup %3404 }
 0x129   : > { %v4302_v6 = vsel %vm1186_vm7, inf, %v6110_v9  ;;  %v1306_v48 = vmin.f32 %v1305_v53, %v4253_v31  ;;  %vm6021_vm0 = vcmp.eq.s32.totalorder %v3973_v25, %v4179_v41  ;;  %vm6020_vm10 = vcmp.eq.s32.totalorder %v3976_v34, %v4179_v41  ;;  %v6126_v9 = vld [vmem:[#allocation23_spill] sm:$0xff] }
 0x12a   : > { %6111 = vst [vmem:[#allocation16_spill] sm:$0xff] %v4302_v6  ;;  %v1330_v27 = vmin.f32 %v4286_v40, %v4302_v6  ;;  %v4315_v7 = vsel %vm1190_vm14, inf, %v6112_v19  ;;  %vm1179_vm3 = vcmp.eq.s32.totalorder %v3647_v12, %v4199_v28  ;;  %vm1183_vm9 = vcmp.eq.s32.totalorder %v3953_v30, %v4199_v28 }
 0x12b   : > { %6113 = vst [vmem:[#allocation24_spill] sm:$0xff] %v4315_v7  ;;  %vm6019_vm2 = vcmp.eq.s32.totalorder %v3956_v4, %v4199_v28  ;;  %v1307_v63 = vmin.f32 %v1306_v48, %v4259_v44  ;;  %vm6017_vm1 = vcmp.eq.s32.totalorder %v3959_v16, %v4199_v28  ;;  %vm6018_vm12 = vcmp.eq.s32.totalorder %v3970_v26, %v4199_v28 }
 0x12c   : > { %v1331_v54 = vmin.f32 %v1330_v27, %v4315_v7  ;;  %v4331_v1 = vpop.eup %3406  ;;  %v4337_v36 = vsel %vm1182_vm13, %v4323_v17, 0.0  ;;  %v4343_v21 = vsel %vm1186_vm7, %v4323_v17, 0.0  ;;  %v4349_v32 = vsel %vm1194_vm15, inf, %v6117_v10 }
 0x12d   : > { %6114 = vst [vmem:[#allocation7_spill] sm:$0xff] %v4331_v1  ;;  %6115 = vst [vmem:[#allocation28_spill] sm:$0xff] %v4337_v36  ;;  %v4355_v22 = vsel %vm6022_vm8, inf, %v6118_v49  ;;  %vm1207_vm13 = vcmp.eq.s32.totalorder %v3979_v39, %v4199_v28  ;;  %v1308_v11 = vmin.f32 %v1307_v63, %v4265_v8  ;;  %v4364_v52 = vsel %vm6021_vm0, inf, %v6119_v47 }
 0x12e   : > { %6116 = vst [vmem:[#allocation10_spill] sm:$0xff] %v4343_v21  ;;  %v1332_v0 = vmin.f32 %v1331_v54, %v4349_v32  ;;  %v4371_v45 = vsel %vm1179_vm3, inf, %v6120_v57  ;;  %v4373_v20 = vpop.eup %3408  ;;  %v4379_v13 = vsel %vm1183_vm9, inf, %v6121_v23  ;;  %v4385_v24 = vsel %vm6019_vm2, inf, %v6122_v35  ;;  %v6127_v54 = vld [vmem:[#allocation6_spill] sm:$0xff]  ;;  %v6133_v23 = vld [vmem:[#allocation17_spill] sm:$0xff] }
 0x12f   : > { %v4391_v37 = vsel %vm6017_vm1, inf, %v6123_v2  ;;  %v4397_v38 = vsel %vm6018_vm12, inf, %v6124_v58  ;;  %v1309_v18 = vmin.f32 %v1308_v11, %v4292_v60  ;;  %v4404_v14 = vsel %vm6020_vm10, inf, %v6125_v56  ;;  %v6129_v11 = vld [vmem:[#allocation9_spill] sm:$0xff] }
 0x130   : > { %v1333_v50 = vmin.f32 %v1332_v0, %v4355_v22  ;;  %vm1199_vm7 = vcmp.eq.s32.totalorder %v3973_v25, %v4199_v28  ;;  %vm1203_vm1 = vcmp.eq.s32.totalorder %v3976_v34, %v4199_v28  ;;  %v1291_v53 = vmin.f32 %v4371_v45, %v4379_v13  ;;  %v6131_v0 = vld [vmem:[#allocation13_spill] sm:$0xff] }
 0x131   : > { %vm1181_vm12 = vcmp.eq.s32.totalorder %v3647_v12, %v4177_v55  ;;  %vm1185_vm2 = vcmp.eq.s32.totalorder %v3953_v30, %v4177_v55  ;;  %v1310_v51 = vmin.f32 %v1309_v18, %v4225_v42  ;;  %vm1189_vm10 = vcmp.eq.s32.totalorder %v3956_v4, %v4177_v55  ;;  %v6135_v18 = vld [vmem:[#allocation21_spill] sm:$0xff] }
 0x132   : > { %v1334_v5 = vmin.f32 %v1333_v50, %v4364_v52  ;;  %vm1193_vm0 = vcmp.eq.s32.totalorder %v3959_v16, %v4177_v55  ;;  %v4427_v48 = vsel %vm1199_vm7, inf, %v6126_v9  ;;  %v1292_v27 = vmin.f32 %v1291_v53, %v4385_v24  ;;  %v6137_v50 = vld [vmem:[#allocation19_spill] sm:$0xff]  ;;  %v6139_v9 = vld [vmem:[#allocation26_spill] sm:$0xff] }
 0x133   : > { %vm1197_vm8 = vcmp.eq.s32.totalorder %v3970_v26, %v4177_v55  ;;  %vm1201_vm11 = vcmp.eq.s32.totalorder %v3973_v25, %v4177_v55  ;;  %v1311_v19 = vrot.slane %v1310_v51, 4  ;;  %vm1205_vm6 = vcmp.eq.s32.totalorder %v3976_v34, %v4177_v55 }
 0x134   : > { %v1335_v63 = vmin.f32 %v1334_v5, %v4404_v14  ;;  %v4441_v10 = vsel %vm1181_vm12, inf, %v6127_v54  ;;  %v1293_v49 = vmin.f32 %v1292_v27, %v4391_v37  ;;  %v4448_v47 = vsel %vm1185_vm2, inf, %v6129_v11 }
 0x135   : > { %6128 = vst [vmem:[#allocation14_spill] sm:$0xff] %v4441_v10  ;;  %6130 = vst [vmem:[#allocation18_spill] sm:$0xff] %v4448_v47  ;;  %v4454_v57 = vsel %vm1189_vm10, inf, %v6131_v0  ;;  %v4460_v35 = vsel %vm1193_vm0, inf, %v6133_v23  ;;  %v1312_v2 = vmin.f32 %v1310_v51, %v1311_v19  ;;  %v4467_v56 = vsel %vm1197_vm8, inf, %v6135_v18  ;;  %v6142_v0 = vld [vmem:[#allocation30_spill] sm:$0xff] }
 0x136   : > { %6132 = vst [vmem:[#allocation22_spill] sm:$0xff] %v4454_v57  ;;  %6134 = vst [vmem:[#allocation25_spill] sm:$0xff] %v4460_v35  ;;  %v1336_v58 = vmin.f32 %v1335_v63, %v4231_v33  ;;  %v4473_v53 = vsel %vm1201_vm11, inf, %v6137_v50  ;;  %v1294_v5 = vmin.f32 %v1293_v49, %v4397_v38  ;;  %v4480_v51 = vsel %vm1205_vm6, inf, %v6139_v9 }
 0x137   : > { %6136 = vst [vmem:[#allocation5_spill] sm:$0xff] %v4467_v56  ;;  %6138 = vst [vmem:[#allocation8_spill] sm:$0xff] %v4473_v53  ;;  %v1317_v27 = vmin.f32 %v4441_v10, %v4448_v47  ;;  %v4488_v19 = vsel %vm1188_vm4, %v4247_v46, 0.0  ;;  %v1313_v63 = vrot.slane %v1312_v2, 2  ;;  %v4494_v49 = vsel %vm1192_vm5, %v4247_v46, 0.0 }
 0x138   : > { %6140 = vst [vmem:[#allocation11_spill] sm:$0xff] %v4480_v51  ;;  %v1337_v54 = vrot.slane %v1336_v58, 4  ;;  %v4500_v11 = vsel %vm1190_vm14, %v4323_v17, 0.0  ;;  %v4506_v23 = vsel %vm1207_vm13, inf, %v6142_v0  ;;  %v1295_v18 = vmin.f32 %v1294_v5, %v4427_v48  ;;  %v6145_v0 = vld [vmem:[#allocation27_spill] sm:$0xff] }
 0x139   : > { %6141 = vst [vmem:[#allocation15_spill] sm:$0xff] %v4500_v11  ;;  %v1318_v50 = vmin.f32 %v1317_v27, %v4454_v57  ;;  %v4514_v9 = vsel %vm1194_vm15, %v4323_v17, 0.0  ;;  %v1314_v21 = vmin.f32 %v1312_v2, %v1313_v63  ;;  %v4520_v11 = vsel %vm1179_vm3, %v4331_v1, 0.0 }
 0x13a   : > { %6143 = vst [vmem:[#allocation20_spill] sm:$0xff] %v4514_v9  ;;  %v1338_v36 = vmin.f32 %v1336_v58, %v1337_v54  ;;  %6144 = vst [vmem:[#allocation29_spill] sm:$0xff] %v4520_v11  ;;  %v4526_v5 = vsel %vm1203_vm1, inf, %v6145_v0  ;;  %v4532_v27 = vsel %vm1183_vm9, %v4331_v1, 0.0  ;;  %vm6147_vm4 = vcmp.eq.s32.totalorder %v3970_v26, %v4175_v62 }
 0x13b   : > { %6146 = vst [vmem:[#allocation23_spill] sm:$0xff] %v4532_v27  ;;  %v1296_v2 = vmin.f32 %v1295_v18, %v4526_v5  ;;  %v1319_v58 = vmin.f32 %v1318_v50, %v4460_v35  ;;  %v4540_v63 = vsel %vm6147_vm4, %v4247_v46, 0.0  ;;  %v1315_v54 = vrot.slane %v1314_v21, 1 }
 0x13c   : > { %v1339_v11 = vrot.slane %v1338_v36, 2  ;;  %vm6148_vm5 = vcmp.eq.s32.totalorder %v3973_v25, %v4175_v62  ;;  %vm6149_vm9 = vcmp.eq.s32.totalorder %v3970_v26, %v4179_v41  ;;  %v4559_v27 = vsel %vm1181_vm12, %v4373_v20, 0.0 }
 0x13d   : > { %v4546_v0 = vsel %vm6148_vm5, %v4247_v46, 0.0  ;;  %v4552_v18 = vsel %vm6149_vm9, %v4323_v17, 0.0  ;;  %v1297_v50 = vmin.f32 %v1296_v2, %v4506_v23  ;;  %6151 = vst [vmem:[#allocation9_spill] sm:$0xff] %v4559_v27  ;;  %v1320_v9 = vmin.f32 %v1319_v58, %v4467_v56 }
 0x13e   : > { %6150 = vst [vmem:[#allocation6_spill] sm:$0xff] %v4552_v18  ;;  %vm6152_vm14 = vcmp.eq.s32.totalorder %v3973_v25, %v4179_v41  ;;  %v1316_v57 = vmin.f32 %v1314_v21, %v1315_v54  ;;  %v4572_v2 = vsel %vm1185_vm2, %v4373_v20, 0.0  ;;  %vm6155_vm12 = vcmp.eq.s32.totalorder %v3956_v4, %v4199_v28 }
 0x13f   : > { %v4566_v35 = vsel %vm6152_vm14, %v4323_v17, 0.0  ;;  %6154 = vst [vmem:[#allocation17_spill] sm:$0xff] %v4572_v2  ;;  %v4578_v27 = vsel %vm6155_vm12, %v4331_v1, 0.0  ;;  %vm6157_vm15 = vcmp.eq.s32.totalorder %v3959_v16, %v4199_v28  ;;  %v1321_v21 = vmin.f32 %v1320_v9, %v4473_v53 }
 0x140   : > { %6153 = vst [vmem:[#allocation13_spill] sm:$0xff] %v4566_v35  ;;  %6156 = vst [vmem:[#allocation21_spill] sm:$0xff] %v4578_v27  ;;  %v4584_v58 = vsel %vm6157_vm15, %v4331_v1, 0.0  ;;  %v4591_v54 = vsel %vm1189_vm10, %v4373_v20, 0.0  ;;  %v4597_v2 = vsel %vm1193_vm0, %v4373_v20, 0.0  ;;  %vm6161_vm2 = vcmp.eq.s32.totalorder %v3976_v34, %v4175_v62 }
 0x141   : > { %6158 = vst [vmem:[#allocation19_spill] sm:$0xff] %v4584_v58  ;;  %6159 = vst [vmem:[#allocation26_spill] sm:$0xff] %v4591_v54  ;;  %v4603_v27 = vsel %vm6161_vm2, %v4247_v46, 0.0  ;;  %vm1344_vm3 = vcmp.le.f32.partialorder %v4213_v15, %v1316_v57  ;;  %vm1348_vm4 = vcmp.le.f32.partialorder %v4219_v29, %v1316_v57  ;;  %v1340_v9 = vmin.f32 %v1338_v36, %v1339_v11 }
 0x142   : > { %6160 = vst [vmem:[#allocation30_spill] sm:$0xff] %v4597_v2  ;;  %6162 = vst [vmem:[#allocation27_spill] sm:$0xff] %v4603_v27  ;;  %vm6163_vm10 = vcmp.eq.s32.totalorder %v3970_v26, %v4199_v28  ;;  %vm1352_vm0 = vcmp.le.f32.partialorder %v4239_v3, %v1316_v57  ;;  %v1298_v2 = vrot.slane %v1297_v50, 4  ;;  %v4618_v58 = vsel %vm1199_vm7, %v4331_v1, 0.0 }
 0x143   : > { %v4611_v54 = vsel %vm6163_vm10, %v4331_v1, 0.0  ;;  %6165 = vst [vmem:[#allocation32_spill] sm:$0xff] %v4618_v58  ;;  %v4624_v36 = vsel %vm1197_vm8, %v4373_v20, 0.0  ;;  %vm1356_vm5 = vcmp.le.f32.partialorder %v4253_v31, %v1316_v57  ;;  %v1376_v11 = vsel %vm1344_vm3, %v3647_v12, 64 }
 0x144   : > { %6164 = vst [vmem:[#allocation31_spill] sm:$0xff] %v4611_v54  ;;  %6166 = vst [vmem:[#allocation33_spill] sm:$0xff] %v4624_v36  ;;  %v1380_v54 = vsel %vm1348_vm4, %v3953_v30, 64  ;;  %v4633_v35 = vsel %vm1201_vm11, %v4373_v20, 0.0  ;;  %vm1360_vm7 = vcmp.le.f32.partialorder %v4259_v44, %v1316_v57  ;;  %vm1364_vm9 = vcmp.le.f32.partialorder %v4265_v8, %v1316_v57 }
 0x145   : > { %6167 = vst [vmem:[#allocation34_spill] sm:$0xff] %v4633_v35  ;;  %vm1368_vm14 = vcmp.le.f32.partialorder %v4292_v60, %v1316_v57  ;;  %vm1372_vm8 = vcmp.le.f32.partialorder %v4225_v42, %v1316_v57  ;;  %v1384_v36 = vsel %vm1352_vm0, %v3956_v4, 64  ;;  %vm1430_vm12 = vcmp.lt.s32.totalorder %v1376_v11, %v1380_v54 }
 0x146   : > { %v1532_v58 = vadd.f32 1e-08, %v1316_v57  ;;  %v1341_v18 = vrot.slane %v1340_v9, 1  ;;  %v1431_v53 = vsel %vm1430_vm12, %v1376_v11, %v1380_v54  ;;  %v1322_v56 = vmin.f32 %v1321_v21, %v4480_v51 }
 0x147   : > { %vm6168_vm11 = vcmp.eq.s32.totalorder %v3979_v39, %v4175_v62  ;;  %vm6170_vm15 = vcmp.eq.s32.totalorder %v3976_v34, %v4179_v41  ;;  %vm1432_vm2 = vcmp.lt.s32.totalorder %v1431_v53, %v1384_v36  ;;  %v1299_v27 = vmin.f32 %v1297_v50, %v1298_v2 }
 0x148   : > { %v4645_v35 = vsel %vm6168_vm11, %v4247_v46, 0.0  ;;  %v4651_v47 = vsel %vm6170_vm15, %v4323_v17, 0.0  ;;  %3410 = vrcp.f32 %v1532_v58  ;;  %v1342_v10 = vmin.f32 %v1340_v9, %v1341_v18 }
 0x149   : > { %6169 = vst [vmem:[#allocation35_spill] sm:$0xff] %v4645_v35  ;;  %6171 = vst [vmem:[#allocation36_spill] sm:$0xff] %v4651_v47  ;;  %v1388_v21 = vsel %vm1356_vm5, %v3959_v16, 64  ;;  %v1433_v54 = vsel %vm1432_vm2, %v1431_v53, %v1384_v36  ;;  %v1323_v11 = vmin.f32 %v1322_v56, %v4191_v43  ;;  %vm6172_vm3 = vcmp.eq.s32.totalorder %v3979_v39, %v4179_v41 }
 0x14a   : > { %v4661_v62 = vsel %vm6172_vm3, %v4323_v17, 0.0  ;;  %v1392_v47 = vsel %vm1360_vm7, %v3970_v26, 64  ;;  %vm1434_vm4 = vcmp.lt.s32.totalorder %v1433_v54, %v1388_v21  ;;  %vm1346_vm10 = vcmp.le.f32.partialorder %v4286_v40, %v1342_v10 }
 0x14b   : > { %6173 = vst [vmem:[#allocation37_spill] sm:$0xff] %v4661_v62  ;;  %vm1350_vm0 = vcmp.le.f32.partialorder %v4302_v6, %v1342_v10  ;;  %v1396_v53 = vsel %vm1364_vm9, %v3973_v25, 64  ;;  %v1400_v56 = vsel %vm1368_vm14, %v3976_v34, 64  ;;  %v1404_v41 = vsel %vm1372_vm8, %v3979_v39, 64 }
 0x14c   : > { %v1435_v18 = vsel %vm1434_vm4, %v1433_v54, %v1388_v21  ;;  %v1378_v50 = vsel %vm1346_vm10, %v3647_v12, 64  ;;  %v1300_v2 = vrot.slane %v1299_v27, 2  ;;  %v4682_v58 = vsel %vm1203_vm1, %v4331_v1, 0.0 }
 0x14d   : > { %vm1436_vm5 = vcmp.lt.s32.totalorder %v1435_v18, %v1392_v47  ;;  %6174 = vst [vmem:[#allocation38_spill] sm:$0xff] %v4682_v58  ;;  %vm1354_vm7 = vcmp.le.f32.partialorder %v4315_v7, %v1342_v10  ;;  %vm1358_vm9 = vcmp.le.f32.partialorder %v4349_v32, %v1342_v10  ;;  %v1382_v36 = vsel %vm1350_vm0, %v3953_v30, 64 }
 0x14e   : > { %v1437_v9 = vsel %vm1436_vm5, %v1435_v18, %v1392_v47  ;;  %vm1362_vm8 = vcmp.le.f32.partialorder %v4355_v22, %v1342_v10  ;;  %vm1366_vm12 = vcmp.le.f32.partialorder %v4364_v52, %v1342_v10  ;;  %vm1370_vm11 = vcmp.le.f32.partialorder %v4404_v14, %v1342_v10 }
 0x14f   : > { %vm1438_vm14 = vcmp.lt.s32.totalorder %v1437_v9, %v1396_v53  ;;  %vm1374_vm15 = vcmp.le.f32.partialorder %v4231_v33, %v1342_v10  ;;  %vm1476_vm2 = vcmp.lt.s32.totalorder %v1378_v50, %v1382_v36  ;;  %v1534_v21 = vadd.f32 1e-08, %v1342_v10 }
 0x150   : > { %v1439_v57 = vsel %vm1438_vm14, %v1437_v9, %v1396_v53  ;;  %v1386_v47 = vsel %vm1354_vm7, %v3956_v4, 64  ;;  %v1477_v54 = vsel %vm1476_vm2, %v1378_v50, %v1382_v36  ;;  %v1301_v18 = vmin.f32 %v1299_v27, %v1300_v2 }
 0x151   : > { %vm1440_vm1 = vcmp.lt.s32.totalorder %v1439_v57, %v1400_v56  ;;  %vm1478_vm3 = vcmp.lt.s32.totalorder %v1477_v54, %v1386_v47  ;;  %3412 = vrcp.f32 %v1534_v21  ;;  %v1324_v62 = vrot.slane %v1323_v11, 4 }
 0x152   : > { %v1441_v58 = vsel %vm1440_vm1, %v1439_v57, %v1400_v56  ;;  %v4692_v35 = vpop.eup %3410  ;;  %v1390_v53 = vsel %vm1358_vm9, %v3959_v16, 64  ;;  %v1479_v9 = vsel %vm1478_vm3, %v1477_v54, %v1386_v47  ;;  %v1302_v43 = vrot.slane %v1301_v18, 1 }
 0x153   : > { %vm1442_vm4 = vcmp.lt.s32.totalorder %v1441_v58, %v1404_v41  ;;  %v1394_v6 = vsel %vm1362_vm8, %v3970_v26, 64  ;;  %v1398_v27 = vsel %vm1366_vm12, %v3973_v25, 64  ;;  %vm1480_vm10 = vcmp.lt.s32.totalorder %v1479_v9, %v1390_v53 }
 0x154   : > { %v1443_v7 = vsel %vm1442_vm4, %v1441_v58, %v1404_v41  ;;  %v1402_v50 = vsel %vm1370_vm11, %v3976_v34, 64  ;;  %v1481_v2 = vsel %vm1480_vm10, %v1479_v9, %v1390_v53  ;;  %v1303_v36 = vmin.f32 %v1301_v18, %v1302_v43 }
 0x155   : > { %v1444_v56 = vrot.slane %v1443_v7, 4  ;;  %v1406_v41 = vsel %vm1374_vm15, %v3979_v39, 64  ;;  %vm1482_vm0 = vcmp.lt.s32.totalorder %v1481_v2, %v1394_v6  ;;  %v1325_v58 = vmin.f32 %v1323_v11, %v1324_v62 }
 0x156   : > { %v4711_v57 = vadd.f32 %v4692_v35, %v4247_v46  ;;  %v1483_v21 = vsel %vm1482_vm0, %v1481_v2, %v1394_v6  ;;  %vm1343_vm7 = vcmp.le.f32.partialorder %v4371_v45, %v1303_v36  ;;  %vm1347_vm9 = vcmp.le.f32.partialorder %v4379_v13, %v1303_v36 }
 0x157   : > { %vm1445_vm5 = vcmp.lt.s32.totalorder %v1443_v7, %v1444_v56  ;;  %vm1484_vm14 = vcmp.lt.s32.totalorder %v1483_v21, %v1398_v27  ;;  %vm1351_vm8 = vcmp.le.f32.partialorder %v4385_v24, %v1303_v36  ;;  %vm1355_vm12 = vcmp.le.f32.partialorder %v4391_v37, %v1303_v36 }
 0x158   : > { %6175 = vst [vmem:[#allocation39_spill] sm:$0xff] %v4711_v57  ;;  %v1446_v47 = vsel %vm1445_vm5, %v1443_v7, %v1444_v56  ;;  %v1485_v10 = vsel %vm1484_vm14, %v1483_v21, %v1398_v27  ;;  %vm1359_vm11 = vcmp.le.f32.partialorder %v4397_v38, %v1303_v36  ;;  %vm1363_vm15 = vcmp.le.f32.partialorder %v4427_v48, %v1303_v36 }
 0x159   : > { %v1447_v43 = vrot.slane %v1446_v47, 2  ;;  %vm1486_vm2 = vcmp.lt.s32.totalorder %v1485_v10, %v1402_v50  ;;  %vm1367_vm1 = vcmp.le.f32.partialorder %v4526_v5, %v1303_v36  ;;  %vm1371_vm3 = vcmp.le.f32.partialorder %v4506_v23, %v1303_v36 }
 0x15a   : > { %v4725_v46 = vsel %vm1207_vm13, %v4331_v1, 0.0  ;;  %v1487_v6 = vsel %vm1486_vm2, %v1485_v10, %v1402_v50  ;;  %v1375_v7 = vsel %vm1343_vm7, %v3647_v12, 64  ;;  %v1379_v11 = vsel %vm1347_vm9, %v3953_v30, 64 }
 0x15b   : > { %vm1448_vm4 = vcmp.lt.s32.totalorder %v1446_v47, %v1447_v43  ;;  %v4733_v62 = vpop.eup %3412  ;;  %vm1488_vm10 = vcmp.lt.s32.totalorder %v1487_v6, %v1406_v41  ;;  %v1326_v18 = vrot.slane %v1325_v58, 2  ;;  %v4739_v28 = vsel %vm1205_vm6, %v4373_v20, 0.0 }
 0x15c   : > { %v1449_v54 = vsel %vm1448_vm4, %v1446_v47, %v1447_v43  ;;  %6176 = vst [vmem:[#allocation40_spill] sm:$0xff] %v4739_v28  ;;  %v1489_v9 = vsel %vm1488_vm10, %v1487_v6, %v1406_v41  ;;  %v1383_v27 = vsel %vm1351_vm8, %v3956_v4, 64  ;;  %v1387_v56 = vsel %vm1355_vm12, %v3959_v16, 64 }
 0x15d   : > { %v1450_v53 = vrot.slane %v1449_v54, 1  ;;  %v1490_v50 = vrot.slane %v1489_v9, 4  ;;  %v1391_v2 = vsel %vm1359_vm11, %v3970_v26, 64  ;;  %v1395_v21 = vsel %vm1363_vm15, %v3973_v25, 64 }
 0x15e   : > { %vm1407_vm6 = vcmp.lt.s32.totalorder %v1375_v7, %v1379_v11  ;;  %v4756_v41 = vsel %vm1367_vm1, %v3976_v34, 64  ;;  %v4760_v43 = vadd.f32 %v4733_v62, %v4323_v17  ;;  %v4767_v6 = vsel %vm1371_vm3, %v3979_v39, 64 }
 0x15f   : > { %vm1451_vm13 = vcmp.lt.s32.totalorder %v1449_v54, %v1450_v53  ;;  %v1408_v47 = vsel %vm1407_vm6, %v1375_v7, %v1379_v11  ;;  %v1531_v57 = vadd.f32 1e-08, %v1303_v36  ;;  %vm1491_vm11 = vcmp.lt.s32.totalorder %v1489_v9, %v1490_v50 }
 0x160   : > { %6177 = vst [vmem:[#allocation41_spill] sm:$0xff] %v4760_v43  ;;  %v4762_v10 = vsel %vm1451_vm13, %v1449_v54, %v1450_v53  ;;  %vm1409_vm0 = vcmp.lt.s32.totalorder %v1408_v47, %v1383_v27  ;;  %v1327_v17 = vmin.f32 %v1325_v58, %v1326_v18 }
 0x161   : > { %vm1500_vm5 = vcmp.eq.s32.totalorder %v3647_v12, %v4762_v10  ;;  %vm1504_vm7 = vcmp.eq.s32.totalorder %v3953_v30, %v4762_v10  ;;  %vm1508_vm9 = vcmp.eq.s32.totalorder %v3956_v4, %v4762_v10  ;;  %vm1512_vm14 = vcmp.eq.s32.totalorder %v3959_v16, %v4762_v10 }
 0x162   : > { %vm1516_vm8 = vcmp.eq.s32.totalorder %v3970_v26, %v4762_v10  ;;  %vm1520_vm12 = vcmp.eq.s32.totalorder %v3973_v25, %v4762_v10  ;;  %v4783_v36 = vsel %vm1500_vm5, %v4692_v35, %v4273_v61  ;;  %v4787_v7 = vsel %vm1504_vm7, %v4692_v35, %v4279_v59 }
 0x163   : > { %v4790_v11 = vsel %vm1500_vm5, inf, %v4213_v15  ;;  %v4793_v54 = vsel %vm1504_vm7, inf, %v4219_v29  ;;  %vm1524_vm15 = vcmp.eq.s32.totalorder %v3976_v34, %v4762_v10  ;;  %v4801_v58 = vsel %vm1508_vm9, inf, %v4239_v3 }
 0x164   : > { %v4807_v61 = vsel %vm1512_vm14, inf, %v4253_v31  ;;  %3414 = vrcp.f32 %v1531_v57  ;;  %vm6041_vm2 = vcmp.eq.s32.totalorder %v3979_v39, %v4762_v10  ;;  %v4815_v15 = vsel %vm1516_vm8, inf, %v4259_v44 }
 0x165   : > { %v4821_v29 = vsel %vm1520_vm12, inf, %v4265_v8  ;;  %v1624_v3 = vmin.f32 %v4790_v11, %v4793_v54  ;;  %v1492_v31 = vsel %vm1491_vm11, %v1489_v9, %v1490_v50  ;;  %v1410_v57 = vsel %vm1409_vm0, %v1408_v47, %v1383_v27 }
 0x166   : > { %v1493_v59 = vrot.slane %v1492_v31, 2  ;;  %v1328_v18 = vrot.slane %v1327_v17, 1  ;;  %v4831_v44 = vsel %vm1508_vm9, %v4692_v35, %v4488_v19  ;;  %vm1411_vm1 = vcmp.lt.s32.totalorder %v1410_v57, %v1387_v56 }
 0x167   : > { %6178 = vst [vmem:[#allocation42_spill] sm:$0xff] %v4831_v44  ;;  %v1625_v53 = vmin.f32 %v1624_v3, %v4801_v58  ;;  %v4839_v8 = vsel %vm1512_vm14, %v4692_v35, %v4494_v49  ;;  %v4846_v9 = vsel %vm1516_vm8, %v4692_v35, %v4540_v63  ;;  %v1412_v19 = vsel %vm1411_vm1, %v1410_v57, %v1387_v56  ;;  %v6182_v3 = vld [vmem:[#allocation27_spill] sm:$0xff]  ;;  %v6184_v57 = vld [vmem:[#allocation14_spill] sm:$0xff] }
 0x168   : > { %6179 = vst [vmem:[#allocation43_spill] sm:$0xff] %v4839_v8  ;;  %6180 = vst [vmem:[#allocation44_spill] sm:$0xff] %v4846_v9  ;;  %vm1494_vm3 = vcmp.lt.s32.totalorder %v1492_v31, %v1493_v59  ;;  %v4848_v27 = vmin.f32 %v1327_v17, %v1328_v18  ;;  %v4855_v50 = vsel %vm1520_vm12, %v4692_v35, %v4546_v0  ;;  %v6185_v18 = vld [vmem:[#allocation18_spill] sm:$0xff] }
 0x169   : > { %6181 = vst [vmem:[#allocation45_spill] sm:$0xff] %v4855_v50  ;;  %v1626_v49 = vmin.f32 %v1625_v53, %v4807_v61  ;;  %v1495_v47 = vsel %vm1494_vm3, %v1492_v31, %v1493_v59  ;;  %vm1413_vm4 = vcmp.lt.s32.totalorder %v1412_v19, %v1391_v2  ;;  %v4863_v63 = vsel %vm1524_vm15, %v4692_v35, %v6182_v3  ;;  %v6186_v31 = vld [vmem:[#allocation22_spill] sm:$0xff]  ;;  %v6187_v59 = vld [vmem:[#allocation25_spill] sm:$0xff] }
 0x16a   : > { %6183 = vst [vmem:[#allocation27_spill] sm:$0xff] %v4863_v63  ;;  %v1496_v56 = vrot.slane %v1495_v47, 1  ;;  %v1414_v17 = vsel %vm1413_vm4, %v1412_v19, %v1391_v2  ;;  %vm1345_vm10 = vcmp.le.f32.partialorder %v6184_v57, %v4848_v27  ;;  %vm1349_vm6 = vcmp.le.f32.partialorder %v6185_v18, %v4848_v27  ;;  %v6188_v3 = vld [vmem:[#allocation5_spill] sm:$0xff]  ;;  %v6189_v2 = vld [vmem:[#allocation8_spill] sm:$0xff] }
 0x16b   : > { %v1627_v0 = vmin.f32 %v1626_v49, %v4815_v15  ;;  %vm1415_vm13 = vcmp.lt.s32.totalorder %v1414_v17, %v1395_v21  ;;  %vm1353_vm0 = vcmp.le.f32.partialorder %v6186_v31, %v4848_v27  ;;  %vm1357_vm5 = vcmp.le.f32.partialorder %v6187_v59, %v4848_v27 }
 0x16c   : > { %vm1497_vm7 = vcmp.lt.s32.totalorder %v1495_v47, %v1496_v56  ;;  %v1416_v53 = vsel %vm1415_vm13, %v1414_v17, %v1395_v21  ;;  %vm1361_vm9 = vcmp.le.f32.partialorder %v6188_v3, %v4848_v27  ;;  %vm1365_vm14 = vcmp.le.f32.partialorder %v6189_v2, %v4848_v27  ;;  %v6197_v3 = vld [vmem:[#allocation15_spill] sm:$0xff] }
 0x16d   : > { %v1628_v19 = vmin.f32 %v1627_v0, %v4821_v29  ;;  %v4879_v43 = vsel %vm1497_vm7, %v1495_v47, %v1496_v56  ;;  %vm1417_vm8 = vcmp.lt.s32.totalorder %v1416_v53, %v4756_v41  ;;  %vm1369_vm12 = vcmp.le.f32.partialorder %v4480_v51, %v4848_v27  ;;  %v6190_v56 = vld [vmem:[#allocation28_spill] sm:$0xff]  ;;  %v6192_v0 = vld [vmem:[#allocation10_spill] sm:$0xff] }
 0x16e   : > { %v4884_v49 = vpop.eup %3414  ;;  %v4890_v21 = vsel %vm1524_vm15, inf, %v4292_v60  ;;  %vm1502_vm11 = vcmp.eq.s32.totalorder %v3647_v12, %v4879_v43  ;;  %vm1506_vm1 = vcmp.eq.s32.totalorder %v3953_v30, %v4879_v43  ;;  %vm1510_vm3 = vcmp.eq.s32.totalorder %v3956_v4, %v4879_v43 }
 0x16f   : > { %v1629_v47 = vmin.f32 %v1628_v19, %v4890_v21  ;;  %vm1514_vm4 = vcmp.eq.s32.totalorder %v3959_v16, %v4879_v43  ;;  %vm1518_vm13 = vcmp.eq.s32.totalorder %v3970_v26, %v4879_v43  ;;  %vm1522_vm15 = vcmp.eq.s32.totalorder %v3973_v25, %v4879_v43 }
 0x170   : > { %v4909_v60 = vsel %vm6041_vm2, inf, %v4225_v42  ;;  %v4913_v17 = vsel %vm1502_vm11, %v4733_v62, %v6190_v56  ;;  %v4917_v19 = vsel %vm1506_vm1, %v4733_v62, %v6192_v0  ;;  %v4920_v28 = vsel %vm1502_vm11, inf, %v4286_v40  ;;  %v6194_v42 = vld [vmem:[#allocation16_spill] sm:$0xff] }
 0x171   : > { %6191 = vst [vmem:[#allocation28_spill] sm:$0xff] %v4913_v17  ;;  %6193 = vst [vmem:[#allocation10_spill] sm:$0xff] %v4917_v19  ;;  %v1630_v63 = vmin.f32 %v1629_v47, %v4909_v60  ;;  %vm1526_vm7 = vcmp.eq.s32.totalorder %v3976_v34, %v4879_v43  ;;  %vm1530_vm2 = vcmp.eq.s32.totalorder %v3979_v39, %v4879_v43  ;;  %v4928_v50 = vsel %vm1506_vm1, inf, %v6194_v42  ;;  %v6195_v56 = vld [vmem:[#allocation24_spill] sm:$0xff] }
 0x172   : > { %v4934_v0 = vsel %vm1510_vm3, inf, %v6195_v56  ;;  %v4940_v40 = vsel %vm1514_vm4, inf, %v4349_v32  ;;  %v4946_v47 = vsel %vm1518_vm13, inf, %v4355_v22  ;;  %v4952_v42 = vsel %vm1522_vm15, inf, %v4364_v52  ;;  %v6196_v17 = vld [vmem:[#allocation12_spill] sm:$0xff] }
 0x173   : > { %v1631_v56 = vrot.slane %v1630_v63, 4  ;;  %v1650_v19 = vmin.f32 %v4920_v28, %v4928_v50  ;;  %v1418_v32 = vsel %vm1417_vm8, %v1416_v53, %v4756_v41  ;;  %vm1373_vm11 = vcmp.le.f32.partialorder %v6196_v17, %v4848_v27 }
 0x174   : > { %v4965_v22 = vsel %vm1526_vm7, inf, %v4404_v14  ;;  %vm1419_vm1 = vcmp.lt.s32.totalorder %v1418_v32, %v4767_v6  ;;  %v1377_v52 = vsel %vm1345_vm10, %v3647_v12, 64  ;;  %v1381_v41 = vsel %vm1349_vm6, %v3953_v30, 64 }
 0x175   : > { %v1632_v53 = vmin.f32 %v1630_v63, %v1631_v56  ;;  %v4980_v1 = vsel %vm1530_vm2, inf, %v4231_v33  ;;  %v1651_v14 = vmin.f32 %v1650_v19, %v4934_v0  ;;  %v1420_v9 = vsel %vm1419_vm1, %v1418_v32, %v4767_v6 }
 0x176   : > { %v1421_v8 = vrot.slane %v1420_v9, 4  ;;  %v1385_v57 = vsel %vm1353_vm0, %v3956_v4, 64  ;;  %v1389_v63 = vsel %vm1357_vm5, %v3959_v16, 64  ;;  %v1393_v33 = vsel %vm1361_vm9, %v3970_v26, 64 }
 0x177   : > { %v1633_v56 = vrot.slane %v1632_v53, 2  ;;  %v1652_v19 = vmin.f32 %v1651_v14, %v4940_v40  ;;  %v5001_v6 = vsel %vm1365_vm14, %v3973_v25, 64  ;;  %vm1453_vm10 = vcmp.lt.s32.totalorder %v1377_v52, %v1381_v41 }
 0x178   : > { %vm1422_vm6 = vcmp.lt.s32.totalorder %v1420_v9, %v1421_v8  ;;  %v5007_v32 = vsel %vm1369_vm12, %v3976_v34, 64  ;;  %v1454_v59 = vsel %vm1453_vm10, %v1377_v52, %v1381_v41  ;;  %v5014_v14 = vsel %vm1510_vm3, %v4733_v62, %v6197_v3  ;;  %v6199_v41 = vld [vmem:[#allocation20_spill] sm:$0xff] }
 0x179   : > { %6198 = vst [vmem:[#allocation16_spill] sm:$0xff] %v5014_v14  ;;  %v1634_v31 = vmin.f32 %v1632_v53, %v1633_v56  ;;  %v1653_v2 = vmin.f32 %v1652_v19, %v4946_v47  ;;  %v1423_v18 = vsel %vm1422_vm6, %v1420_v9, %v1421_v8  ;;  %vm1455_vm0 = vcmp.lt.s32.totalorder %v1454_v59, %v1385_v57  ;;  %v6201_v8 = vld [vmem:[#allocation6_spill] sm:$0xff]  ;;  %v6207_v14 = vld [vmem:[#allocation36_spill] sm:$0xff] }
 0x17a   : > { %v1424_v44 = vrot.slane %v1423_v18, 2  ;;  %v5021_v51 = vsel %vm1373_vm11, %v3979_v39, 64  ;;  %v1456_v52 = vsel %vm1455_vm0, %v1454_v59, %v1385_v57  ;;  %v5028_v3 = vsel %vm1514_vm4, %v4733_v62, %v6199_v41  ;;  %v6203_v59 = vld [vmem:[#allocation13_spill] sm:$0xff]  ;;  %v6205_v41 = vld [vmem:[#allocation35_spill] sm:$0xff] }
 0x17b   : > { %6200 = vst [vmem:[#allocation24_spill] sm:$0xff] %v5028_v3  ;;  %v1635_v53 = vrot.slane %v1634_v31, 1  ;;  %v1654_v56 = vmin.f32 %v1653_v2, %v4952_v42  ;;  %vm1457_vm5 = vcmp.lt.s32.totalorder %v1456_v52, %v1389_v63  ;;  %v5036_v9 = vsel %vm1518_vm13, %v4733_v62, %v6201_v8 }
 0x17c   : > { %6202 = vst [vmem:[#allocation12_spill] sm:$0xff] %v5036_v9  ;;  %vm1425_vm9 = vcmp.lt.s32.totalorder %v1423_v18, %v1424_v44  ;;  %v1458_v57 = vsel %vm1457_vm5, %v1456_v52, %v1389_v63  ;;  %v5043_v19 = vsel %vm1522_vm15, %v4733_v62, %v6203_v59  ;;  %vm6206_vm14 = vcmp.eq.s32.totalorder %v3979_v39, %v4762_v10 }
 0x17d   : > { %6204 = vst [vmem:[#allocation15_spill] sm:$0xff] %v5043_v19  ;;  %v5050_v2 = vsel %vm6206_vm14, %v4692_v35, %v6205_v41  ;;  %v1636_v3 = vmin.f32 %v1634_v31, %v1635_v53  ;;  %v1655_v8 = vmin.f32 %v1654_v56, %v4965_v22  ;;  %v1426_v9 = vsel %vm1425_vm9, %v1423_v18, %v1424_v44  ;;  %v6208_v19 = vld [vmem:[#allocation37_spill] sm:$0xff] }
 0x17e   : > { %vm1459_vm8 = vcmp.lt.s32.totalorder %v1458_v57, %v1393_v33  ;;  %v1427_v63 = vrot.slane %v1426_v9, 1  ;;  %v5060_v59 = vsel %vm1526_vm7, %v4733_v62, %v6207_v14  ;;  %v5067_v35 = vsel %vm1530_vm2, %v4733_v62, %v6208_v19  ;;  %v6209_v53 = vld [vmem:[#allocation29_spill] sm:$0xff] }
 0x17f   : > { %v5053_v52 = vsel %vm1459_vm8, %v1458_v57, %v1393_v33  ;;  %vm1664_vm12 = vcmp.le.f32.partialorder %v4790_v11, %v1636_v3  ;;  %vm1668_vm3 = vcmp.le.f32.partialorder %v4793_v54, %v1636_v3  ;;  %vm1672_vm4 = vcmp.le.f32.partialorder %v4801_v58, %v1636_v3  ;;  %v6210_v57 = vld [vmem:[#allocation23_spill] sm:$0xff] }
 0x180   : > { %vm1676_vm13 = vcmp.le.f32.partialorder %v4807_v61, %v1636_v3  ;;  %vm1680_vm15 = vcmp.le.f32.partialorder %v4815_v15, %v1636_v3  ;;  %vm1684_vm7 = vcmp.le.f32.partialorder %v4821_v29, %v1636_v3  ;;  %vm1688_vm11 = vcmp.le.f32.partialorder %v4890_v21, %v1636_v3 }
 0x181   : > { %vm1692_vm1 = vcmp.le.f32.partialorder %v4909_v60, %v1636_v3  ;;  %v1696_v43 = vsel %vm1664_vm12, %v3647_v12, 64  ;;  %v1700_v62 = vsel %vm1668_vm3, %v3953_v30, 64  ;;  %v1704_v10 = vsel %vm1672_vm4, %v3956_v4, 64 }
 0x182   : > { %v5081_v11 = vadd.f32 1e-08, %v4848_v27  ;;  %v1708_v54 = vsel %vm1676_vm13, %v3959_v16, 64  ;;  %v1712_v58 = vsel %vm1680_vm15, %v3970_v26, 64  ;;  %v1716_v61 = vsel %vm1684_vm7, %v3973_v25, 64 }
 0x183   : > { %v1720_v15 = vsel %vm1688_vm11, %v3976_v34, 64  ;;  %v1724_v29 = vsel %vm1692_vm1, %v3979_v39, 64  ;;  %vm1750_vm2 = vcmp.lt.s32.totalorder %v1696_v43, %v1700_v62  ;;  %v1656_v44 = vmin.f32 %v1655_v8, %v4980_v1 }
 0x184   : > { %vm1428_vm10 = vcmp.lt.s32.totalorder %v1426_v9, %v1427_v63  ;;  %v1751_v18 = vsel %vm1750_vm2, %v1696_v43, %v1700_v62  ;;  %vm1461_vm6 = vcmp.lt.s32.totalorder %v5053_v52, %v5001_v6  ;;  %v1852_v27 = vadd.f32 1e-08, %v1636_v3 }
 0x185   : > { %v5089_v31 = vsel %vm1428_vm10, %v1426_v9, %v1427_v63  ;;  %vm1752_vm0 = vcmp.lt.s32.totalorder %v1751_v18, %v1704_v10  ;;  %v1657_v21 = vrot.slane %v1656_v44, 4  ;;  %v6051_v60 = vmov 0.0  }
 0x186   : > { %vm1499_vm5 = vcmp.eq.s32.totalorder %v3647_v12, %v5089_v31  ;;  %1976 = vmatprep.mubr.f32.mxu0 %v6051_v60  ;;  %2065 = vmatprep.mubr.f32.mxu1 %v6051_v60  ;;  %v1753_v33 = vsel %vm1752_vm0, %v1751_v18, %v1704_v10  ;;  %vm1503_vm9 = vcmp.eq.s32.totalorder %v3953_v30, %v5089_v31  ;;  %v6212_v18 = vld [vmem:[#allocation19_spill] sm:$0xff]  ;;  %3416 = vrcp.f32 %v1852_v27 }
 0x187   : > { %vm1507_vm14 = vcmp.eq.s32.totalorder %v3956_v4, %v5089_v31  ;;  %vm1511_vm8 = vcmp.eq.s32.totalorder %v3959_v16, %v5089_v31  ;;  %vm1754_vm12 = vcmp.lt.s32.totalorder %v1753_v33, %v1708_v54  ;;  %v1658_v14 = vmin.f32 %v1656_v44, %v1657_v21 }
 0x188   : > { %vm1515_vm3 = vcmp.eq.s32.totalorder %v3970_v26, %v5089_v31  ;;  %vm1519_vm4 = vcmp.eq.s32.totalorder %v3973_v25, %v5089_v31  ;;  %v1755_v3 = vsel %vm1754_vm12, %v1753_v33, %v1708_v54  ;;  %vm1523_vm13 = vcmp.eq.s32.totalorder %v3976_v34, %v5089_v31  ;;  %v6213_v33 = vld [vmem:[#allocation31_spill] sm:$0xff] }
 0x189   : > { %vm1527_vm15 = vcmp.eq.s32.totalorder %v3979_v39, %v5089_v31  ;;  %v5116_v56 = vsel %vm1499_vm5, %v4884_v49, %v6209_v53  ;;  %vm1756_vm7 = vcmp.lt.s32.totalorder %v1755_v3, %v1712_v58  ;;  %v1659_v9 = vrot.slane %v1658_v14, 2  ;;  %v6214_v53 = vld [vmem:[#allocation32_spill] sm:$0xff] }
 0x18a   : > { %v5123_v19 = vsel %vm1503_vm9, %v4884_v49, %v6210_v57  ;;  %v5129_v41 = vsel %vm1499_vm5, inf, %v4371_v45  ;;  %v1757_v8 = vsel %vm1756_vm7, %v1755_v3, %v1712_v58  ;;  %v5135_v63 = vsel %vm1503_vm9, inf, %v4379_v13 }
 0x18b   : > { %v5141_v43 = vsel %vm1507_vm14, inf, %v4385_v24  ;;  %v5147_v62 = vsel %vm1511_vm8, inf, %v4391_v37  ;;  %vm1758_vm11 = vcmp.lt.s32.totalorder %v1757_v8, %v1716_v61  ;;  %v1660_v45 = vmin.f32 %v1658_v14, %v1659_v9 }
 0x18c   : > { %v5153_v13 = vsel %vm1515_vm3, inf, %v4397_v38  ;;  %v5159_v24 = vsel %vm1519_vm4, inf, %v4427_v48  ;;  %v1759_v10 = vsel %vm1758_vm11, %v1757_v8, %v1716_v61  ;;  %v5165_v37 = vsel %vm1523_vm13, inf, %v4526_v5  ;;  %v6211_v61 = vld [vmem:[#allocation21_spill] sm:$0xff] }
 0x18d   : > { %v5171_v54 = vsel %vm1527_vm15, inf, %v4506_v23  ;;  %v1611_v38 = vmin.f32 %v5129_v41, %v5135_v63  ;;  %vm1760_vm1 = vcmp.lt.s32.totalorder %v1759_v10, %v1720_v15  ;;  %v1661_v58 = vrot.slane %v1660_v45, 1 }
 0x18e   : > { %v1462_v48 = vsel %vm1461_vm6, %v5053_v52, %v5001_v6  ;;  %v5185_v5 = vsel %vm1507_vm14, %v4884_v49, %v6211_v61  ;;  %v1761_v23 = vsel %vm1760_vm1, %v1759_v10, %v1720_v15  ;;  %v5194_v21 = vsel %vm1511_vm8, %v4884_v49, %v6212_v18 }
 0x18f   : > { %v1612_v44 = vmin.f32 %v1611_v38, %v5141_v43  ;;  %vm1463_vm2 = vcmp.lt.s32.totalorder %v1462_v48, %v5007_v32  ;;  %vm1762_vm10 = vcmp.lt.s32.totalorder %v1761_v23, %v1724_v29  ;;  %v1662_v6 = vmin.f32 %v1660_v45, %v1661_v58 }
 0x190   : > { %v1464_v52 = vsel %vm1463_vm2, %v1462_v48, %v5007_v32  ;;  %v5202_v15 = vsel %vm1515_vm3, %v4884_v49, %v6213_v33  ;;  %v1763_v14 = vsel %vm1762_vm10, %v1761_v23, %v1724_v29  ;;  %v5211_v9 = vsel %vm1519_vm4, %v4884_v49, %v6214_v53 }
 0x191   : > { %v1613_v3 = vmin.f32 %v1612_v44, %v5147_v62  ;;  %vm1465_vm6 = vcmp.lt.s32.totalorder %v1464_v52, %v5021_v51  ;;  %v1764_v32 = vrot.slane %v1763_v14, 4  ;;  %vm1666_vm0 = vcmp.le.f32.partialorder %v4920_v28, %v1662_v6 }
 0x192   : > { %vm1670_vm5 = vcmp.le.f32.partialorder %v4928_v50, %v1662_v6  ;;  %vm6215_vm9 = vcmp.eq.s32.totalorder %v3979_v39, %v4177_v55  ;;  %vm1674_vm14 = vcmp.le.f32.partialorder %v4934_v0, %v1662_v6  ;;  %vm1678_vm8 = vcmp.le.f32.partialorder %v4940_v40, %v1662_v6 }
 0x193   : > { %v5219_v29 = vsel %vm6215_vm9, %v4373_v20, 0.0  ;;  %vm1682_vm12 = vcmp.le.f32.partialorder %v4946_v47, %v1662_v6  ;;  %vm1765_vm3 = vcmp.lt.s32.totalorder %v1763_v14, %v1764_v32  ;;  %vm1686_vm4 = vcmp.le.f32.partialorder %v4952_v42, %v1662_v6 }
 0x194   : > { %v1698_v28 = vsel %vm1666_vm0, %v3647_v12, 64  ;;  %v1702_v50 = vsel %vm1670_vm5, %v3953_v30, 64  ;;  %v1766_v57 = vsel %vm1765_vm3, %v1763_v14, %v1764_v32  ;;  %vm1690_vm7 = vcmp.le.f32.partialorder %v4965_v22, %v1662_v6  ;;  %v5260_v32 = vpop.eup %3416 }
 0x195   : > { %vm1694_vm11 = vcmp.le.f32.partialorder %v4980_v1, %v1662_v6  ;;  %3418 = vrcp.f32 %v5081_v11  ;;  %v1767_v55 = vrot.slane %v1766_v57, 2  ;;  %v1706_v0 = vsel %vm1674_vm14, %v3956_v4, 64  ;;  %v6216_v11 = vld [vmem:[#allocation38_spill] sm:$0xff] }
 0x196   : > { %v1710_v40 = vsel %vm1678_vm8, %v3959_v16, 64  ;;  %v1714_v47 = vsel %vm1682_vm12, %v3970_v26, 64  ;;  %v1718_v42 = vsel %vm1686_vm4, %v3973_v25, 64  ;;  %vm1796_vm1 = vcmp.lt.s32.totalorder %v1698_v28, %v1702_v50 }
 0x197   : > { %v1614_v27 = vmin.f32 %v1613_v3, %v5153_v13  ;;  %v1466_v8 = vsel %vm1465_vm6, %v1464_v52, %v5021_v51  ;;  %vm1768_vm2 = vcmp.lt.s32.totalorder %v1766_v57, %v1767_v55  ;;  %v1797_v45 = vsel %vm1796_vm1, %v1698_v28, %v1702_v50 }
 0x198   : > { %v1467_v10 = vrot.slane %v1466_v8, 4  ;;  %v5243_v38 = vsel %vm1523_vm13, %v4884_v49, %v6216_v11  ;;  %v1769_v58 = vsel %vm1768_vm2, %v1766_v57, %v1767_v55  ;;  %vm1798_vm10 = vcmp.lt.s32.totalorder %v1797_v45, %v1706_v0 }
 0x199   : > { %v1854_v48 = vadd.f32 1e-08, %v1662_v6  ;;  %v1615_v61 = vmin.f32 %v1614_v27, %v5159_v24  ;;  %v1770_v23 = vrot.slane %v1769_v58, 1  ;;  %v1799_v44 = vsel %vm1798_vm10, %v1797_v45, %v1706_v0 }
 0x19a   : > { %vm1468_vm0 = vcmp.lt.s32.totalorder %v1466_v8, %v1467_v10  ;;  %v5251_v51 = vsel %vm1527_vm15, %v4884_v49, %v4725_v46  ;;  %v1722_v18 = vsel %vm1690_vm7, %v3976_v34, 64  ;;  %vm1800_vm13 = vcmp.lt.s32.totalorder %v1799_v44, %v1710_v40 }
 0x19b   : > { %v1616_v52 = vmin.f32 %v1615_v61, %v5165_v37  ;;  %v1469_v33 = vsel %vm1468_vm0, %v1466_v8, %v1467_v10  ;;  %vm1771_vm6 = vcmp.lt.s32.totalorder %v1769_v58, %v1770_v23  ;;  %v1726_v14 = vsel %vm1694_vm11, %v3979_v39, 64 }
 0x19c   : > { %v1801_v3 = vsel %vm1800_vm13, %v1799_v44, %v1710_v40  ;;  %v1470_v53 = vrot.slane %v1469_v33, 2  ;;  %v5262_v31 = vsel %vm1771_vm6, %v1769_v58, %v1770_v23  ;;  %3420 = vrcp.f32 %v1854_v48  ;;  %v6219_v48 = vld [vmem:[#allocation44_spill] sm:$0xff]  ;;  %v6220_v23 = vld [vmem:[#allocation7_spill] sm:$0xff] }
 0x19d   : > { %vm1802_vm15 = vcmp.lt.s32.totalorder %v1801_v3, %v1714_v47  ;;  %v1617_v46 = vmin.f32 %v1616_v52, %v5171_v54  ;;  %vm1820_vm5 = vcmp.eq.s32.totalorder %v3647_v12, %v5262_v31  ;;  %vm1824_vm9 = vcmp.eq.s32.totalorder %v3953_v30, %v5262_v31 }
 0x19e   : > { %v1803_v22 = vsel %vm1802_vm15, %v1801_v3, %v1714_v47  ;;  %vm1471_vm14 = vcmp.lt.s32.totalorder %v1469_v33, %v1470_v53  ;;  %v1864_v6 = vsel %vm1820_vm5, %v5260_v32, %v4783_v36  ;;  %v1868_v28 = vsel %vm1824_vm9, %v5260_v32, %v4787_v7  ;;  %v6217_v36 = vld [vmem:[#allocation42_spill] sm:$0xff]  ;;  %v6218_v7 = vld [vmem:[#allocation43_spill] sm:$0xff]  ;;  %v6221_v3 = vld [vmem:[#allocation9_spill] sm:$0xff] }
 0x19f   : > { %v5269_v1 = vpop.eup %3418  ;;  %vm1804_vm8 = vcmp.lt.s32.totalorder %v1803_v22, %v1718_v42  ;;  %v1618_v50 = vrot.slane %v1617_v46, 4  ;;  %v3203_v57 = vpack.c.bf16 %v1868_v28, %v1864_v6  ;;  %v1472_v0 = vsel %vm1471_vm14, %v1469_v33, %v1470_v53  ;;  %v6223_v6 = vld [vmem:[#allocation14_spill] sm:$0xff] }
 0x1a0   : > { %v1805_v55 = vsel %vm1804_vm8, %v1803_v22, %v1718_v42  ;;  %vm1828_vm12 = vcmp.eq.s32.totalorder %v3956_v4, %v5262_v31  ;;  %v1473_v47 = vrot.slane %v1472_v0, 1  ;;  %vm1832_vm4 = vcmp.eq.s32.totalorder %v3959_v16, %v5262_v31 }
 0x1a1   : > { %vm1806_vm3 = vcmp.lt.s32.totalorder %v1805_v55, %v1722_v18  ;;  %v1619_v40 = vmin.f32 %v1617_v46, %v1618_v50  ;;  %3204 = vmatprep.subr.bf16.mxu0 %v3203_v57  ;;  %v5281_v8 = vsel %vm1828_vm12, %v5260_v32, %v6217_v36  ;;  %v5285_v45 = vsel %vm1832_vm4, %v5260_v32, %v6218_v7  ;;  %v6222_v46 = vld [vmem:[#allocation17_spill] sm:$0xff] }
 0x1a2   : > { %v1807_v27 = vsel %vm1806_vm3, %v1805_v55, %v1722_v18  ;;  %vm1836_vm7 = vcmp.eq.s32.totalorder %v3970_v26, %v5262_v31  ;;  %vm1474_vm1 = vcmp.lt.s32.totalorder %v1472_v0, %v1473_v47  ;;  %v5299_v44 = vadd.f32 %v4884_v49, %v6220_v23  ;;  %v6224_v55 = vld [vmem:[#allocation18_spill] sm:$0xff]  ;;  %v6227_v7 = vld [vmem:[#allocation5_spill] sm:$0xff]  ;;  %v6229_v23 = vld [vmem:[#allocation11_spill] sm:$0xff] }
 0x1a3   : > { %vm1808_vm11 = vcmp.lt.s32.totalorder %v1807_v27, %v1726_v14  ;;  %v1620_v42 = vrot.slane %v1619_v40, 2  ;;  %v5291_v58 = vsel %vm1474_vm1, %v1472_v0, %v1473_v47  ;;  %v5295_v61 = vsel %vm1836_vm7, %v5260_v32, %v6219_v48 }
 0x1a4   : > { %v1809_v11 = vsel %vm1808_vm11, %v1807_v27, %v1726_v14  ;;  %vm1501_vm2 = vcmp.eq.s32.totalorder %v3647_v12, %v5291_v58  ;;  %vm1505_vm10 = vcmp.eq.s32.totalorder %v3953_v30, %v5291_v58  ;;  %vm1509_vm0 = vcmp.eq.s32.totalorder %v3956_v4, %v5291_v58  ;;  %v6226_v27 = vld [vmem:[#allocation25_spill] sm:$0xff] }
 0x1a5   : > { %v1810_v18 = vrot.slane %v1809_v11, 4  ;;  %v1621_v52 = vmin.f32 %v1619_v40, %v1620_v42  ;;  %vm1513_vm13 = vcmp.eq.s32.totalorder %v3959_v16, %v5291_v58  ;;  %vm1517_vm6 = vcmp.eq.s32.totalorder %v3970_v26, %v5291_v58  ;;  %v6225_v40 = vld [vmem:[#allocation22_spill] sm:$0xff] }
 0x1a6   : > { %vm1521_vm15 = vcmp.eq.s32.totalorder %v3973_v25, %v5291_v58  ;;  %v5313_v49 = vpop.eup %3420  ;;  %vm6050_vm9 = vcmp.eq.s32.totalorder %v3976_v34, %v5291_v58  ;;  %vm1529_vm14 = vcmp.eq.s32.totalorder %v3979_v39, %v5291_v58  ;;  %v5321_v53 = vsel %vm1501_vm2, %v5269_v1, %v6221_v3 }
 0x1a7   : > { %vm1811_vm5 = vcmp.lt.s32.totalorder %v1809_v11, %v1810_v18  ;;  %v1622_v33 = vrot.slane %v1621_v52, 1  ;;  %v5328_v22 = vsel %vm1505_vm10, %v5269_v1, %v6222_v46  ;;  %v5331_v28 = vsel %vm1501_vm2, inf, %v6223_v6 }
 0x1a8   : > { %v1812_v14 = vsel %vm1811_vm5, %v1809_v11, %v1810_v18  ;;  %v5337_v0 = vsel %vm1505_vm10, inf, %v6224_v55  ;;  %v5343_v47 = vsel %vm1509_vm0, inf, %v6225_v40  ;;  %v5349_v36 = vsel %vm1513_vm13, inf, %v6226_v27  ;;  %v6228_v11 = vld [vmem:[#allocation8_spill] sm:$0xff]  ;;  %v6231_v27 = vld [vmem:[#allocation10_spill] sm:$0xff] }
 0x1a9   : > { %v1813_v50 = vrot.slane %v1812_v14, 2  ;;  %v1623_v57 = vmin.f32 %v1621_v52, %v1622_v33  ;;  %v5355_v42 = vsel %vm1517_vm6, inf, %v6227_v7  ;;  %v5361_v48 = vsel %vm1521_vm15, inf, %v6228_v11  ;;  %v6230_v55 = vld [vmem:[#allocation28_spill] sm:$0xff] }
 0x1aa   : > { %v5367_v18 = vsel %vm6050_vm9, inf, %v6229_v23  ;;  %vm1840_vm7 = vcmp.eq.s32.totalorder %v3973_v25, %v5262_v31  ;;  %v5391_v46 = vsel %vm1529_vm14, inf, %v6196_v17  ;;  %v6232_v23 = vld [vmem:[#allocation16_spill] sm:$0xff] }
 0x1ab   : > { %vm1814_vm8 = vcmp.lt.s32.totalorder %v1812_v14, %v1813_v50  ;;  %vm1663_vm12 = vcmp.le.f32.partialorder %v5129_v41, %v1623_v57  ;;  %vm1667_vm3 = vcmp.le.f32.partialorder %v5135_v63, %v1623_v57  ;;  %vm1671_vm4 = vcmp.le.f32.partialorder %v5141_v43, %v1623_v57 }
 0x1ac   : > { %v1815_v52 = vsel %vm1814_vm8, %v1812_v14, %v1813_v50  ;;  %vm1675_vm11 = vcmp.le.f32.partialorder %v5147_v62, %v1623_v57  ;;  %vm1679_vm1 = vcmp.le.f32.partialorder %v5153_v13, %v1623_v57  ;;  %vm1683_vm2 = vcmp.le.f32.partialorder %v5159_v24, %v1623_v57 }
 0x1ad   : > { %v1816_v33 = vrot.slane %v1815_v52, 1  ;;  %vm1687_vm10 = vcmp.le.f32.partialorder %v5165_v37, %v1623_v57  ;;  %vm1691_vm5 = vcmp.le.f32.partialorder %v5171_v54, %v1623_v57  ;;  %v1695_v41 = vsel %vm1663_vm12, %v3647_v12, 64 }
 0x1ae   : > { %v1699_v63 = vsel %vm1667_vm3, %v3953_v30, 64  ;;  %v1703_v43 = vsel %vm1671_vm4, %v3956_v4, 64  ;;  %v1707_v3 = vsel %vm1675_vm11, %v3959_v16, 64  ;;  %v1711_v14 = vsel %vm1679_vm1, %v3970_v26, 64 }
 0x1af   : > { %vm1817_vm8 = vcmp.lt.s32.totalorder %v1815_v52, %v1816_v33  ;;  %v1715_v62 = vsel %vm1683_vm2, %v3973_v25, 64  ;;  %v1719_v13 = vsel %vm1687_vm10, %v3976_v34, 64  ;;  %v1723_v24 = vsel %vm1691_vm5, %v3979_v39, 64 }
 0x1b0   : > { %v1818_v37 = vsel %vm1817_vm8, %v1815_v52, %v1816_v33  ;;  %vm1727_vm9 = vcmp.lt.s32.totalorder %v1695_v41, %v1699_v63  ;;  %v1851_v54 = vadd.f32 1e-08, %v1623_v57  ;;  %v1637_v50 = vmin.f32 %v5331_v28, %v5337_v0  ;;  %v6233_v33 = vld [vmem:[#allocation26_spill] sm:$0xff] }
 0x1b1   : > { %vm1822_vm12 = vcmp.eq.s32.totalorder %v3647_v12, %v1818_v37  ;;  %vm1826_vm3 = vcmp.eq.s32.totalorder %v3953_v30, %v1818_v37  ;;  %v1728_v6 = vsel %vm1727_vm9, %v1695_v41, %v1699_v63  ;;  %vm1830_vm11 = vcmp.eq.s32.totalorder %v3956_v4, %v1818_v37 }
 0x1b2   : > { %v1866_v40 = vsel %vm1822_vm12, %v5313_v49, %v6230_v55  ;;  %v1870_v57 = vsel %vm1826_vm3, %v5313_v49, %v6231_v27  ;;  %vm1729_vm4 = vcmp.lt.s32.totalorder %v1728_v6, %v1703_v43  ;;  %3422 = vrcp.f32 %v1851_v54  ;;  %v6234_v54 = vld [vmem:[#allocation24_spill] sm:$0xff]  ;;  %v6236_v27 = vld [vmem:[#allocation45_spill] sm:$0xff] }
 0x1b3   : > { %v3219_v7 = vpack.c.bf16 %v1870_v57, %v1866_v40  ;;  %v1730_v11 = vsel %vm1729_vm4, %v1728_v6, %v1703_v43  ;;  %v1638_v17 = vmin.f32 %v1637_v50, %v5343_v47  ;;  %vm1834_vm9 = vcmp.eq.s32.totalorder %v3959_v16, %v1818_v37  ;;  %v6235_v50 = vld [vmem:[#allocation30_spill] sm:$0xff] }
 0x1b4   : > { %vm1731_vm1 = vcmp.lt.s32.totalorder %v1730_v11, %v1707_v3  ;;  %v5406_v52 = vsel %vm1830_vm11, %v5313_v49, %v6232_v23  ;;  %v5413_v41 = vsel %vm1509_vm0, %v5269_v1, %v6233_v33  ;;  %v5418_v6 = vsel %vm1834_vm9, %v5313_v49, %v6234_v54  ;;  %v6239_v33 = vld [vmem:[#allocation15_spill] sm:$0xff]  ;;  %v6241_v40 = vld [vmem:[#allocation34_spill] sm:$0xff] }
 0x1b5   : > { %3220 = vmatprep.subr.bf16.mxu1 %v3219_v7  ;;  %v1732_v63 = vsel %vm1731_vm1, %v1730_v11, %v1707_v3  ;;  %v1639_v43 = vmin.f32 %v1638_v17, %v5349_v36  ;;  %v5425_v55 = vsel %vm1513_vm13, %v5269_v1, %v6235_v50  ;;  %v5434_v3 = vsel %vm1840_vm7, %v5260_v32, %v6236_v27  ;;  %v6237_v17 = vld [vmem:[#allocation12_spill] sm:$0xff]  ;;  %v6240_v50 = vld [vmem:[#allocation33_spill] sm:$0xff] }
 0x1b6   : > { %vm1733_vm2 = vcmp.lt.s32.totalorder %v1732_v63, %v1711_v14  ;;  %vm1838_vm0 = vcmp.eq.s32.totalorder %v3970_v26, %v1818_v37  ;;  %vm1842_vm13 = vcmp.eq.s32.totalorder %v3973_v25, %v1818_v37  ;;  %vm1844_vm5 = vcmp.eq.s32.totalorder %v3976_v34, %v5262_v31 }
 0x1b7   : > { %v1734_v57 = vsel %vm1733_vm2, %v1732_v63, %v1711_v14  ;;  %v1640_v7 = vmin.f32 %v1639_v43, %v5355_v42  ;;  %v5443_v23 = vsel %vm1838_vm0, %v5313_v49, %v6237_v17  ;;  %v5447_v54 = vsel %vm1842_vm13, %v5313_v49, %v6239_v33 }
 0x1b8   : > { %vm1735_vm10 = vcmp.lt.s32.totalorder %v1734_v57, %v1715_v62  ;;  %6238 = vst [vmem:[#allocation20_spill] sm:$0xff] %v5443_v23  ;;  %v5454_v14 = vsel %vm1517_vm6, %v5269_v1, %v6240_v50  ;;  %v5464_v17 = vsel %vm1521_vm15, %v5269_v1, %v6241_v40  ;;  %vm1848_vm6 = vcmp.eq.s32.totalorder %v3979_v39, %v5262_v31 }
 0x1b9   : > { %v1736_v63 = vsel %vm1735_vm10, %v1734_v57, %v1715_v62  ;;  %v1641_v43 = vmin.f32 %v1640_v7, %v5361_v48  ;;  %vm1846_vm8 = vcmp.eq.s32.totalorder %v3976_v34, %v1818_v37  ;;  %v6242_v7 = vld [vmem:[#allocation27_spill] sm:$0xff]  ;;  %v5478_v40 = vsel %vm1848_vm6, %v5260_v32, %v5050_v2  ;;  %v6245_v2 = vld [vmem:[#allocation40_spill] sm:$0xff] }
 0x1ba   : > { %vm1737_vm7 = vcmp.lt.s32.totalorder %v1736_v63, %v1719_v13  ;;  %v5474_v33 = vsel %vm1844_vm5, %v5260_v32, %v6242_v7  ;;  %vm1850_vm12 = vcmp.eq.s32.totalorder %v3979_v39, %v1818_v37  ;;  %v5487_v31 = vsel %vm1846_vm8, %v5313_v49, %v5060_v59 }
 0x1bb   : > { %v1738_v62 = vsel %vm1737_vm7, %v1736_v63, %v1719_v13  ;;  %v1642_v57 = vmin.f32 %v1641_v43, %v5367_v18  ;;  %6243 = vst [vmem:[#allocation6_spill] sm:$0xff] %v5487_v31  ;;  %v5492_v43 = vsel %vm1850_vm12, %v5313_v49, %v5067_v35  ;;  %vm6246_vm3 = vcmp.eq.s32.totalorder %v3976_v34, %v5291_v58 }
 0x1bc   : > { %v5480_v50 = vpop.eup %3422  ;;  %vm1739_vm15 = vcmp.lt.s32.totalorder %v1738_v62, %v1723_v24  ;;  %6244 = vst [vmem:[#allocation13_spill] sm:$0xff] %v5492_v43  ;;  %v5499_v7 = vsel %vm6246_vm3, %v5269_v1, %v6245_v2  ;;  %v5508_v59 = vsel %vm1529_vm14, %v5269_v1, %v5219_v29  ;;  %v6249_v2 = vld [vmem:[#allocation41_spill] sm:$0xff] }
 0x1bd   : > { %v1740_v13 = vsel %vm1739_vm15, %v1738_v62, %v1723_v24  ;;  %v1643_v63 = vmin.f32 %v1642_v57, %v5391_v46  ;;  %v5512_v35 = vadd.f32 %v5480_v50, %v5299_v44  ;;  %v6248_v62 = vld [vmem:[#allocation39_spill] sm:$0xff]  ;;  %v5520_v27 = vadd.f32 %v5313_v49, %v6249_v2 }
 0x1be   : > { %v1741_v60 = vrot.slane %v1740_v13, 4  ;;  %v5516_v57 = vadd.f32 %v5260_v32, %v6248_v62 }
 0x1bf   : > { %6247 = vst [vmem:[#allocation35_spill] sm:$0xff] %v5512_v35  ;;  %v1644_v24 = vrot.slane %v1643_v63, 4 }
 0x1c0   : > { %vm1742_vm4 = vcmp.lt.s32.totalorder %v1740_v13, %v1741_v60 }
 0x1c1   : > { %v1743_v37 = vsel %vm1742_vm4, %v1740_v13, %v1741_v60  ;;  %v1645_v11 = vmin.f32 %v1643_v63, %v1644_v24 }
 0x1c2   : > { %v1744_v10 = vrot.slane %v1743_v37, 2 }
 0x1c3   : > { %v1646_v58 = vrot.slane %v1645_v11, 2 }
 0x1c4   : > { %vm1745_vm14 = vcmp.lt.s32.totalorder %v1743_v37, %v1744_v10 }
 0x1c5   : > { %v1746_v29 = vsel %vm1745_vm14, %v1743_v37, %v1744_v10  ;;  %v1647_v31 = vmin.f32 %v1645_v11, %v1646_v58  ;;  %v6251_v37 = vpack.c.bf16 %v5434_v3, %v5295_v61  ;;  %v6253_v58 = vmov 0.0  }
 0x1c6   : > { %v1747_v43 = vrot.slane %v1746_v29, 1 }
 0x1c7   : > { %v1648_v44 = vrot.slane %v1647_v31, 1 }
 0x1c8   : > { %vm1748_vm11 = vcmp.lt.s32.totalorder %v1746_v29, %v1747_v43 }
 0x1c9   : > { %v1749_v35 = vsel %vm1748_vm11, %v1746_v29, %v1747_v43  ;;  %v1649_v23 = vmin.f32 %v1647_v31, %v1648_v44  ;;  %v458_v44 = vld [vmem:[%s436_s26 + $0x10] sm:$0xff] }
 0x1ca   : > { %vm1819_vm1 = vcmp.eq.s32.totalorder %v3647_v12, %v1749_v35  ;;  %vm1823_vm9 = vcmp.eq.s32.totalorder %v3953_v30, %v1749_v35  ;;  %vm1827_vm2 = vcmp.eq.s32.totalorder %v3956_v4, %v1749_v35  ;;  %vm1831_vm0 = vcmp.eq.s32.totalorder %v3959_v16, %v1749_v35 }
 0x1cb   : > { %v1863_v60 = vsel %vm1819_vm1, %v5480_v50, %v5116_v56  ;;  %v1867_v32 = vsel %vm1823_vm9, %v5480_v50, %v5123_v19  ;;  %vm1665_vm13 = vcmp.le.f32.partialorder %v5331_v28, %v1649_v23  ;;  %vm1669_vm10 = vcmp.le.f32.partialorder %v5337_v0, %v1649_v23 }
 0x1cc   : > { %v3205_v10 = vpack.c.bf16 %v1867_v32, %v1863_v60  ;;  %vm1673_vm7 = vcmp.le.f32.partialorder %v5343_v47, %v1649_v23  ;;  %vm1677_vm5 = vcmp.le.f32.partialorder %v5349_v36, %v1649_v23  ;;  %vm1681_vm6 = vcmp.le.f32.partialorder %v5355_v42, %v1649_v23  ;;  %v459_v60 = vld [vmem:[%s436_s26 + $0x18] sm:$0xff] }
 0x1cd   : > { %vm1685_vm8 = vcmp.le.f32.partialorder %v5361_v48, %v1649_v23  ;;  %vm1689_vm15 = vcmp.le.f32.partialorder %v5367_v18, %v1649_v23  ;;  %vm1693_vm12 = vcmp.le.f32.partialorder %v5391_v46, %v1649_v23  ;;  %v1697_v56 = vsel %vm1665_vm13, %v3647_v12, 64  ;;  %v457_v46 = vld [vmem:[%s436_s26 + $0x8] sm:$0xff] }
 0x1ce   : > { %3206 = vmatpush1.bf16.msra.mxu0 %v3205_v10  ;;  %v1701_v19 = vsel %vm1669_vm10, %v3953_v30, 64  ;;  %v1705_v49 = vsel %vm1673_vm7, %v3956_v4, 64  ;;  %v1709_v28 = vsel %vm1677_vm5, %v3959_v16, 64  ;;  %v6250_v0 = vpack.c.bf16 %v5285_v45, %v5281_v8 }
 0x1cf   : > { %vm1773_vm3 = vcmp.lt.s32.totalorder %v1697_v56, %v1701_v19  ;;  %v1853_v36 = vadd.f32 1e-08, %v1649_v23  ;;  %v1871_v11 = vsel %vm1827_vm2, %v5480_v50, %v5185_v5  ;;  %v1875_v31 = vsel %vm1831_vm0, %v5480_v50, %v5194_v21 }
 0x1d0   : > { %3208 = vmatprep.subr.bf16.mxu0 %v6250_v0  ;;  %v1774_v47 = vsel %vm1773_vm3, %v1697_v56, %v1701_v19  ;;  %v3209_v13 = vpack.c.bf16 %v1875_v31, %v1871_v11  ;;  %vm1835_vm14 = vcmp.eq.s32.totalorder %v3970_v26, %v1749_v35  ;;  %vm1839_vm11 = vcmp.eq.s32.totalorder %v3973_v25, %v1749_v35  ;;  %v2749_v11 = vld [vmem:[%s5975_s8 + $0x8] sm:$0xff] }
 0x1d1   : > { %vm1775_vm4 = vcmp.lt.s32.totalorder %v1774_v47, %v1705_v49  ;;  %3424 = vrcp.f32 %v1853_v36  ;;  %v1879_v45 = vsel %vm1835_vm14, %v5480_v50, %v5202_v15  ;;  %v1883_v5 = vsel %vm1839_vm11, %v5480_v50, %v5211_v9  ;;  %v2136_v36 = vld [vmem:[%s5973_s6 + $0x30] sm:$0xff] }
 0x1d2   : > { %v1776_v8 = vsel %vm1775_vm4, %v1774_v47, %v1705_v49  ;;  %3210 = vmatpush1.bf16.msra.mxu0 %v3209_v13  ;;  %v3213_v63 = vpack.c.bf16 %v1883_v5, %v1879_v45  ;;  %vm1843_vm9 = vcmp.eq.s32.totalorder %v3976_v34, %v1749_v35  ;;  %vm1847_vm2 = vcmp.eq.s32.totalorder %v3979_v39, %v1749_v35  ;;  %v2137_v47 = vld [vmem:[%s5973_s6 + $0x38] sm:$0xff] }
 0x1d3   : > { %vm1777_vm1 = vcmp.lt.s32.totalorder %v1776_v8, %v1709_v28  ;;  %v1713_v21 = vsel %vm1681_vm6, %v3970_v26, 64  ;;  %3212 = vmatprep.subr.bf16.mxu0 %v6251_v37  ;;  %v1887_v15 = vsel %vm1843_vm9, %v5480_v50, %v5243_v38  ;;  %v1891_v9 = vsel %vm1847_vm2, %v5480_v50, %v5251_v51  ;;  %v456_v50 = vld [vmem:[%s436_s26] sm:$0xff]  ;;  %s5675_s26 = scalar_lea.vmem %s5969_s2, %s3199_s24 }
 0x1d4   : > { %v1778_v43 = vsel %vm1777_vm1, %v1776_v8, %v1709_v28  ;;  %v3217_v24 = vpack.c.bf16 %v1891_v9, %v1887_v15  ;;  %v1717_v35 = vsel %vm1685_vm8, %v3973_v25, 64  ;;  %v1721_v61 = vsel %vm1689_vm15, %v3976_v34, 64 }
 0x1d5   : > { %vm1779_vm0 = vcmp.lt.s32.totalorder %v1778_v43, %v1713_v21  ;;  %v6252_v38 = vpack.c.bf16 %v5478_v40, %v5474_v33  ;;  %v1725_v51 = vsel %vm1693_vm12, %v3979_v39, 64  ;;  %vm1899_vm5 = vcmask 523264  }
 0x1d6   : > { %v1780_v42 = vsel %vm1779_vm0, %v1778_v43, %v1713_v21  ;;  %3214 = vmatpush1.bf16.msra.mxu0 %v3213_v63  ;;  %v1577_v18 = vadd.f32 %v5269_v1, %v4373_v20  ;;  %v2751_v21 = vld [vmem:[%s5975_s8 + $0x18] sm:$0xff]  ;;  %v2750_v43 = vld [vmem:[%s5975_s8 + $0x10] sm:$0xff]  ;;  %vm2138_vm0 = vcmask 261120  }
 0x1d7   : > { %vm1781_vm13 = vcmp.lt.s32.totalorder %v1780_v42, %v1717_v35  ;;  %3216 = vmatprep.subr.bf16.mxu0 %v6252_v38 }
 0x1d8   : > { %v1782_v3 = vsel %vm1781_vm13, %v1780_v42, %v1717_v35  ;;  %vm2389_vm13 = vcmask 130048  }
 0x1d9   : > { %vm1783_vm10 = vcmp.lt.s32.totalorder %v1782_v3, %v1721_v61 }
 0x1da   : > { %v1784_v48 = vsel %vm1783_vm10, %v1782_v3, %v1721_v61  ;;  %3218 = vmatpush1.bf16.msra.mxu0 %v3217_v24 }
 0x1db   : > { %vm1785_vm7 = vcmp.lt.s32.totalorder %v1784_v48, %v1725_v51  ;;  %v3425_v62 = vpop.eup %3424 }
 0x1dc   : > { %v1786_v33 = vsel %vm1785_vm7, %v1784_v48, %v1725_v51  ;;  %v5589_v2 = vadd.f32 %v3425_v62, %v1577_v18 }
 0x1dd   : > { %v1787_v40 = vrot.slane %v1786_v33, 4  ;;  %3145 = vmatmul.mubr.msk.f32.vlgmr.msra.gmra.mrb[0].mxu0 %vm1899_vm5, %v456_v50 }
 0x1de   : > { %1982 = vmatprep.mubr.f32.mxu0 %v6253_v58 }
 0x1df   : > { %vm1788_vm6 = vcmp.lt.s32.totalorder %v1786_v33, %v1787_v40 }
 0x1e0   : > { %v1789_v23 = vsel %vm1788_vm6, %v1786_v33, %v1787_v40  ;;  %v453_v33 = vld [vmem:[%s5675_s26 + $0x28] sm:$0xff] }
 0x1e1   : > { %v1790_v29 = vrot.slane %v1789_v23, 2  ;;  %3146 = vmatmul.mubr.msk.f32.gmra.mrb[2].mxu0 %vm1899_vm5, %v457_v46 }
 0x1e2   : > { %1988 = vmatprep.mubr.f32.mxu0 %v6253_v58 }
 0x1e3   : > { %vm1791_vm8 = vcmp.lt.s32.totalorder %v1789_v23, %v1790_v29 }
 0x1e4   : > { %v1792_v20 = vsel %vm1791_vm8, %v1789_v23, %v1790_v29 }
 0x1e5   : > { %v1793_v1 = vrot.slane %v1792_v20, 1  ;;  %3147 = vmatmul.mubr.msk.f32.gmra.mrb[4].mxu0 %vm1899_vm5, %v458_v44 }
 0x1e6   : > { %1994 = vmatprep.mubr.f32.mxu0 %v6253_v58 }
 0x1e7   : > { %vm1794_vm15 = vcmp.lt.s32.totalorder %v1792_v20, %v1793_v1 }
 0x1e8   : > { %v1795_v32 = vsel %vm1794_vm15, %v1792_v20, %v1793_v1  ;;  %v452_v20 = vld [vmem:[%s5675_s26 + $0x20] sm:$0xff] }
 0x1e9   : > { %vm1821_vm12 = vcmp.eq.s32.totalorder %v3647_v12, %v1795_v32  ;;  %vm1825_vm3 = vcmp.eq.s32.totalorder %v3953_v30, %v1795_v32  ;;  %vm1829_vm4 = vcmp.eq.s32.totalorder %v3956_v4, %v1795_v32  ;;  %vm1833_vm14 = vcmp.eq.s32.totalorder %v3959_v16, %v1795_v32  ;;  %3148 = vmatmul.mubr.msk.f32.gmra.mrb[6].mxu0 %vm1899_vm5, %v459_v60  ;;  %v5684_v1 = vld [vmem:[%s5972_s5] sm:$0xff] }
 0x1ea   : > { %v1865_v10 = vsel %vm1821_vm12, %v3425_v62, %v5321_v53  ;;  %v1869_v56 = vsel %vm1825_vm3, %v3425_v62, %v5328_v22  ;;  %v1873_v19 = vsel %vm1829_vm4, %v3425_v62, %v5413_v41  ;;  %v1877_v49 = vsel %vm1833_vm14, %v3425_v62, %v5425_v55  ;;  %2227 = vmatprep.mubr.f32.mxu0 %v6253_v58  ;;  %v6255_v22 = vld [vmem:[#allocation20_spill] sm:$0xff]  ;;  %v6258_v55 = vld [vmem:[#allocation6_spill] sm:$0xff] }
 0x1eb   : > { %v3221_v28 = vpack.c.bf16 %v1869_v56, %v1865_v10  ;;  %v3225_v0 = vpack.c.bf16 %v1877_v49, %v1873_v19  ;;  %vm1837_vm11 = vcmp.eq.s32.totalorder %v3970_v26, %v1795_v32  ;;  %vm1841_vm1 = vcmp.eq.s32.totalorder %v3973_v25, %v1795_v32 }
 0x1ec   : > { %v1881_v12 = vsel %vm1837_vm11, %v3425_v62, %v5454_v14  ;;  %v1885_v30 = vsel %vm1841_vm1, %v3425_v62, %v5464_v17  ;;  %vm1845_vm9 = vcmp.eq.s32.totalorder %v3976_v34, %v1795_v32  ;;  %vm1849_vm2 = vcmp.eq.s32.totalorder %v3979_v39, %v1795_v32  ;;  %v6257_v34 = vld [vmem:[#allocation13_spill] sm:$0xff]  ;;  %v2132_v14 = vld [vmem:[%s5973_s6 + $0x10] sm:$0xff]  ;;  %v5694_v32 = vld [vmem:[%s5972_s5 + $0x8] sm:$0xff] }
 0x1ed   : > { %3222 = vmatpush1.bf16.msra.mxu1 %v3221_v28  ;;  %v3229_v4 = vpack.c.bf16 %v1885_v30, %v1881_v12  ;;  %v1889_v16 = vsel %vm1845_vm9, %v3425_v62, %v5499_v7  ;;  %v1893_v53 = vsel %vm1849_vm2, %v3425_v62, %v5508_v59  ;;  %v6254_v26 = vpack.c.bf16 %v5418_v6, %v5406_v52  ;;  %v2130_v52 = vld [vmem:[%s5973_s6] sm:$0xff]  ;;  %v2131_v6 = vld [vmem:[%s5973_s6 + $0x8] sm:$0xff]  ;;  %v6260_v17 = vld [vmem:[#allocation35_spill] sm:$0xff] }
 0x1ee   : > { %v3233_v25 = vpack.c.bf16 %v1893_v53, %v1889_v16  ;;  %v6256_v41 = vpack.c.bf16 %v5447_v54, %v6255_v22  ;;  %v6259_v39 = vpack.c.bf16 %v6257_v34, %v6258_v55  ;;  %2642 = vperm.xlu0 %3400, %v2130_v52   ;;  %2647 = vperm.xlu1 %3401, %v2131_v6   ;;  %v2133_v54 = vld [vmem:[%s5973_s6 + $0x18] sm:$0xff]  ;;  %3426 = vrcp.f32 %v6260_v17  ;;  %v2135_v7 = vld [vmem:[%s5973_s6 + $0x28] sm:$0xff]  ;;  %v2134_v59 = vld [vmem:[%s5973_s6 + $0x20] sm:$0xff] }
 0x1ef   : > { %3224 = vmatprep.subr.bf16.mxu1 %v6254_v26  ;;  %3428 = vrcp.f32 %v5516_v57  ;;  %v2748_v57 = vld [vmem:[%s5975_s8] sm:$0xff]  ;;  %v449_v62 = vld [vmem:[%s5675_s26 + $0x8] sm:$0xff]  ;;  %v2125_v28 = vld [vmem:[%s5972_s5 + $0x18] sm:$0xff] }
 0x1f0   : > { %v3251_v29 = vpack.c.bf16 %v453_v33, %v449_v62  ;;  %3430 = vrcp.f32 %v5589_v2  ;;  %v2126_v16 = vld [vmem:[%s5972_s5 + $0x20] sm:$0xff]  ;;  %v2127_v55 = vld [vmem:[%s5972_s5 + $0x28] sm:$0xff]  ;;  %v455_v17 = vld [vmem:[%s5675_s26 + $0x38] sm:$0xff] }
 0x1f1   : > { %3226 = vmatpush1.bf16.msra.mxu1 %v3225_v0  ;;  %3432 = vrcp.f32 %v5520_v27  ;;  %v5702_v27 = vld [vmem:[%s5972_s5 + $0x10] sm:$0xff] }
 0x1f2   : > { %3228 = vmatprep.subr.bf16.mxu1 %v6256_v41  ;;  %2657 = vperm.xlu0 %3400, %v2133_v54  }
 0x1f3   : > { %2652 = vperm.xlu1 %3401, %v2132_v14   ;;  %v451_v14 = vld [vmem:[%s5675_s26 + $0x18] sm:$0xff] }
 0x1f5   : > { %3230 = vmatpush1.bf16.msra.mxu1 %v3229_v4 }
 0x1f6   : > { %3232 = vmatprep.subr.bf16.mxu1 %v6259_v39  ;;  %2667 = vperm.xlu0 %3400, %v2135_v7   ;;  %v2128_v7 = vld [vmem:[%s5972_s5 + $0x30] sm:$0xff] }
 0x1f7   : > { %2662 = vperm.xlu1 %3401, %v2134_v59  }
 0x1f8   : > { %v3427_v31 = vpop.eup %3426 }
 0x1f9   : > { %3234 = vmatpush1.bf16.msra.mxu1 %v3233_v25  ;;  %v3429_v8 = vpop.eup %3428 }
 0x1fa   : > { %2677 = vperm.xlu0 %3400, %v2137_v47   ;;  %v3431_v2 = vpop.eup %3430 }
 0x1fb   : > { %2672 = vperm.xlu1 %3401, %v2136_v36   ;;  %v3433_v56 = vpop.eup %3432 }
 0x1fc   : > { %3149 = vmatmul.mubr.msk.f32.vlgmr.msra.gmra.mrb[0].mxu1 %vm1899_vm5, %v456_v50 }
 0x1fd   : > { %2071 = vmatprep.mubr.f32.mxu1 %v6253_v58 }
 0x1fe   : > { %2759 = vperm.xlu0 %3400, %v2749_v11   ;;  %v3255_v11 = vpack.c.bf16 %v455_v17, %v451_v14 }
 0x1ff   : > { %2754 = vperm.xlu1 %3401, %v2748_v57   ;;  %v450_v57 = vld [vmem:[%s5675_s26 + $0x10] sm:$0xff] }
 0x200   : > { %3150 = vmatmul.mubr.msk.f32.gmra.mrb[2].mxu1 %vm1899_vm5, %v457_v46 }
 0x201   : > { %2077 = vmatprep.mubr.f32.mxu1 %v6253_v58 }
 0x202   : > { %2769 = vperm.xlu0 %3400, %v2751_v21   ;;  %v2117_v21 = vld [vmem:[%s5971_s4 + $0x18] sm:$0xff] }
 0x203   : > { %2764 = vperm.xlu1 %3401, %v2750_v43   ;;  %v2118_v43 = vld [vmem:[%s5971_s4 + $0x20] sm:$0xff] }
 0x204   : > { %3151 = vmatmul.mubr.msk.f32.gmra.mrb[4].mxu1 %vm1899_vm5, %v458_v44  ;;  %v448_v44 = vld [vmem:[%s5675_s26] sm:$0xff] }
 0x205   : > { %2083 = vmatprep.mubr.f32.mxu1 %v6253_v58 }
 0x208   : > { %3152 = vmatmul.mubr.msk.f32.gmra.mrb[6].mxu1 %vm1899_vm5, %v459_v60  ;;  %v3253_v60 = vpack.c.bf16 %v452_v20, %v448_v44 }
 0x209   : > { %2340 = vmatprep.mubr.f32.mxu1 %v6253_v58 }
 0x2b0   : > { %v1978_v13 = vpop.f32.mrb[0].mxu0 }
 0x2b1   : > { %v2098_v45 = vmul.f32 %v3427_v31, %v1978_v13  ;;  %v1980_v5 = vpop.f32.mrb[1].mxu0  ;;  %v2129_v13 = vld [vmem:[%s5972_s5 + $0x38] sm:$0xff] }
 0x2b2   : > { %v2099_v63 = vmul.f32 %v3429_v8, %v1980_v5  ;;  %v2115_v5 = vld [vmem:[%s5971_s4 + $0x8] sm:$0xff] }
 0x2b4   : > { %v1984_v37 = vpop.f32.mrb[2].mxu0 }
 0x2b5   : > { %v2102_v15 = vmul.f32 %v3427_v31, %v1984_v37  ;;  %v1986_v9 = vpop.f32.mrb[3].mxu0  ;;  %v2119_v37 = vld [vmem:[%s5971_s4 + $0x28] sm:$0xff] }
 0x2b6   : > { %v2103_v24 = vmul.f32 %v3429_v8, %v1986_v9  ;;  %v2121_v9 = vld [vmem:[%s5971_s4 + $0x38] sm:$0xff] }
 0x2b7   : > { %v3237_v35 = vpack.c.bf16 %v2102_v15, %v2098_v45  ;;  %v2114_v45 = vld [vmem:[%s5971_s4] sm:$0xff]  ;;  %v2120_v15 = vld [vmem:[%s5971_s4 + $0x30] sm:$0xff] }
 0x2b8   : > { %v3235_v42 = vpack.c.bf16 %v2103_v24, %v2099_v63  ;;  %v1990_v61 = vpop.f32.mrb[4].mxu0  ;;  %v2116_v63 = vld [vmem:[%s5971_s4 + $0x10] sm:$0xff] }
 0x2b9   : > { %v2106_v3 = vmul.f32 %v3427_v31, %v1990_v61  ;;  %v1992_v38 = vpop.f32.mrb[5].mxu0 }
 0x2ba   : > { %v2107_v51 = vmul.f32 %v3429_v8, %v1992_v38  ;;  %3236 = vmatprep.subr.bf16.mxu0 %v3235_v42  ;;  %v5811_v42 = vpop.permute.xlu0 %2642 }
 0x2bb   : > { %3238 = vmatpush1.bf16.msra.mxu0 %v3237_v35 }
 0x2bc   : > { %v1996_v48 = vpop.f32.mrb[6].mxu0 }
 0x2bd   : > { %v2110_v50 = vmul.f32 %v3427_v31, %v1996_v48  ;;  %v1998_v18 = vpop.f32.mrb[7].mxu0  ;;  %v454_v31 = vld [vmem:[%s5675_s26 + $0x30] sm:$0xff]  ;;  %s404_s26 = sand.u32 1, %s3496_s10  }
 0x2be   : > { %v2111_v40 = vmul.f32 %v3429_v8, %v1998_v18  ;;  %v3257_v8 = vpack.c.bf16 %v454_v31, %v450_v57  ;;  %s3136_s20 = sshll.u32 %s404_s26, 7  ;;  %s5921_s12 = scalar_lea.sflag [#allocation3], %s404_s26 }
 0x2bf   : > { %v3241_v46 = vpack.c.bf16 %v2110_v50, %v2106_v3  ;;  %v5814_v3 = vpop.permute.xlu1 %2647  ;;  %s5892_s25 = scalar_lea.vmem [#allocation2], %s3136_s20  ;;  %s3440_s20 = scalar_lea.vmem %s3439_s18, 4096 }
 0x2c0   : > { %v3239_v23 = vpack.c.bf16 %v2111_v40, %v2107_v51  ;;  %s3010_s24 = sshll.u32 %s5892_s25, 4  ;;  %s5915_s24 = int_to_ptr.vmem [resolvable:$true] %s3010_s24 }
 0x2c1   : > { %s3434_s15 = scalar_lea.vmem %s5915_s24, 2048  ;;  %p3441_p1 = scmp.lt.s32.totalorder %s5915_s24, %s3439_s18 }
 0x2c2   : > { %3240 = vmatprep.subr.bf16.mxu0 %v3239_v23  ;;  %p3435_p12 = scmp.ne.s32.totalorder %s5915_s24, %s3434_s15  ;;  %p3442_p2 = scmp.lt.s32.totalorder %s3440_s20, %s3434_s15 }
 0x2c3   : > { %3242 = vmatpush1.bf16.msra.mxu0 %v3241_v46  ;;  %v5819_v20 = vpop.permute.xlu1 %2652 }
 0x2c4   : > { %3252 = vmatprep.subr.bf16.mxu0 %v3251_v29  ;;  %p3436_p13 = pnand %p3435_p12, %p3611_p4  ;;  %p3443_p3 = por %p3442_p2, %p3441_p1 }
 0x2c6   : > { %3153 = vmatmul.mubr.msk.f32.vlgmr.msra.gmra.mrb[8].mxu0 %vm2138_vm0, %v5684_v1  ;;  %p3437_p0 = pneg %p3436_p13 }
 0x2c7   : > { %2233 = vmatprep.mubr.f32.mxu0 %v6253_v58  ;;  %3254 = vmatpush1.bf16.msra.mxu0 %v3253_v60 }
 0x2c8   : > { %p3444_p5 = pnand %p3443_p3, %p3437_p0 }
 0x2ca   : > { %3154 = vmatmul.mubr.msk.f32.gmra.mrb[10].mxu0 %vm2138_vm0, %v5694_v32 }
 0x2cb   : > { %2239 = vmatprep.mubr.f32.mxu0 %v6253_v58 }
 0x2ce   : > { %3155 = vmatmul.mubr.msk.f32.gmra.mrb[12].mxu0 %vm2138_vm0, %v5702_v27 }
 0x2cf   : > { %v2067_v10 = vpop.f32.mrb[0].mxu1  ;;  %2245 = vmatprep.mubr.f32.mxu0 %v6253_v58 }
 0x2d0   : > { %v2100_v19 = vmul.f32 %v3431_v2, %v2067_v10  ;;  %v2069_v49 = vpop.f32.mrb[1].mxu1 }
 0x2d1   : > { %v2101_v0 = vmul.f32 %v3433_v56, %v2069_v49 }
 0x2d2   : > { %3156 = vmatmul.mubr.msk.f32.gmra.mrb[14].mxu0 %vm2138_vm0, %v2125_v28 }
 0x2d3   : > { %v2073_v12 = vpop.f32.mrb[2].mxu1  ;;  %2251 = vmatprep.mubr.f32.mxu0 %v6253_v58 }
 0x2d4   : > { %v2104_v30 = vmul.f32 %v3431_v2, %v2073_v12  ;;  %v2075_v4 = vpop.f32.mrb[3].mxu1 }
 0x2d5   : > { %v2105_v53 = vmul.f32 %v3433_v56, %v2075_v4 }
 0x2d6   : > { %v3245_v26 = vpack.c.bf16 %v2104_v30, %v2100_v19  ;;  %3157 = vmatmul.mubr.msk.f32.gmra.mrb[16].mxu0 %vm2138_vm0, %v2126_v16 }
 0x2d7   : > { %v3243_v25 = vpack.c.bf16 %v2105_v53, %v2101_v0  ;;  %v2079_v22 = vpop.f32.mrb[4].mxu1  ;;  %2257 = vmatprep.mubr.f32.mxu0 %v6253_v58  ;;  %v5827_v53 = vpop.permute.xlu1 %2662 }
 0x2d8   : > { %v2108_v41 = vmul.f32 %v3431_v2, %v2079_v22  ;;  %v2081_v34 = vpop.f32.mrb[5].mxu1 }
 0x2d9   : > { %v2109_v39 = vmul.f32 %v3433_v56, %v2081_v34  ;;  %3244 = vmatprep.subr.bf16.mxu1 %v3243_v25 }
 0x2da   : > { %3246 = vmatpush1.bf16.msra.mxu1 %v3245_v26  ;;  %3158 = vmatmul.mubr.msk.f32.gmra.mrb[18].mxu0 %vm2138_vm0, %v2127_v55 }
 0x2db   : > { %v2085_v52 = vpop.f32.mrb[6].mxu1  ;;  %2263 = vmatprep.mubr.f32.mxu0 %v6253_v58 }
 0x2dc   : > { %v2112_v6 = vmul.f32 %v3431_v2, %v2085_v52  ;;  %v2087_v54 = vpop.f32.mrb[7].mxu1 }
 0x2dd   : > { %v2113_v59 = vmul.f32 %v3433_v56, %v2087_v54 }
 0x2de   : > { %v3249_v47 = vpack.c.bf16 %v2112_v6, %v2108_v41  ;;  %3159 = vmatmul.mubr.msk.f32.gmra.mrb[20].mxu0 %vm2138_vm0, %v2128_v7 }
 0x2df   : > { %v3247_v36 = vpack.c.bf16 %v2113_v59, %v2109_v39  ;;  %2269 = vmatprep.mubr.f32.mxu0 %v6253_v58 }
 0x2e1   : > { %3248 = vmatprep.subr.bf16.mxu1 %v3247_v36  ;;  %v5835_v36 = vpop.permute.xlu1 %2672 }
 0x2e2   : > { %3250 = vmatpush1.bf16.msra.mxu1 %v3249_v47  ;;  %3160 = vmatmul.mubr.msk.f32.gmra.mrb[22].mxu0 %vm2138_vm0, %v2129_v13 }
 0x2e3   : > { %3256 = vmatprep.subr.bf16.mxu1 %v3255_v11  ;;  %2478 = vmatprep.mubr.f32.mxu0 %v6253_v58 }
 0x2e5   : > { %3161 = vmatmul.mubr.msk.f32.vlgmr.msra.gmra.mrb[8].mxu1 %vm2138_vm0, %v5684_v1 }
 0x2e6   : > { %2346 = vmatprep.mubr.f32.mxu1 %v6253_v58  ;;  %3258 = vmatpush1.bf16.msra.mxu1 %v3257_v8 }
 0x2e7   : > { %3169 = vmatmul.mubr.msk.f32.vlgmr.msra.gmra.mrb[8].mxu0 %vm2389_vm13, %v2114_v45 }
 0x2e8   : > { %2484 = vmatprep.mubr.f32.mxu0 %v6253_v58 }
 0x2e9   : > { %3162 = vmatmul.mubr.msk.f32.gmra.mrb[10].mxu1 %vm2138_vm0, %v5694_v32  ;;  %v5822_v32 = vpop.permute.xlu0 %2657 }
 0x2ea   : > { %2352 = vmatprep.mubr.f32.mxu1 %v6253_v58 }
 0x2eb   : > { %3170 = vmatmul.mubr.msk.f32.gmra.mrb[10].mxu0 %vm2389_vm13, %v2115_v5 }
 0x2ec   : > { %2490 = vmatprep.mubr.f32.mxu0 %v6253_v58 }
 0x2ed   : > { %3163 = vmatmul.mubr.msk.f32.gmra.mrb[12].mxu1 %vm2138_vm0, %v5702_v27  ;;  %v5830_v22 = vpop.permute.xlu0 %2667 }
 0x2ee   : > { %2358 = vmatprep.mubr.f32.mxu1 %v6253_v58 }
 0x2ef   : > { %3171 = vmatmul.mubr.msk.f32.gmra.mrb[12].mxu0 %vm2389_vm13, %v2116_v63 }
 0x2f0   : > { %2496 = vmatprep.mubr.f32.mxu0 %v6253_v58 }
 0x2f1   : > { %3164 = vmatmul.mubr.msk.f32.gmra.mrb[14].mxu1 %vm2138_vm0, %v2125_v28  ;;  %v5838_v31 = vpop.permute.xlu0 %2677 }
 0x2f2   : > { %2364 = vmatprep.mubr.f32.mxu1 %v6253_v58 }
 0x2f3   : > { %3172 = vmatmul.mubr.msk.f32.gmra.mrb[14].mxu0 %vm2389_vm13, %v2117_v21 }
 0x2f4   : > { %2502 = vmatprep.mubr.f32.mxu0 %v6253_v58 }
 0x2f5   : > { %3165 = vmatmul.mubr.msk.f32.gmra.mrb[16].mxu1 %vm2138_vm0, %v2126_v16 }
 0x2f6   : > { %2370 = vmatprep.mubr.f32.mxu1 %v6253_v58 }
 0x2f7   : > { %3173 = vmatmul.mubr.msk.f32.gmra.mrb[16].mxu0 %vm2389_vm13, %v2118_v43 }
 0x2f8   : > { %2508 = vmatprep.mubr.f32.mxu0 %v6253_v58 }
 0x2f9   : > { %3166 = vmatmul.mubr.msk.f32.gmra.mrb[18].mxu1 %vm2138_vm0, %v2127_v55 }
 0x2fa   : > { %2376 = vmatprep.mubr.f32.mxu1 %v6253_v58 }
 0x2fb   : > { %3174 = vmatmul.mubr.msk.f32.gmra.mrb[18].mxu0 %vm2389_vm13, %v2119_v37 }
 0x2fc   : > { %2514 = vmatprep.mubr.f32.mxu0 %v6253_v58 }
 0x2fd   : > { %3167 = vmatmul.mubr.msk.f32.gmra.mrb[20].mxu1 %vm2138_vm0, %v2128_v7 }
 0x2fe   : > { %2382 = vmatprep.mubr.f32.mxu1 %v6253_v58 }
 0x2ff   : > { %3175 = vmatmul.mubr.msk.f32.gmra.mrb[20].mxu0 %vm2389_vm13, %v2120_v15 }
 0x300   : > { %2520 = vmatprep.mubr.f32.mxu0 %v6253_v58 }
 0x301   : > { %3168 = vmatmul.mubr.msk.f32.gmra.mrb[22].mxu1 %vm2138_vm0, %v2129_v13 }
 0x302   : > { %2591 = vmatprep.mubr.f32.mxu1 %v6253_v58 }
 0x303   : > { %3176 = vmatmul.mubr.msk.f32.gmra.mrb[22].mxu0 %vm2389_vm13, %v2121_v9 }
 0x304   : > { %2848 = vmatprep.mubr.f32.mxu0 %v6253_v58 }
 0x305   : > { %3177 = vmatmul.mubr.msk.f32.vlgmr.msra.gmra.mrb[8].mxu1 %vm2389_vm13, %v2114_v45 }
 0x306   : > { %2597 = vmatprep.mubr.f32.mxu1 %v6253_v58 }
 0x309   : > { %3178 = vmatmul.mubr.msk.f32.gmra.mrb[10].mxu1 %vm2389_vm13, %v2115_v5 }
 0x30a   : > { %2603 = vmatprep.mubr.f32.mxu1 %v6253_v58 }
 0x30d   : > { %3179 = vmatmul.mubr.msk.f32.gmra.mrb[12].mxu1 %vm2389_vm13, %v2116_v63 }
 0x30e   : > { %2609 = vmatprep.mubr.f32.mxu1 %v6253_v58 }
 0x311   : > { %3180 = vmatmul.mubr.msk.f32.gmra.mrb[14].mxu1 %vm2389_vm13, %v2117_v21 }
 0x312   : > { %2615 = vmatprep.mubr.f32.mxu1 %v6253_v58 }
 0x315   : > { %3181 = vmatmul.mubr.msk.f32.gmra.mrb[16].mxu1 %vm2389_vm13, %v2118_v43 }
 0x316   : > { %2621 = vmatprep.mubr.f32.mxu1 %v6253_v58 }
 0x319   : > { %3182 = vmatmul.mubr.msk.f32.gmra.mrb[18].mxu1 %vm2389_vm13, %v2119_v37 }
 0x31a   : > { %2627 = vmatprep.mubr.f32.mxu1 %v6253_v58 }
 0x31d   : > { %3183 = vmatmul.mubr.msk.f32.gmra.mrb[20].mxu1 %vm2389_vm13, %v2120_v15 }
 0x31e   : > { %2633 = vmatprep.mubr.f32.mxu1 %v6253_v58 }
 0x321   : > { %3184 = vmatmul.mubr.msk.f32.gmra.mrb[22].mxu1 %vm2389_vm13, %v2121_v9 }
 0x322   : > { %2937 = vmatprep.mubr.f32.mxu1 %v6253_v58 }
 0x3ba   : > { %v2480_v24 = vpop.f32.mrb[8].mxu0 }
 0x3bb   : > { %v2482_v35 = vpop.f32.mrb[9].mxu0  ;;  %v2680_v61 = vadd.f32 %v5811_v42, %v2480_v24 }
 0x3bc   : > { %v2681_v38 = vadd.f32 %v5811_v42, %v2482_v35 }
 0x3bd   : > { %v2712_v62 = vmax.f32 %v2680_v61, 0.0 }
 0x3be   : > { %v2486_v51 = vpop.f32.mrb[10].mxu0  ;;  %v2713_v40 = vmax.f32 %v2681_v38, 0.0 }
 0x3bf   : > { %v2684_v48 = vadd.f32 %v5814_v3, %v2486_v51  ;;  %v2488_v50 = vpop.f32.mrb[11].mxu0 }
 0x3c0   : > { %v2685_v18 = vadd.f32 %v5814_v3, %v2488_v50 }
 0x3c1   : > { %v2716_v33 = vmax.f32 %v2684_v48, 0.0 }
 0x3c2   : > { %v2717_v46 = vmax.f32 %v2685_v18, 0.0  ;;  %v2492_v23 = vpop.f32.mrb[12].mxu0 }
 0x3c3   : > { %v3261_v29 = vpack.c.bf16 %v2716_v33, %v2712_v62  ;;  %v2494_v44 = vpop.f32.mrb[13].mxu0  ;;  %v2688_v60 = vadd.f32 %v5819_v20, %v2492_v23 }
 0x3c4   : > { %v3259_v1 = vpack.c.bf16 %v2717_v46, %v2713_v40  ;;  %v2689_v27 = vadd.f32 %v5819_v20, %v2494_v44  ;;  %v5850_v46 = vld [vmem:[%s5974_s7] sm:$0xff] }
 0x3c5   : > { %v2720_v49 = vmax.f32 %v2688_v60, 0.0 }
 0x3c6   : > { %v2498_v2 = vpop.f32.mrb[14].mxu0  ;;  %3260 = vmatprep.subr.bf16.mxu0 %v3259_v1  ;;  %v2721_v0 = vmax.f32 %v2689_v27, 0.0  ;;  %v2745_v27 = vld [vmem:[%s5974_s7 + $0x8] sm:$0xff] }
 0x3c7   : > { %v2692_v10 = vadd.f32 %v5822_v32, %v2498_v2  ;;  %v2500_v56 = vpop.f32.mrb[15].mxu0  ;;  %3262 = vmatpush1.bf16.msra.mxu0 %v3261_v29 }
 0x3c8   : > { %v2693_v19 = vadd.f32 %v5822_v32, %v2500_v56 }
 0x3c9   : > { %v2724_v28 = vmax.f32 %v2692_v10, 0.0 }
 0x3ca   : > { %v2725_v12 = vmax.f32 %v2693_v19, 0.0  ;;  %v2504_v30 = vpop.f32.mrb[16].mxu0 }
 0x3cb   : > { %v3265_v4 = vpack.c.bf16 %v2724_v28, %v2720_v49  ;;  %v2506_v16 = vpop.f32.mrb[17].mxu0  ;;  %v2696_v25 = vadd.f32 %v5827_v53, %v2504_v30 }
 0x3cc   : > { %v3263_v26 = vpack.c.bf16 %v2725_v12, %v2721_v0  ;;  %v2697_v41 = vadd.f32 %v5827_v53, %v2506_v16  ;;  %v2746_v12 = vld [vmem:[%s5974_s7 + $0x10] sm:$0xff] }
 0x3cd   : > { %v2728_v6 = vmax.f32 %v2696_v25, 0.0 }
 0x3ce   : > { %v2510_v34 = vpop.f32.mrb[18].mxu0  ;;  %3264 = vmatprep.subr.bf16.mxu0 %v3263_v26  ;;  %v2729_v14 = vmax.f32 %v2697_v41, 0.0  ;;  %v2747_v41 = vld [vmem:[%s5974_s7 + $0x18] sm:$0xff] }
 0x3cf   : > { %v2700_v55 = vadd.f32 %v5830_v22, %v2510_v34  ;;  %v2512_v39 = vpop.f32.mrb[19].mxu0  ;;  %3266 = vmatpush1.bf16.msra.mxu0 %v3265_v4 }
 0x3d0   : > { %v2701_v52 = vadd.f32 %v5830_v22, %v2512_v39 }
 0x3d1   : > { %v2732_v54 = vmax.f32 %v2700_v55, 0.0 }
 0x3d2   : > { %v2733_v17 = vmax.f32 %v2701_v52, 0.0  ;;  %v2516_v7 = vpop.f32.mrb[20].mxu0 }
 0x3d3   : > { %v3269_v59 = vpack.c.bf16 %v2732_v54, %v2728_v6  ;;  %v2518_v47 = vpop.f32.mrb[21].mxu0  ;;  %v2704_v57 = vadd.f32 %v5835_v36, %v2516_v7 }
 0x3d4   : > { %v3267_v11 = vpack.c.bf16 %v2733_v17, %v2729_v14  ;;  %v2705_v13 = vadd.f32 %v5835_v36, %v2518_v47 }
 0x3d5   : > { %v2736_v37 = vmax.f32 %v2704_v57, 0.0 }
 0x3d6   : > { %v2522_v8 = vpop.f32.mrb[22].mxu0  ;;  %3268 = vmatprep.subr.bf16.mxu0 %v3267_v11  ;;  %v2737_v9 = vmax.f32 %v2705_v13, 0.0 }
 0x3d7   : > { %v2708_v45 = vadd.f32 %v5838_v31, %v2522_v8  ;;  %v2524_v5 = vpop.f32.mrb[23].mxu0  ;;  %3270 = vmatpush1.bf16.msra.mxu0 %v3269_v59 }
 0x3d8   : > { %v2593_v63 = vpop.f32.mrb[8].mxu1  ;;  %v2709_v21 = vadd.f32 %v5838_v31, %v2524_v5 }
 0x3d9   : > { %v2595_v43 = vpop.f32.mrb[9].mxu1  ;;  %v2740_v15 = vmax.f32 %v2708_v45, 0.0  ;;  %v2682_v35 = vadd.f32 %v5811_v42, %v2593_v63 }
 0x3da   : > { %v2741_v24 = vmax.f32 %v2709_v21, 0.0  ;;  %v2683_v38 = vadd.f32 %v5811_v42, %v2595_v43 }
 0x3db   : > { %v3273_v61 = vpack.c.bf16 %v2740_v15, %v2736_v37  ;;  %v2714_v33 = vmax.f32 %v2682_v35, 0.0 }
 0x3dc   : > { %v2599_v51 = vpop.f32.mrb[10].mxu1  ;;  %v3271_v48 = vpack.c.bf16 %v2741_v24, %v2737_v9  ;;  %v2715_v23 = vmax.f32 %v2683_v38, 0.0 }
 0x3dd   : > { %v2686_v50 = vadd.f32 %v5814_v3, %v2599_v51  ;;  %v2601_v18 = vpop.f32.mrb[11].mxu1  ;;  %v2760_v51 = vpop.permute.xlu0 %2759 }
 0x3de   : > { %v2687_v62 = vadd.f32 %v5814_v3, %v2601_v18  ;;  %3272 = vmatprep.subr.bf16.mxu0 %v3271_v48 }
 0x3df   : > { %v2718_v40 = vmax.f32 %v2686_v50, 0.0  ;;  %3274 = vmatpush1.bf16.msra.mxu0 %v3273_v61 }
 0x3e0   : > { %v2719_v29 = vmax.f32 %v2687_v62, 0.0  ;;  %v2605_v44 = vpop.f32.mrb[12].mxu1 }
 0x3e1   : > { %v3277_v42 = vpack.c.bf16 %v2718_v40, %v2714_v33  ;;  %v2607_v1 = vpop.f32.mrb[13].mxu1  ;;  %v2690_v3 = vadd.f32 %v5819_v20, %v2605_v44 }
 0x3e2   : > { %v3275_v60 = vpack.c.bf16 %v2719_v29, %v2715_v23  ;;  %3185 = vmatmul.mubr.msk.f32.vlgmr.msra.gmra.mrb[24].mxu0 %vm1899_vm5, %v5850_v46  ;;  %v2691_v2 = vadd.f32 %v5819_v20, %v2607_v1 }
 0x3e3   : > { %2854 = vmatprep.mubr.f32.mxu0 %v6253_v58  ;;  %v2722_v28 = vmax.f32 %v2690_v3, 0.0 }
 0x3e4   : > { %v2611_v10 = vpop.f32.mrb[14].mxu1  ;;  %3276 = vmatprep.subr.bf16.mxu1 %v3275_v60  ;;  %v2723_v30 = vmax.f32 %v2691_v2, 0.0  ;;  %v2770_v60 = vpop.permute.xlu0 %2769 }
 0x3e5   : > { %v2694_v56 = vadd.f32 %v5822_v32, %v2611_v10  ;;  %v2613_v19 = vpop.f32.mrb[15].mxu1  ;;  %3278 = vmatpush1.bf16.msra.mxu1 %v3277_v42 }
 0x3e6   : > { %v2695_v49 = vadd.f32 %v5822_v32, %v2613_v19  ;;  %3186 = vmatmul.mubr.msk.f32.gmra.mrb[26].mxu0 %vm1899_vm5, %v2745_v27 }
 0x3e7   : > { %v2726_v0 = vmax.f32 %v2694_v56, 0.0  ;;  %2860 = vmatprep.mubr.f32.mxu0 %v6253_v58 }
 0x3e8   : > { %v2727_v20 = vmax.f32 %v2695_v49, 0.0  ;;  %v2617_v4 = vpop.f32.mrb[16].mxu1 }
 0x3e9   : > { %v3281_v16 = vpack.c.bf16 %v2726_v0, %v2722_v28  ;;  %v2619_v26 = vpop.f32.mrb[17].mxu1  ;;  %v2698_v32 = vadd.f32 %v5827_v53, %v2617_v4 }
 0x3ea   : > { %v3279_v25 = vpack.c.bf16 %v2727_v20, %v2723_v30  ;;  %3187 = vmatmul.mubr.msk.f32.gmra.mrb[28].mxu0 %vm1899_vm5, %v2746_v12  ;;  %v2699_v34 = vadd.f32 %v5827_v53, %v2619_v26 }
 0x3eb   : > { %2866 = vmatprep.mubr.f32.mxu0 %v6253_v58  ;;  %v2730_v54 = vmax.f32 %v2698_v32, 0.0 }
 0x3ec   : > { %v2623_v55 = vpop.f32.mrb[18].mxu1  ;;  %3280 = vmatprep.subr.bf16.mxu1 %v3279_v25  ;;  %v2731_v17 = vmax.f32 %v2699_v34, 0.0 }
 0x3ed   : > { %v2702_v39 = vadd.f32 %v5830_v22, %v2623_v55  ;;  %v2625_v52 = vpop.f32.mrb[19].mxu1  ;;  %3282 = vmatpush1.bf16.msra.mxu1 %v3281_v16 }
 0x3ee   : > { %v2703_v6 = vadd.f32 %v5830_v22, %v2625_v52  ;;  %3188 = vmatmul.mubr.msk.f32.gmra.mrb[30].mxu0 %vm1899_vm5, %v2747_v41 }
 0x3ef   : > { %v2734_v14 = vmax.f32 %v2702_v39, 0.0 }
 0x3f0   : > { %v2735_v7 = vmax.f32 %v2703_v6, 0.0  ;;  %v2629_v59 = vpop.f32.mrb[20].mxu1 }
 0x3f1   : > { %v3285_v47 = vpack.c.bf16 %v2734_v14, %v2730_v54  ;;  %v2631_v11 = vpop.f32.mrb[21].mxu1  ;;  %v2706_v53 = vadd.f32 %v5835_v36, %v2629_v59 }
 0x3f2   : > { %v3283_v57 = vpack.c.bf16 %v2735_v7, %v2731_v17  ;;  %v2707_v13 = vadd.f32 %v5835_v36, %v2631_v11  ;;  %v2755_v36 = vpop.permute.xlu1 %2754 }
 0x3f3   : > { %v2738_v63 = vmax.f32 %v2706_v53, 0.0 }
 0x3f4   : > { %v2635_v8 = vpop.f32.mrb[22].mxu1  ;;  %3284 = vmatprep.subr.bf16.mxu1 %v3283_v57  ;;  %v2739_v43 = vmax.f32 %v2707_v13, 0.0 }
 0x3f5   : > { %v2710_v45 = vadd.f32 %v5838_v31, %v2635_v8  ;;  %v2637_v5 = vpop.f32.mrb[23].mxu1  ;;  %3286 = vmatpush1.bf16.msra.mxu1 %v3285_v47 }
 0x3f6   : > { %v2711_v22 = vadd.f32 %v5838_v31, %v2637_v5  ;;  %v2765_v40 = vpop.permute.xlu1 %2764 }
 0x3f7   : > { %v2742_v21 = vmax.f32 %v2710_v45, 0.0 }
 0x3f8   : > { %v2743_v37 = vmax.f32 %v2711_v22, 0.0 }
 0x3f9   : > { %v3289_v15 = vpack.c.bf16 %v2742_v21, %v2738_v63 }
 0x3fa   : > { %v3287_v9 = vpack.c.bf16 %v2743_v37, %v2739_v43 }
 0x3fc   : > { %3288 = vmatprep.subr.bf16.mxu1 %v3287_v9 }
 0x3fd   : > { %3290 = vmatpush1.bf16.msra.mxu1 %v3289_v15 }
 0x400   : > { %3189 = vmatmul.mubr.msk.f32.vlgmr.msra.gmra.mrb[24].mxu1 %vm1899_vm5, %v5850_v46 }
 0x401   : > { %2943 = vmatprep.mubr.f32.mxu1 %v6253_v58 }
 0x404   : > { %3190 = vmatmul.mubr.msk.f32.gmra.mrb[26].mxu1 %vm1899_vm5, %v2745_v27 }
 0x405   : > { %2949 = vmatprep.mubr.f32.mxu1 %v6253_v58 }
 0x408   : > { %3191 = vmatmul.mubr.msk.f32.gmra.mrb[28].mxu1 %vm1899_vm5, %v2746_v12 }
 0x409   : > { %2955 = vmatprep.mubr.f32.mxu1 %v6253_v58 }
 0x40c   : > { %3192 = vmatmul.mubr.msk.f32.gmra.mrb[30].mxu1 %vm1899_vm5, %v2747_v41 }
 0x4b5   : > { %v2850_v31 = vpop.f32.mrb[24].mxu0 }
 0x4b6   : > { %v2851_v24 = vadd.f32 %v2850_v31, %v2755_v36  ;;  %v2852_v35 = vpop.f32.mrb[25].mxu0 }
 0x4b7   : > { %v2853_v61 = vadd.f32 %v2852_v35, %v2755_v36 }
 0x4b8   : > { %v2962_v38 = vmax.f32 %v2851_v24, 0.0 }
 0x4b9   : > { %v2963_v48 = vmax.f32 %v2853_v61, 0.0  ;;  %v2856_v50 = vpop.f32.mrb[26].mxu0 }
 0x4ba   : > { %2978 = vst [vmem:[%s5892_s25] sm:$0xff] %v2962_v38  ;;  %v2857_v58 = vadd.f32 %v2856_v50, %v2760_v51  ;;  %v2858_v18 = vpop.f32.mrb[27].mxu0 }
 0x4bb   : > { %2979 = vst [vmem:[%s5892_s25 + $0x8] sm:$0xff] %v2963_v48  ;;  %v2859_v62 = vadd.f32 %v2858_v18, %v2760_v51 }
 0x4bc   : > { %v2966_v33 = vmax.f32 %v2857_v58, 0.0 }
 0x4bd   : > { %v2967_v46 = vmax.f32 %v2859_v62, 0.0  ;;  %v2862_v23 = vpop.f32.mrb[28].mxu0 }
 0x4be   : > { %2982 = vst [vmem:[%s5892_s25 + $0x20] sm:$0xff] %v2966_v33  ;;  %v2863_v29 = vadd.f32 %v2862_v23, %v2765_v40  ;;  %v2864_v44 = vpop.f32.mrb[29].mxu0 }
 0x4bf   : > { %2983 = vst [vmem:[%s5892_s25 + $0x28] sm:$0xff] %v2967_v46  ;;  %v2865_v42 = vadd.f32 %v2864_v44, %v2765_v40 }
 0x4c0   : > { %v2970_v1 = vmax.f32 %v2863_v29, 0.0 }
 0x4c1   : > { %v2971_v3 = vmax.f32 %v2865_v42, 0.0  ;;  %v2868_v27 = vpop.f32.mrb[30].mxu0 }
 0x4c2   : > { %2986 = vst [vmem:[%s5892_s25 + $0x40] sm:$0xff] %v2970_v1  ;;  %v2869_v2 = vadd.f32 %v2868_v27, %v2770_v60  ;;  %v2870_v10 = vpop.f32.mrb[31].mxu0 }
 0x4c3   : > { %2987 = vst [vmem:[%s5892_s25 + $0x48] sm:$0xff] %v2971_v3  ;;  %v2871_v56 = vadd.f32 %v2870_v10, %v2770_v60 }
 0x4c4   : > { %v2974_v19 = vmax.f32 %v2869_v2, 0.0 }
 0x4c5   : > { %v2975_v49 = vmax.f32 %v2871_v56, 0.0 }
 0x4c6   : > { %2990 = vst [vmem:[%s5892_s25 + $0x60] sm:$0xff] %v2974_v19 }
 0x4c7   : > { %2991 = vst [vmem:[%s5892_s25 + $0x68] sm:$0xff] %v2975_v49 }
 0x4d3   : > { %v2939_v28 = vpop.f32.mrb[24].mxu1 }
 0x4d4   : > { %v2940_v0 = vadd.f32 %v2939_v28, %v2755_v36  ;;  %v2941_v12 = vpop.f32.mrb[25].mxu1 }
 0x4d5   : > { %v2942_v30 = vadd.f32 %v2941_v12, %v2755_v36 }
 0x4d6   : > { %v2964_v20 = vmax.f32 %v2940_v0, 0.0 }
 0x4d7   : > { %v2965_v4 = vmax.f32 %v2942_v30, 0.0  ;;  %v2945_v16 = vpop.f32.mrb[26].mxu1 }
 0x4d8   : > { %2980 = vst [vmem:[%s5892_s25 + $0x10] sm:$0xff] %v2964_v20  ;;  %v2946_v26 = vadd.f32 %v2945_v16, %v2760_v51  ;;  %v2947_v25 = vpop.f32.mrb[27].mxu1 }
 0x4d9   : > { %2981 = vst [vmem:[%s5892_s25 + $0x18] sm:$0xff] %v2965_v4  ;;  %v2948_v32 = vadd.f32 %v2947_v25, %v2760_v51 }
 0x4da   : > { %v2968_v41 = vmax.f32 %v2946_v26, 0.0 }
 0x4db   : > { %v2969_v34 = vmax.f32 %v2948_v32, 0.0  ;;  %v2951_v55 = vpop.f32.mrb[28].mxu1 }
 0x4dc   : > { %2984 = vst [vmem:[%s5892_s25 + $0x30] sm:$0xff] %v2968_v41  ;;  %v2952_v39 = vadd.f32 %v2951_v55, %v2765_v40  ;;  %v2953_v52 = vpop.f32.mrb[29].mxu1 }
 0x4dd   : > { %2985 = vst [vmem:[%s5892_s25 + $0x38] sm:$0xff] %v2969_v34  ;;  %v2954_v6 = vadd.f32 %v2953_v52, %v2765_v40 }
 0x4de   : > { %v2972_v54 = vmax.f32 %v2952_v39, 0.0 }
 0x4df   : > { %v2973_v14 = vmax.f32 %v2954_v6, 0.0  ;;  %v2957_v17 = vpop.f32.mrb[30].mxu1 }
 0x4e0   : > { %2988 = vst [vmem:[%s5892_s25 + $0x50] sm:$0xff] %v2972_v54  ;;  %v2958_v7 = vadd.f32 %v2957_v17, %v2770_v60  ;;  %v2959_v59 = vpop.f32.mrb[31].mxu1 }
 0x4e1   : > { %2989 = vst [vmem:[%s5892_s25 + $0x58] sm:$0xff] %v2973_v14  ;;  %v2960_v47 = vadd.f32 %v2959_v59, %v2770_v60 }
 0x4e2   : > { %v2976_v11 = vmax.f32 %v2958_v7, 0.0 }
 0x4e3   : > { %v2977_v57 = vmax.f32 %v2960_v47, 0.0 }
 0x4e4   : > { %2992 = vst [vmem:[%s5892_s25 + $0x70] sm:$0xff] %v2976_v11 }
 0x4e5   : > { %2993 = vst [vmem:[%s5892_s25 + $0x78] sm:$0xff] %v2977_v57 }
 0x4e6   : > { %3447 = shalt.err (!%p3444_p5)
}
 0x4e7   : > { %s3448_s26 = scalar_lea.hbm %s5913_s29, 2048  ;;  %s3452_s27 = scalar_lea.hbm %s5976_s9, 4096 }
 0x4e8   : > { %p3449_p6 = scmp.ne.s32.totalorder %s5913_s29, %s3448_s26  ;;  %p3453_p10 = scmp.lt.u32.totalorder %s5913_s29, %s5976_s9 }
 0x4e9   : > { %p3454_p11 = scmp.lt.u32.totalorder %s3452_s27, %s3448_s26  ;;  %p3456_p13 = scmp.lt.u32.totalorder %s3448_s26, %s5913_s29 }
 0x4ea   : > { %p3450_p7 = pnand %p3449_p6, %p3611_p4 }
 0x4eb   : > { %p3455_p12 = por %p3454_p11, %p3453_p10 }
 0x4ec   : > { %p3451_p9 = pneg %p3450_p7 }
 0x4ed   : > { %p3457_p0 = por %p3456_p13, %p3455_p12 }
 0x4ef   : > { %p3458_p1 = pnand %p3457_p0, %p3451_p9 }
 0x4f1   : > { %3461 = shalt.err (!%p3458_p1)
}
 0x4f2   : > { %s3519_s15 = smov 512   ;;  %s3520_s18 = smov 32  }
 0x4f3   : > { %3323 = dma.vmem_to_hbm [thread:$0]  (%p3611_p4), %s5915_s24, 2048, %s5913_s29, %s5921_s12, %s3519_s15, %s3519_s15, %s3520_s18  }
 0x4f4 PF: > { %p3329_p2 = scmp.ge.s32.totalorder %s3512_s14, 2  ;;  %s3025_s20 = sand.u32 1, %s3492_s30  }
 0x4f5   : > { %s3026_s26 = scalar_lea.sflag [#allocation3], %s3025_s20 }
 0x4f6   : > { %p3326_p3 = pnand %p3329_p2, %p3618_p8 }
 0x4f8   : > { %3487 = dma.done.wait (!%p3326_p3), %s3026_s26, 2048  }
 0x4f9   : > { %3489 = vsyncadd (!%p3326_p3), %s3026_s26, 4294965248  ;;  %s22_s14 = sadd.s32 1, %s3512_s14   ;;  %s6261_s30 = smov %s3496_s10 }
 0x4fa   : > { %p19_p5 = scmp.ge.s32.totalorder %s22_s14, 4   ;;  %s6262_s10 = smov %s3500_s11 }
 0x4fb   : > { %s6263_s11 = smov %s3624_s22  ;;  %s6264_s12 = smov %s3508_s13 }
 0x4fc   : > { %s6265_s13 = smov %s6267_s17  ;;  %21 = sbr.rel (!%p19_p5) target bundleno = 4 (0x4), region = 100 }
 0x503   :  { %3031 = vsyncpa [#allocation3], 1 }
 0x504   :  { %3033 = vsyncpa [#allocation3 + $0x1], 1 }

</bundles_post_ra>
